<compile_context>
chip_gen: v7x
topology: tpu7x:2x2x1
jax: 0.10.0
libtpu: 0.0.40
codegen_flags: <defaults>
</compile_context>

<pallas_src>
import jax
import jax.numpy as jnp
from jax.experimental import pallas as pl
from jax.experimental.pallas import tpu as pltpu

FEATURES = 16
IN_DIM = 784          # 6*128 + 16 -> one masked lane-vreg per row on load/store
HID_DIM = 512
ENC_PAD = 128         # enc2 output padded 32 -> 128 (lane-dense store)
MAX_TILE_B = 512


def _vae_kernel(x_ref, w1_ref, b1_ref, w2_ref, b2_ref,
                w3_ref, b3_ref, w4_ref, b4_ref, eps_ref,
                recon_ref, enc_ref):
    # MXU operands in bf16, f32 accumulation; elementwise math in f32
    # (portable across v5e/v6e/v7x).
    x = x_ref[...].astype(jnp.bfloat16)                               # [TB, 784]

    # enc1 + relu
    h1 = jnp.dot(x, w1_ref[...],
                 preferred_element_type=jnp.float32) + b1_ref[...]
    h1 = jnp.maximum(h1, 0.0)                                         # f32 [TB, 512]

    # enc2 -> [TB, 128]; cols 0:16 = mu, 16:32 = log_var, 32:128 = zero pad
    enc = jnp.dot(h1.astype(jnp.bfloat16), w2_ref[...],
                  preferred_element_type=jnp.float32) + b2_ref[...]   # f32 [TB, 128]
    mu = enc[:, :FEATURES]
    log_var = enc[:, FEATURES:2 * FEATURES]

    # reparameterize: z = mu + eps * exp(0.5 * log_var)
    z = mu + eps_ref[...] * jnp.exp(0.5 * log_var)                    # f32 [TB, 16]

    # dec1 + relu
    h2 = jnp.dot(z.astype(jnp.bfloat16), w3_ref[...],
                 preferred_element_type=jnp.float32) + b3_ref[...]
    h2 = jnp.maximum(h2, 0.0)                                         # f32 [TB, 512]

    # dec2 + sigmoid, stored as bf16 (halves recon writeback bytes)
    logits = jnp.dot(h2.astype(jnp.bfloat16), w4_ref[...],
                     preferred_element_type=jnp.float32) + b4_ref[...]
    recon_ref[...] = jax.nn.sigmoid(logits).astype(recon_ref.dtype)   # bf16 [TB, 784]
    enc_ref[...] = enc                                                # f32  [TB, 128]


def _pick_tile_b(batch):
    """Tile in [128, 512], multiple of 128, aiming for >= 4 grid steps
    (>= 2 per TensorCore under v7x megacore sharding)."""
    bp = pl.cdiv(batch, 128) * 128
    t = (bp // 4) // 128 * 128
    return max(128, min(MAX_TILE_B, t))


def linear_vae_forward(x, params, eps, *, tile_b=None):
    """x: [B, 784] f32; params: bf16 weights / f32 biases; eps: [B, 16] f32.
    Returns (recon [B,784] bf16, mu [B,16] f32, log_var [B,16] f32)."""
    B = x.shape[0]
    if tile_b is None:
        tile_b = _pick_tile_b(B)
    Bp = pl.cdiv(B, tile_b) * tile_b
    if Bp != B:                       # pad batch rows only when not tile-aligned
        x = jnp.pad(x, ((0, Bp - B), (0, 0)))
        eps = jnp.pad(eps, ((0, Bp - B), (0, 0)))

    def batch_spec(ncols):
        return pl.BlockSpec((tile_b, ncols), lambda i: (i, 0))

    def resident_spec(arr):
        # Constant index_map -> DMA'd once, stays VMEM resident across tiles.
        return pl.BlockSpec(arr.shape, lambda i: (0, 0))

    flops = 2 * Bp * (IN_DIM * HID_DIM + HID_DIM * ENC_PAD
                      + FEATURES * HID_DIM + HID_DIM * IN_DIM)
    transcendentals = Bp * (FEATURES + IN_DIM)       # exp in reparam + sigmoid
    weight_bytes = sum(int(v.size) * v.dtype.itemsize for v in params.values())
    bytes_accessed = int(weight_bytes
                         + Bp * IN_DIM * 4            # f32 x in
                         + Bp * FEATURES * 4          # f32 eps in
                         + Bp * IN_DIM * 2            # bf16 recon out
                         + Bp * ENC_PAD * 4)          # f32 enc out

    recon_p, enc = pl.pallas_call(
        _vae_kernel,
        grid=(Bp // tile_b,),
        in_specs=[batch_spec(IN_DIM),
                  resident_spec(params["w1"]), resident_spec(params["b1"]),
                  resident_spec(params["w2"]), resident_spec(params["b2"]),
                  resident_spec(params["w3"]), resident_spec(params["b3"]),
                  resident_spec(params["w4"]), resident_spec(params["b4"]),
                  batch_spec(FEATURES)],
        out_specs=(batch_spec(IN_DIM), batch_spec(ENC_PAD)),
        out_shape=(jax.ShapeDtypeStruct((Bp, IN_DIM), jnp.bfloat16),
                   jax.ShapeDtypeStruct((Bp, ENC_PAD), jnp.float32)),
        compiler_params=pltpu.CompilerParams(
            dimension_semantics=("parallel",),
            vmem_limit_bytes=32 * 1024 * 1024),
        cost_estimate=pl.CostEstimate(
            flops=int(flops),
            transcendentals=int(transcendentals),
            bytes_accessed=bytes_accessed),
    )(x,
      params["w1"], params["b1"],
      params["w2"], params["b2"],
      params["w3"], params["b3"],
      params["w4"], params["b4"],
      eps)

    recon = recon_p[:B] if Bp != B else recon_p
    enc = enc[:B] if Bp != B else enc
    mu = enc[:, :FEATURES]
    log_var = enc[:, FEATURES:2 * FEATURES]
    return recon, mu, log_var


def _init_linear(key, fan_in, fan_out, *, pad_out=None):
    """PyTorch nn.Linear default init: U(-1/sqrt(fan_in), 1/sqrt(fan_in)).
    Weight stored as [fan_in, fan_out] (transposed vs. torch) in bf16 for the
    MXU; bias stays f32. Optional zero-padding of the output dim."""
    kw, kb = jax.random.split(key)
    bound = 1.0 / float(fan_in) ** 0.5
    w = jax.random.uniform(kw, (fan_in, fan_out), jnp.float32, -bound, bound)
    b = jax.random.uniform(kb, (1, fan_out), jnp.float32, -bound, bound)
    if pad_out is not None and pad_out > fan_out:
        w = jnp.pad(w, ((0, 0), (0, pad_out - fan_out)))
        b = jnp.pad(b, ((0, 0), (0, pad_out - fan_out)))
    return w.astype(jnp.bfloat16), b


def init_params(key):
    k1, k2, k3, k4 = jax.random.split(key, 4)
    w1, b1 = _init_linear(k1, IN_DIM, HID_DIM)                        # enc1: 784 -> 512
    w2, b2 = _init_linear(k2, HID_DIM, FEATURES * 2, pad_out=ENC_PAD)  # enc2: 512 -> 32 (pad 128)
    w3, b3 = _init_linear(k3, FEATURES, HID_DIM)                      # dec1: 16  -> 512
    w4, b4 = _init_linear(k4, HID_DIM, IN_DIM)                        # dec2: 512 -> 784
    return {"w1": w1, "b1": b1, "w2": w2, "b2": b2,
            "w3": w3, "b3": b3, "w4": w4, "b4": b4}


def reference_forward(x, params, eps):
    """Pure-JAX reference mirroring the kernel's dtypes (bf16 MXU / f32 acc)."""
    h1 = jnp.maximum(
        jnp.dot(x.astype(jnp.bfloat16), params["w1"],
                preferred_element_type=jnp.float32) + params["b1"], 0.0)
    enc = jnp.dot(h1.astype(jnp.bfloat16), params["w2"],
                  preferred_element_type=jnp.float32) + params["b2"]
    mu = enc[:, :FEATURES]
    log_var = enc[:, FEATURES:2 * FEATURES]
    z = mu + eps * jnp.exp(0.5 * log_var)
    h2 = jnp.maximum(
        jnp.dot(z.astype(jnp.bfloat16), params["w3"],
                preferred_element_type=jnp.float32) + params["b3"], 0.0)
    recon = jax.nn.sigmoid(
        jnp.dot(h2.astype(jnp.bfloat16), params["w4"],
                preferred_element_type=jnp.float32) + params["b4"])
    return recon.astype(jnp.bfloat16), mu, log_var


if __name__ == "__main__":
    key = jax.random.PRNGKey(0)
    k_params, k_x, k_eps = jax.random.split(key, 3)

    B = 256  # tile picker -> tile_b=128, two grid steps (exercises pipelining)
    params = init_params(k_params)
    x = jax.random.normal(k_x, (B, IN_DIM), jnp.float32)
    eps = jax.random.normal(k_eps, (B, FEATURES), jnp.float32)

    recon, mu, log_var = jax.jit(linear_vae_forward)(x, params, eps)
    jax.block_until_ready((recon, mu, log_var))

    # sanity check against pure-JAX reference
    r_ref, mu_ref, lv_ref = reference_forward(x, params, eps)
    assert recon.shape == (B, IN_DIM) and recon.dtype == jnp.bfloat16
    assert mu.shape == (B, FEATURES)
    assert log_var.shape == (B, FEATURES)
    assert jnp.allclose(recon.astype(jnp.float32), r_ref.astype(jnp.float32),
                        atol=1e-2, rtol=1e-2)
    assert jnp.allclose(mu, mu_ref, atol=2e-3, rtol=2e-3)
    assert jnp.allclose(log_var, lv_ref, atol=2e-3, rtol=2e-3)

    print("KERNEL_OK")
</pallas_src>

<mosaic_0001>
module attributes {stable_mosaic.version = 11 : i64} {
  func.func @_vae_kernel(%arg0: i32, %arg1: memref<128x784xf32, #tpu.memory_space<vmem>>, %arg2: memref<784x512xbf16, #tpu.memory_space<vmem>>, %arg3: memref<1x512xf32, #tpu.memory_space<vmem>>, %arg4: memref<512x128xbf16, #tpu.memory_space<vmem>>, %arg5: memref<1x128xf32, #tpu.memory_space<vmem>>, %arg6: memref<16x512xbf16, #tpu.memory_space<vmem>>, %arg7: memref<1x512xf32, #tpu.memory_space<vmem>>, %arg8: memref<512x784xbf16, #tpu.memory_space<vmem>>, %arg9: memref<1x784xf32, #tpu.memory_space<vmem>>, %arg10: memref<128x16xf32, #tpu.memory_space<vmem>>, %arg11: memref<128x784xbf16, #tpu.memory_space<vmem>>, %arg12: memref<128x128xf32, #tpu.memory_space<vmem>>) attributes {dimension_semantics = [#tpu.dimension_semantics<parallel>], iteration_bounds = array<i64: 2>, scalar_prefetch = 0 : i64, scratch_operands = 0 : i64, tpu.core_type = #tpu.core_type<tc>, window_params = [{transform_indices = @transform_0, window_bounds = array<i64: 128, 784>}, {pipeline_mode = #tpu.pipeline_mode<synchronous>, transform_indices = @transform_1, window_bounds = array<i64: 784, 512>}, {pipeline_mode = #tpu.pipeline_mode<synchronous>, transform_indices = @transform_2, window_bounds = array<i64: 1, 512>}, {pipeline_mode = #tpu.pipeline_mode<synchronous>, transform_indices = @transform_3, window_bounds = array<i64: 512, 128>}, {pipeline_mode = #tpu.pipeline_mode<synchronous>, transform_indices = @transform_4, window_bounds = array<i64: 1, 128>}, {pipeline_mode = #tpu.pipeline_mode<synchronous>, transform_indices = @transform_5, window_bounds = array<i64: 16, 512>}, {pipeline_mode = #tpu.pipeline_mode<synchronous>, transform_indices = @transform_6, window_bounds = array<i64: 1, 512>}, {pipeline_mode = #tpu.pipeline_mode<synchronous>, transform_indices = @transform_7, window_bounds = array<i64: 512, 784>}, {pipeline_mode = #tpu.pipeline_mode<synchronous>, transform_indices = @transform_8, window_bounds = array<i64: 1, 784>}, {transform_indices = @transform_9, window_bounds = array<i64: 128, 16>}, {transform_indices = @transform_10, window_bounds = array<i64: 128, 784>}, {transform_indices = @transform_11, window_bounds = array<i64: 128, 128>}]} {
    %c0 = arith.constant 0 : index
    %c0_0 = arith.constant 0 : index
    %0 = vector.load %arg1[%c0, %c0_0] : memref<128x784xf32, #tpu.memory_space<vmem>>, vector<128x784xf32>
    %1 = arith.truncf %0 : vector<128x784xf32> to vector<128x784xbf16>
    %c0_1 = arith.constant 0 : index
    %c0_2 = arith.constant 0 : index
    %2 = vector.load %arg2[%c0_1, %c0_2] : memref<784x512xbf16, #tpu.memory_space<vmem>>, vector<784x512xbf16>
    %cst = arith.constant dense<0.000000e+00> : vector<128x512xf32>
    %3 = tpu.matmul %1, %2, %cst {dimension_numbers = #tpu.dot_dimension_numbers<[1], [0], [0], [1], [0, 0, 1, 1], [], []>} : vector<128x784xbf16>, vector<784x512xbf16>, vector<128x512xf32> -> vector<128x512xf32>
    %c0_3 = arith.constant 0 : index
    %c0_4 = arith.constant 0 : index
    %4 = vector.load %arg3[%c0_3, %c0_4] : memref<1x512xf32, #tpu.memory_space<vmem>>, vector<1x512xf32>
    %5 = vector.broadcast %4 : vector<1x512xf32> to vector<128x512xf32>
    %6 = arith.addf %3, %5 : vector<128x512xf32>
    %cst_5 = arith.constant 0.000000e+00 : f32
    %7 = vector.broadcast %cst_5 : f32 to vector<128x512xf32>
    %8 = arith.maximumf %6, %7 : vector<128x512xf32>
    %9 = arith.truncf %8 : vector<128x512xf32> to vector<128x512xbf16>
    %c0_6 = arith.constant 0 : index
    %c0_7 = arith.constant 0 : index
    %10 = vector.load %arg4[%c0_6, %c0_7] : memref<512x128xbf16, #tpu.memory_space<vmem>>, vector<512x128xbf16>
    %cst_8 = arith.constant dense<0.000000e+00> : vector<128x128xf32>
    %11 = tpu.matmul %9, %10, %cst_8 {dimension_numbers = #tpu.dot_dimension_numbers<[1], [0], [0], [1], [0, 0, 1, 1], [], []>} : vector<128x512xbf16>, vector<512x128xbf16>, vector<128x128xf32> -> vector<128x128xf32>
    %c0_9 = arith.constant 0 : index
    %c0_10 = arith.constant 0 : index
    %12 = vector.load %arg5[%c0_9, %c0_10] : memref<1x128xf32, #tpu.memory_space<vmem>>, vector<1x128xf32>
    %13 = vector.broadcast %12 : vector<1x128xf32> to vector<128x128xf32>
    %14 = arith.addf %11, %13 : vector<128x128xf32>
    %15 = vector.extract_strided_slice %14 {offsets = [0, 0], sizes = [128, 16], strides = [1, 1]} : vector<128x128xf32> to vector<128x16xf32>
    %16 = vector.extract_strided_slice %14 {offsets = [0, 16], sizes = [128, 16], strides = [1, 1]} : vector<128x128xf32> to vector<128x16xf32>
    %c0_11 = arith.constant 0 : index
    %c0_12 = arith.constant 0 : index
    %17 = vector.load %arg10[%c0_11, %c0_12] : memref<128x16xf32, #tpu.memory_space<vmem>>, vector<128x16xf32>
    %cst_13 = arith.constant 5.000000e-01 : f32
    %18 = vector.broadcast %cst_13 : f32 to vector<128x16xf32>
    %19 = arith.mulf %18, %16 : vector<128x16xf32>
    %20 = math.exp %19 : vector<128x16xf32>
    %21 = arith.mulf %17, %20 : vector<128x16xf32>
    %22 = arith.addf %15, %21 : vector<128x16xf32>
    %23 = arith.truncf %22 : vector<128x16xf32> to vector<128x16xbf16>
    %c0_14 = arith.constant 0 : index
    %c0_15 = arith.constant 0 : index
    %24 = vector.load %arg6[%c0_14, %c0_15] : memref<16x512xbf16, #tpu.memory_space<vmem>>, vector<16x512xbf16>
    %cst_16 = arith.constant dense<0.000000e+00> : vector<128x512xf32>
    %25 = tpu.matmul %23, %24, %cst_16 {dimension_numbers = #tpu.dot_dimension_numbers<[1], [0], [0], [1], [0, 0, 1, 1], [], []>} : vector<128x16xbf16>, vector<16x512xbf16>, vector<128x512xf32> -> vector<128x512xf32>
    %c0_17 = arith.constant 0 : index
    %c0_18 = arith.constant 0 : index
    %26 = vector.load %arg7[%c0_17, %c0_18] : memref<1x512xf32, #tpu.memory_space<vmem>>, vector<1x512xf32>
    %27 = vector.broadcast %26 : vector<1x512xf32> to vector<128x512xf32>
    %28 = arith.addf %25, %27 : vector<128x512xf32>
    %cst_19 = arith.constant 0.000000e+00 : f32
    %29 = vector.broadcast %cst_19 : f32 to vector<128x512xf32>
    %30 = arith.maximumf %28, %29 : vector<128x512xf32>
    %31 = arith.truncf %30 : vector<128x512xf32> to vector<128x512xbf16>
    %c0_20 = arith.constant 0 : index
    %c0_21 = arith.constant 0 : index
    %32 = vector.load %arg8[%c0_20, %c0_21] : memref<512x784xbf16, #tpu.memory_space<vmem>>, vector<512x784xbf16>
    %cst_22 = arith.constant dense<0.000000e+00> : vector<128x784xf32>
    %33 = tpu.matmul %31, %32, %cst_22 {dimension_numbers = #tpu.dot_dimension_numbers<[1], [0], [0], [1], [0, 0, 1, 1], [], []>} : vector<128x512xbf16>, vector<512x784xbf16>, vector<128x784xf32> -> vector<128x784xf32>
    %c0_23 = arith.constant 0 : index
    %c0_24 = arith.constant 0 : index
    %34 = vector.load %arg9[%c0_23, %c0_24] : memref<1x784xf32, #tpu.memory_space<vmem>>, vector<1x784xf32>
    %35 = vector.broadcast %34 : vector<1x784xf32> to vector<128x784xf32>
    %36 = arith.addf %33, %35 : vector<128x784xf32>
    %37 = arith.negf %36 : vector<128x784xf32>
    %38 = math.exp %37 : vector<128x784xf32>
    %cst_25 = arith.constant 1.000000e+00 : f32
    %39 = vector.broadcast %cst_25 : f32 to vector<128x784xf32>
    %40 = arith.addf %39, %38 : vector<128x784xf32>
    %41 = arith.divf %39, %40 : vector<128x784xf32>
    %42 = arith.truncf %41 : vector<128x784xf32> to vector<128x784xbf16>
    %c0_26 = arith.constant 0 : index
    %c0_27 = arith.constant 0 : index
    %43 = vector.load %arg11[%c0_26, %c0_27] : memref<128x784xbf16, #tpu.memory_space<vmem>>, vector<128x784xbf16>
    tpu.vector_store %arg11[%c0_26, %c0_27], %42 {strides = array<i32>} : memref<128x784xbf16, #tpu.memory_space<vmem>>, vector<128x784xbf16>,
    %c0_28 = arith.constant 0 : index
    %c0_29 = arith.constant 0 : index
    %44 = vector.load %arg12[%c0_28, %c0_29] : memref<128x128xf32, #tpu.memory_space<vmem>>, vector<128x128xf32>
    tpu.vector_store %arg12[%c0_28, %c0_29], %14 {strides = array<i32>} : memref<128x128xf32, #tpu.memory_space<vmem>>, vector<128x128xf32>,
    return
  }
  func.func @transform_0(%arg0: i32) -> (i32, i32) {
    %c0_i32 = arith.constant 0 : i32
    %c0_i32_0 = arith.constant 0 : i32
    return %arg0, %c0_i32 : i32, i32
  }
  func.func @transform_1(%arg0: i32) -> (i32, i32) {
    %c0_i32 = arith.constant 0 : i32
    %c0_i32_0 = arith.constant 0 : i32
    %c0_i32_1 = arith.constant 0 : i32
    return %c0_i32, %c0_i32_0 : i32, i32
  }
  func.func @transform_2(%arg0: i32) -> (i32, i32) {
    %c0_i32 = arith.constant 0 : i32
    %c0_i32_0 = arith.constant 0 : i32
    %c0_i32_1 = arith.constant 0 : i32
    return %c0_i32, %c0_i32_0 : i32, i32
  }
  func.func @transform_3(%arg0: i32) -> (i32, i32) {
    %c0_i32 = arith.constant 0 : i32
    %c0_i32_0 = arith.constant 0 : i32
    %c0_i32_1 = arith.constant 0 : i32
    return %c0_i32, %c0_i32_0 : i32, i32
  }
  func.func @transform_4(%arg0: i32) -> (i32, i32) {
    %c0_i32 = arith.constant 0 : i32
    %c0_i32_0 = arith.constant 0 : i32
    %c0_i32_1 = arith.constant 0 : i32
    return %c0_i32, %c0_i32_0 : i32, i32
  }
  func.func @transform_5(%arg0: i32) -> (i32, i32) {
    %c0_i32 = arith.constant 0 : i32
    %c0_i32_0 = arith.constant 0 : i32
    %c0_i32_1 = arith.constant 0 : i32
    return %c0_i32, %c0_i32_0 : i32, i32
  }
  func.func @transform_6(%arg0: i32) -> (i32, i32) {
    %c0_i32 = arith.constant 0 : i32
    %c0_i32_0 = arith.constant 0 : i32
    %c0_i32_1 = arith.constant 0 : i32
    return %c0_i32, %c0_i32_0 : i32, i32
  }
  func.func @transform_7(%arg0: i32) -> (i32, i32) {
    %c0_i32 = arith.constant 0 : i32
    %c0_i32_0 = arith.constant 0 : i32
    %c0_i32_1 = arith.constant 0 : i32
    return %c0_i32, %c0_i32_0 : i32, i32
  }
  func.func @transform_8(%arg0: i32) -> (i32, i32) {
    %c0_i32 = arith.constant 0 : i32
    %c0_i32_0 = arith.constant 0 : i32
    %c0_i32_1 = arith.constant 0 : i32
    return %c0_i32, %c0_i32_0 : i32, i32
  }
  func.func @transform_9(%arg0: i32) -> (i32, i32) {
    %c0_i32 = arith.constant 0 : i32
    %c0_i32_0 = arith.constant 0 : i32
    return %arg0, %c0_i32 : i32, i32
  }
  func.func @transform_10(%arg0: i32) -> (i32, i32) {
    %c0_i32 = arith.constant 0 : i32
    %c0_i32_0 = arith.constant 0 : i32
    return %arg0, %c0_i32 : i32, i32
  }
  func.func @transform_11(%arg0: i32) -> (i32, i32) {
    %c0_i32 = arith.constant 0 : i32
    %c0_i32_0 = arith.constant 0 : i32
    return %arg0, %c0_i32 : i32, i32
  }
}

</mosaic_0001>

<bundles_post_ra>
// kernel: linear_vae_forward.1
= control target key start
LH: loop header
LB: loop body
LE: loop exit
PB: predicated region body
PF: predicated region fallthrough
CT: control target
= control target key end

     0   :  { %s10029_s17 = smov 0   ;;  %s12599_s0 = inlined_call_operand.vmem [shape: f32[256,784], index: 0, kind: input, shape index: {}]   ;;  %s12600_s1 = inlined_call_operand.vmem [shape: bf16[784,512], index: 1, kind: input, shape index: {}]   ;;  %s12601_s2 = inlined_call_operand.vmem [shape: f32[1,512], index: 2, kind: input, shape index: {}]   ;;  %s12602_s3 = inlined_call_operand.vmem [shape: bf16[512,128], index: 3, kind: input, shape index: {}]   ;;  %s12603_s4 = inlined_call_operand.vmem [shape: f32[1,128], index: 4, kind: input, shape index: {}]   ;;  %s12604_s5 = inlined_call_operand.vmem [shape: bf16[16,512], index: 5, kind: input, shape index: {}]   ;;  %s12605_s6 = inlined_call_operand.vmem [shape: f32[1,512], index: 6, kind: input, shape index: {}]   ;;  %s12606_s7 = inlined_call_operand.vmem [shape: bf16[512,784], index: 7, kind: input, shape index: {}]   ;;  %s12607_s8 = inlined_call_operand.vmem [shape: f32[1,784], index: 8, kind: input, shape index: {}]   ;;  %s12608_s9 = inlined_call_operand.vmem [shape: f32[256,16], index: 9, kind: input, shape index: {}]   ;;  %s12609_s10 = inlined_call_operand.vmem [shape: bf16[256,784], index: 10, kind: output, shape index: {0}]   ;;  %s12610_s11 = inlined_call_operand.vmem [shape: f32[256,128], index: 11, kind: output, shape index: {1}]  }
   0x1 LB: > { %s7366_s18 = sadd.s32 4294967295, %s9965_s17   ;;  %p7370_p0 = scmp.ge.s32.totalorder %s9965_s17, 1  ;;  %s9965_s17 = sphi %s10029_s17, %s22_s17  }
   0x2   : > { %p353_p1 = scmp.lt.s32.totalorder %s9965_s17, 3 }
   0x4   : > { %p354_p2 = pnand %p7370_p0, %p353_p1 }
   0x5   : > { %v8826_v0 = vld [vmem:[%s12600_s1 + $0x4] ss:$16 sps:$4 sm:$0xff] (!%p354_p2)   ;;  %v8828_v1 = vld [vmem:[%s12600_s1 + $0xc] ss:$16 sps:$4 sm:$0xff] (!%p354_p2)   ;;  %v8830_v2 = vld [vmem:[%s12600_s1] ss:$16 sps:$4 sm:$0xff] (!%p354_p2)  }
   0x6   : > { %357 = sbr.rel (%p354_p2) target bundleno = 1592 (0x638), region = 60  ;;  %1823 = vmatprep.subr.bf16.mxu0 (!%p354_p2), %v8826_v0  ;;  %v8831_v3 = vld [vmem:[%s12600_s1 + $0x8] ss:$16 sps:$4 sm:$0xff] (!%p354_p2)   ;;  %2275 = vmatprep.subr.bf16.mxu1 (!%p354_p2), %v8828_v1  ;;  %v8832_v4 = vld [vmem:[%s12600_s1 + $0x24] ss:$16 sps:$4 sm:$0xff] (!%p354_p2)   ;;  %s7371_s26 = sshll.u32 (!%p354_p2), %s7366_s18, 4 }
   0x7   : > { %1824 = vmatpush1.bf16.msra.mxu0 (!%p354_p2), %v8830_v2  ;;  %2276 = vmatpush1.bf16.msra.mxu1 (!%p354_p2), %v8831_v3  ;;  %v8834_v5 = vld [vmem:[%s12600_s1 + $0x2c] ss:$16 sps:$4 sm:$0xff] (!%p354_p2)   ;;  %v8836_v6 = vld [vmem:[%s12600_s1 + $0x20] ss:$16 sps:$4 sm:$0xff] (!%p354_p2)   ;;  %v8837_v7 = vld [vmem:[%s12600_s1 + $0x28] ss:$16 sps:$4 sm:$0xff] (!%p354_p2)  }
   0x8   : > { %1825 = vmatprep.subr.bf16.mxu0 (!%p354_p2), %v8832_v4  ;;  %2277 = vmatprep.subr.bf16.mxu1 (!%p354_p2), %v8834_v5  ;;  %v8838_v8 = vld [vmem:[%s12600_s1 + $0x44] ss:$16 sps:$4 sm:$0xff] (!%p354_p2)   ;;  %v8840_v9 = vld [vmem:[%s12600_s1 + $0x4c] ss:$16 sps:$4 sm:$0xff] (!%p354_p2)   ;;  %v8842_v10 = vld [vmem:[%s12600_s1 + $0x40] ss:$16 sps:$4 sm:$0xff] (!%p354_p2)  }
   0x9   : > { %v8843_v11 = vld [vmem:[%s12600_s1 + $0x48] ss:$16 sps:$4 sm:$0xff] (!%p354_p2)   ;;  %v8844_v12 = vld [vmem:[%s12600_s1 + $0x64] ss:$16 sps:$4 sm:$0xff] (!%p354_p2)   ;;  %v8846_v13 = vld [vmem:[%s12600_s1 + $0x6c] ss:$16 sps:$4 sm:$0xff] (!%p354_p2)  }
   0xa   : > { %v8848_v14 = vld [vmem:[%s12600_s1 + $0x60] ss:$16 sps:$4 sm:$0xff] (!%p354_p2)   ;;  %v8849_v15 = vld [vmem:[%s12600_s1 + $0x68] ss:$16 sps:$4 sm:$0xff] (!%p354_p2)   ;;  %v8850_v16 = vld [vmem:[%s12600_s1 + $0x84] ss:$16 sps:$4 sm:$0xff] (!%p354_p2)  }
   0xb   : > { %1826 = vmatpush1.bf16.msra.mxu0 (!%p354_p2), %v8836_v6  ;;  %2278 = vmatpush1.bf16.msra.mxu1 (!%p354_p2), %v8837_v7  ;;  %v8852_v17 = vld [vmem:[%s12600_s1 + $0x8c] ss:$16 sps:$4 sm:$0xff] (!%p354_p2)   ;;  %v8854_v18 = vld [vmem:[%s12600_s1 + $0x80] ss:$16 sps:$4 sm:$0xff] (!%p354_p2)   ;;  %v8855_v19 = vld [vmem:[%s12600_s1 + $0x88] ss:$16 sps:$4 sm:$0xff] (!%p354_p2)  }
   0xc   : > { %1827 = vmatprep.subr.bf16.mxu0 (!%p354_p2), %v8838_v8  ;;  %2279 = vmatprep.subr.bf16.mxu1 (!%p354_p2), %v8840_v9  ;;  %v8856_v20 = vld [vmem:[%s12600_s1 + $0xa4] ss:$16 sps:$4 sm:$0xff] (!%p354_p2)   ;;  %v8858_v21 = vld [vmem:[%s12600_s1 + $0xac] ss:$16 sps:$4 sm:$0xff] (!%p354_p2)   ;;  %v8860_v22 = vld [vmem:[%s12600_s1 + $0xa0] ss:$16 sps:$4 sm:$0xff] (!%p354_p2)  }
   0xd   : > { %v8861_v23 = vld [vmem:[%s12600_s1 + $0xa8] ss:$16 sps:$4 sm:$0xff]   ;;  %v8862_v24 = vld [vmem:[%s12600_s1 + $0xc4] ss:$16 sps:$4 sm:$0xff]   ;;  %v8864_v25 = vld [vmem:[%s12600_s1 + $0xcc] ss:$16 sps:$4 sm:$0xff]  }
   0xe   : > { %v8866_v26 = vld [vmem:[%s12600_s1 + $0xc0] ss:$16 sps:$4 sm:$0xff]   ;;  %v8867_v27 = vld [vmem:[%s12600_s1 + $0xc8] ss:$16 sps:$4 sm:$0xff]   ;;  %v8868_v28 = vld [vmem:[%s12600_s1 + $0xe4] ss:$16 sps:$4 sm:$0xff]  }
   0xf   : > { %1828 = vmatpush1.bf16.msra.mxu0 %v8842_v10  ;;  %2280 = vmatpush1.bf16.msra.mxu1 %v8843_v11  ;;  %v8870_v29 = vld [vmem:[%s12600_s1 + $0xec] ss:$16 sps:$4 sm:$0xff]   ;;  %v8872_v30 = vld [vmem:[%s12600_s1 + $0xe0] ss:$16 sps:$4 sm:$0xff]   ;;  %p406_p3 = scmp.lt.s32.totalorder %s7371_s26, 31  ;;  %vm1798_vm0 = vcmask 130048  }
  0x10   : > { %1829 = vmatprep.subr.bf16.mxu0 %v8844_v12  ;;  %2281 = vmatprep.subr.bf16.mxu1 %v8846_v13  ;;  %v8873_v31 = vld [vmem:[%s12600_s1 + $0xe8] ss:$16 sps:$4 sm:$0xff]   ;;  %v8874_v32 = vld [vmem:[%s12600_s1 + $0x104] ss:$16 sps:$4 sm:$0xff]   ;;  %v8876_v33 = vld [vmem:[%s12600_s1 + $0x10c] ss:$16 sps:$4 sm:$0xff]  }
  0x11   : > { %v8878_v34 = vld [vmem:[%s12600_s1 + $0x100] ss:$16 sps:$4 sm:$0xff]   ;;  %v8879_v35 = vld [vmem:[%s12600_s1 + $0x108] ss:$16 sps:$4 sm:$0xff]   ;;  %s12612_s26 = smov (!%p406_p3, %s7371_s26), 31  ;;  %s9968_s24 = smov 112  }
  0x12   : > { %v8880_v36 = vld [vmem:[%s12600_s1 + $0x124] ss:$16 sps:$4 sm:$0xff]   ;;  %v8882_v37 = vld [vmem:[%s12600_s1 + $0x12c] ss:$16 sps:$4 sm:$0xff]   ;;  %v8884_v38 = vld [vmem:[%s12600_s1 + $0x120] ss:$16 sps:$4 sm:$0xff]  }
  0x13   : > { %1830 = vmatpush1.bf16.msra.mxu0 %v8848_v14  ;;  %2282 = vmatpush1.bf16.msra.mxu1 %v8849_v15  ;;  %s8814_s30 = smul.u32 56, %s12612_s26  ;;  %v8885_v39 = vld [vmem:[%s12600_s1 + $0x128] ss:$16 sps:$4 sm:$0xff]   ;;  %v8886_v40 = vld [vmem:[%s12600_s1 + $0x144] ss:$16 sps:$4 sm:$0xff]   ;;  %s7374_s15 = sshll.u32 %s12612_s26, 3 }
  0x14   : > { %1831 = vmatprep.subr.bf16.mxu0 %v8850_v16  ;;  %2283 = vmatprep.subr.bf16.mxu1 %v8852_v17  ;;  %v8888_v41 = vld [vmem:[%s12600_s1 + $0x14c] ss:$16 sps:$4 sm:$0xff]   ;;  %v8890_v42 = vld [vmem:[%s12600_s1 + $0x140] ss:$16 sps:$4 sm:$0xff]   ;;  %v8891_v43 = vld [vmem:[%s12600_s1 + $0x148] ss:$16 sps:$4 sm:$0xff]   ;;  %s10988_s19 = scalar_lea.vmem %s12610_s11, %s7374_s15  ;;  %s11118_s14 = scalar_lea.vmem %s12608_s9, %s7374_s15 }
  0x15   : > { %s10177_s25 = scalar_lea.vmem %s12599_s0, %s8814_s30  ;;  %v8892_v44 = vld [vmem:[%s12600_s1 + $0x164] ss:$16 sps:$4 sm:$0xff]   ;;  %v8894_v45 = vld [vmem:[%s12600_s1 + $0x16c] ss:$16 sps:$4 sm:$0xff]   ;;  %v8896_v47 = vld [vmem:[%s12600_s1 + $0x160] ss:$16 sps:$4 sm:$0xff]  }
  0x16   : > { %v433_v46 = vld [vmem:[%s10177_s25 + $0x8] sm:$0xff]  ;;  %v440_v49 = vld [vmem:[%s10177_s25 + $0x40] sm:$0xff]  ;;  %v439_v4 = vld [vmem:[%s10177_s25 + $0x38] sm:$0xff]  ;;  %s8815_s27 = smul.u32 28, %s12612_s26  ;;  %vm7184_vm1 = vcmask 125952  }
  0x17   : > { %1832 = vmatpush1.bf16.msra.mxu0 %v8854_v18  ;;  %2284 = vmatpush1.bf16.msra.mxu1 %v8855_v19  ;;  %v8897_v48 = vld [vmem:[%s12600_s1 + $0x168] ss:$16 sps:$4 sm:$0xff]   ;;  %v8898_v50 = vld [vmem:[%s12600_s1 + $0x184] ss:$16 sps:$4 sm:$0xff]   ;;  %v545_v51 = vpack.c.bf16 %v440_v49, %v433_v46  ;;  %v8900_v52 = vld [vmem:[%s12600_s1 + $0x18c] ss:$16 sps:$4 sm:$0xff]  }
  0x18   : > { %1833 = vmatprep.subr.bf16.mxu0 %v8856_v20  ;;  %2285 = vmatprep.subr.bf16.mxu1 %v8858_v21  ;;  %v8902_v53 = vld [vmem:[%s12600_s1 + $0x180] ss:$16 sps:$4 sm:$0xff]   ;;  %v8903_v54 = vld [vmem:[%s12600_s1 + $0x188] ss:$16 sps:$4 sm:$0xff]   ;;  %v8904_v55 = vld [vmem:[%s12600_s1 + $0x1a4] ss:$16 sps:$4 sm:$0xff]   ;;  %s12174_s29 = scalar_lea.vmem %s12609_s10, %s8815_s27 }
  0x19   : > { %1855 = vmatprep.mubr.bf16.mxu0 %v545_v51  ;;  %2307 = vmatprep.mubr.bf16.mxu1 %v545_v51  ;;  %v8906_v56 = vld [vmem:[%s12600_s1 + $0x1ac] ss:$16 sps:$4 sm:$0xff]   ;;  %v8908_v57 = vld [vmem:[%s12600_s1 + $0x1a0] ss:$16 sps:$4 sm:$0xff]   ;;  %v8909_v58 = vld [vmem:[%s12600_s1 + $0x1a8] ss:$16 sps:$4 sm:$0xff]  }
  0x1a   : > { %v8910_v59 = vld [vmem:[%s12600_s1 + $0x1c4] ss:$16 sps:$4 sm:$0xff]   ;;  %v8912_v60 = vld [vmem:[%s12600_s1 + $0x1cc] ss:$16 sps:$4 sm:$0xff]   ;;  %v8914_v61 = vld [vmem:[%s12600_s1 + $0x1c0] ss:$16 sps:$4 sm:$0xff]  }
  0x1b   : > { %1834 = vmatpush1.bf16.msra.mxu0 %v8860_v22  ;;  %2286 = vmatpush1.bf16.msra.mxu1 %v8861_v23  ;;  %v8915_v62 = vld [vmem:[%s12600_s1 + $0x1c8] ss:$16 sps:$4 sm:$0xff]   ;;  %v8916_v63 = vld [vmem:[%s12600_s1 + $0x1e4] ss:$16 sps:$4 sm:$0xff]   ;;  %v8918_v0 = vld [vmem:[%s12600_s1 + $0x1ec] ss:$16 sps:$4 sm:$0xff]  }
  0x1c   : > { %1835 = vmatprep.subr.bf16.mxu0 %v8862_v24  ;;  %2287 = vmatprep.subr.bf16.mxu1 %v8864_v25  ;;  %v8920_v1 = vld [vmem:[%s12600_s1 + $0x1e0] ss:$16 sps:$4 sm:$0xff]   ;;  %v8921_v2 = vld [vmem:[%s12600_s1 + $0x1e8] ss:$16 sps:$4 sm:$0xff]   ;;  %v8924_v5 = vld [vmem:[%s12600_s1 + $0x204] ss:$16 sps:$4 sm:$0xff]  }
  0x1d   : > { %v432_v3 = vld [vmem:[%s10177_s25] sm:$0xff]  ;;  %v8927_v6 = vld [vmem:[%s12600_s1 + $0x20c] ss:$16 sps:$4 sm:$0xff]   ;;  %v8925_v9 = vld [vmem:[%s12600_s1 + $0x208] ss:$16 sps:$4 sm:$0xff]  }
  0x1e   : > { %v8922_v7 = vld [vmem:[%s12600_s1 + $0x200] ss:$16 sps:$4 sm:$0xff]   ;;  %v544_v8 = vpack.c.bf16 %v439_v4, %v432_v3  ;;  %v447_v10 = vld [vmem:[%s10177_s25 + $0x78] sm:$0xff]  ;;  %v8930_v12 = vld [vmem:[%s12600_s1 + $0x224] ss:$16 sps:$4 sm:$0xff]  }
  0x1f   : > { %1836 = vmatpush1.bf16.msra.mxu0 %v8866_v26  ;;  %2288 = vmatpush1.bf16.msra.mxu1 %v8867_v27  ;;  %v454_v11 = vld [vmem:[%s10177_s25 + $0xb0] sm:$0xff]  ;;  %v8933_v13 = vld [vmem:[%s12600_s1 + $0x22c] ss:$16 sps:$4 sm:$0xff]   ;;  %v8931_v16 = vld [vmem:[%s12600_s1 + $0x228] ss:$16 sps:$4 sm:$0xff]  }
  0x20   : > { %1837 = vmatprep.subr.bf16.mxu0 %v8868_v28  ;;  %2289 = vmatprep.subr.bf16.mxu1 %v8870_v29  ;;  %v8928_v14 = vld [vmem:[%s12600_s1 + $0x220] ss:$16 sps:$4 sm:$0xff]   ;;  %v552_v15 = vpack.c.bf16 %v454_v11, %v447_v10  ;;  %v453_v18 = vld [vmem:[%s10177_s25 + $0xa8] sm:$0xff]  ;;  %v8936_v19 = vld [vmem:[%s12600_s1 + $0x244] ss:$16 sps:$4 sm:$0xff]  }
  0x21   : > { %v446_v17 = vld [vmem:[%s10177_s25 + $0x70] sm:$0xff]  ;;  %v8939_v20 = vld [vmem:[%s12600_s1 + $0x24c] ss:$16 sps:$4 sm:$0xff]   ;;  %v8937_v22 = vld [vmem:[%s12600_s1 + $0x248] ss:$16 sps:$4 sm:$0xff]  }
  0x22   : > { %v8934_v21 = vld [vmem:[%s12600_s1 + $0x240] ss:$16 sps:$4 sm:$0xff]   ;;  %v551_v23 = vpack.c.bf16 %v453_v18, %v446_v17  ;;  %v461_v24 = vld [vmem:[%s10177_s25 + $0xe8] sm:$0xff]  ;;  %v8942_v26 = vld [vmem:[%s12600_s1 + $0x264] ss:$16 sps:$4 sm:$0xff]  }
  0x23   : > { %1838 = vmatpush1.bf16.msra.mxu0 %v8872_v30  ;;  %2290 = vmatpush1.bf16.msra.mxu1 %v8873_v31  ;;  %v468_v25 = vld [vmem:[%s10177_s25 + $0x120] sm:$0xff]  ;;  %v8945_v27 = vld [vmem:[%s12600_s1 + $0x26c] ss:$16 sps:$4 sm:$0xff]   ;;  %v8943_v30 = vld [vmem:[%s12600_s1 + $0x268] ss:$16 sps:$4 sm:$0xff]  }
  0x24   : > { %1839 = vmatprep.subr.bf16.mxu0 %v8874_v32  ;;  %2291 = vmatprep.subr.bf16.mxu1 %v8876_v33  ;;  %v559_v28 = vpack.c.bf16 %v468_v25, %v461_v24  ;;  %v8940_v29 = vld [vmem:[%s12600_s1 + $0x260] ss:$16 sps:$4 sm:$0xff]   ;;  %v467_v32 = vld [vmem:[%s10177_s25 + $0x118] sm:$0xff]  ;;  %v8948_v33 = vld [vmem:[%s12600_s1 + $0x284] ss:$16 sps:$4 sm:$0xff]  }
  0x25   : > { %v460_v31 = vld [vmem:[%s10177_s25 + $0xe0] sm:$0xff]  ;;  %v481_v46 = vld [vmem:[%s10177_s25 + $0x188] sm:$0xff]  ;;  %v523_v24 = vld [vmem:[%s10177_s25 + $0x2d8] sm:$0xff] }
  0x26   : > { %v8958_v49 = vld [vmem:[%s12600_s1 + $0x2c0] ss:$16 sps:$4 sm:$0xff]   ;;  %v489_v51 = vld [vmem:[%s10177_s25 + $0x1c8] sm:$0xff]  ;;  %v8978_v4 = vld [vmem:[%s12600_s1 + $0x324] ss:$16 sps:$4 sm:$0xff]  }
  0x27   : > { %1840 = vmatpush1.bf16.msra.mxu0 %v8878_v34  ;;  %2292 = vmatpush1.bf16.msra.mxu1 %v8879_v35  ;;  %v8951_v34 = vld [vmem:[%s12600_s1 + $0x28c] ss:$16 sps:$4 sm:$0xff]   ;;  %v8946_v35 = vld [vmem:[%s12600_s1 + $0x280] ss:$16 sps:$4 sm:$0xff]   ;;  %v8973_v3 = vld [vmem:[%s12600_s1 + $0x308] ss:$16 sps:$4 sm:$0xff]  }
  0x28   : > { %1841 = vmatprep.subr.bf16.mxu0 %v8880_v36  ;;  %2293 = vmatprep.subr.bf16.mxu1 %v8882_v37  ;;  %v8949_v36 = vld [vmem:[%s12600_s1 + $0x288] ss:$16 sps:$4 sm:$0xff]   ;;  %v558_v37 = vpack.c.bf16 %v467_v32, %v460_v31  ;;  %v8984_v11 = vld [vmem:[%s12600_s1 + $0x344] ss:$16 sps:$4 sm:$0xff]  }
  0x29   : > { %v509_v10 = vld [vmem:[%s10177_s25 + $0x268] sm:$0xff]  ;;  %v524_v17 = vld [vmem:[%s10177_s25 + $0x2e0] sm:$0xff]  ;;  %v538_v31 = vld [vmem:[%s10177_s25 + $0x350] sm:$0xff] }
  0x2a   : > { %v8990_v18 = vld [vmem:[%s12600_s1 + $0x364] ss:$16 sps:$4 sm:$0xff]  }
  0x2b   : > { %1842 = vmatpush1.bf16.msra.mxu0 %v8884_v38  ;;  %2294 = vmatpush1.bf16.msra.mxu1 %v8885_v39  ;;  %v475_v38 = vld [vmem:[%s10177_s25 + $0x158] sm:$0xff]  ;;  %v482_v39 = vld [vmem:[%s10177_s25 + $0x190] sm:$0xff] }
  0x2c   : > { %1843 = vmatprep.subr.bf16.mxu0 %v8886_v40  ;;  %2295 = vmatprep.subr.bf16.mxu1 %v8888_v41  ;;  %v8954_v40 = vld [vmem:[%s12600_s1 + $0x2a4] ss:$16 sps:$4 sm:$0xff]   ;;  %v8957_v41 = vld [vmem:[%s12600_s1 + $0x2ac] ss:$16 sps:$4 sm:$0xff]  }
  0x2d   : > { %v8996_v25 = vld [vmem:[%s12600_s1 + $0x384] ss:$16 sps:$4 sm:$0xff]  }
  0x2e   : > { %v9002_v32 = vld [vmem:[%s12600_s1 + $0x3a4] ss:$16 sps:$4 sm:$0xff]  }
  0x2f   : > { %1844 = vmatpush1.bf16.msra.mxu0 %v8890_v42  ;;  %2296 = vmatpush1.bf16.msra.mxu1 %v8891_v43  ;;  %v8952_v42 = vld [vmem:[%s12600_s1 + $0x2a0] ss:$16 sps:$4 sm:$0xff]   ;;  %v566_v43 = vpack.c.bf16 %v482_v39, %v475_v38  ;;  %v537_v38 = vld [vmem:[%s10177_s25 + $0x348] sm:$0xff]  ;;  %v9008_v39 = vld [vmem:[%s12600_s1 + $0x3c4] ss:$16 sps:$4 sm:$0xff]  }
  0x30   : > { %1845 = vmatprep.subr.bf16.mxu0 %v8892_v44  ;;  %2297 = vmatprep.subr.bf16.mxu1 %v8894_v45  ;;  %v8955_v44 = vld [vmem:[%s12600_s1 + $0x2a8] ss:$16 sps:$4 sm:$0xff]   ;;  %v474_v45 = vld [vmem:[%s10177_s25 + $0x150] sm:$0xff] }
  0x33   : > { %1846 = vmatpush1.bf16.msra.mxu0 %v8896_v47  ;;  %2298 = vmatpush1.bf16.msra.mxu1 %v8897_v48  ;;  %v8960_v47 = vld [vmem:[%s12600_s1 + $0x2c4] ss:$16 sps:$4 sm:$0xff]   ;;  %v8963_v48 = vld [vmem:[%s12600_s1 + $0x2cc] ss:$16 sps:$4 sm:$0xff]  }
  0x34   : > { %1847 = vmatprep.subr.bf16.mxu0 %v8898_v50  ;;  %2299 = vmatprep.subr.bf16.mxu1 %v8900_v52  ;;  %v565_v50 = vpack.c.bf16 %v481_v46, %v474_v45  ;;  %v496_v52 = vld [vmem:[%s10177_s25 + $0x200] sm:$0xff]  ;;  %v442_v45 = vld [vmem:[%s10177_s25 + $0x50] sm:$0xff] }
  0x35   : > { %v9014_v46 = vld [vmem:[%s12600_s1 + $0x3e4] ss:$16 sps:$4 sm:$0xff]  }
  0x37   : > { %1848 = vmatpush1.bf16.msra.mxu0 %v8902_v53  ;;  %2300 = vmatpush1.bf16.msra.mxu1 %v8903_v54  ;;  %v8961_v53 = vld [vmem:[%s12600_s1 + $0x2c8] ss:$16 sps:$4 sm:$0xff]   ;;  %v8966_v54 = vld [vmem:[%s12600_s1 + $0x2e4] ss:$16 sps:$4 sm:$0xff]  }
  0x38   : > { %1849 = vmatprep.subr.bf16.mxu0 %v8904_v55  ;;  %2301 = vmatprep.subr.bf16.mxu1 %v8906_v56  ;;  %v8969_v55 = vld [vmem:[%s12600_s1 + $0x2ec] ss:$16 sps:$4 sm:$0xff]   ;;  %v8964_v56 = vld [vmem:[%s12600_s1 + $0x2e0] ss:$16 sps:$4 sm:$0xff]  }
  0x3b   : > { %1850 = vmatpush1.bf16.msra.mxu0 %v8908_v57  ;;  %2302 = vmatpush1.bf16.msra.mxu1 %v8909_v58  ;;  %v8967_v57 = vld [vmem:[%s12600_s1 + $0x2e8] ss:$16 sps:$4 sm:$0xff]   ;;  %v573_v58 = vpack.c.bf16 %v496_v52, %v489_v51  ;;  %v434_v51 = vld [vmem:[%s10177_s25 + $0x10] sm:$0xff] }
  0x3c   : > { %1851 = vmatprep.subr.bf16.mxu0 %v8910_v59  ;;  %2303 = vmatprep.subr.bf16.mxu1 %v8912_v60  ;;  %v488_v59 = vld [vmem:[%s10177_s25 + $0x1c0] sm:$0xff]  ;;  %v495_v60 = vld [vmem:[%s10177_s25 + $0x1f8] sm:$0xff]  ;;  %v441_v52 = vld [vmem:[%s10177_s25 + $0x48] sm:$0xff] }
  0x3f   : > { %1852 = vmatpush1.bf16.msra.mxu0 %v8914_v61  ;;  %2304 = vmatpush1.bf16.msra.mxu1 %v8915_v62  ;;  %v8972_v61 = vld [vmem:[%s12600_s1 + $0x304] ss:$16 sps:$4 sm:$0xff]   ;;  %v8975_v62 = vld [vmem:[%s12600_s1 + $0x30c] ss:$16 sps:$4 sm:$0xff]  }
  0x40   : > { %1853 = vmatprep.subr.bf16.mxu0 %v8916_v63  ;;  %2305 = vmatprep.subr.bf16.mxu1 %v8918_v0  ;;  %v572_v63 = vpack.c.bf16 %v495_v60, %v488_v59  ;;  %v503_v0 = vld [vmem:[%s10177_s25 + $0x238] sm:$0xff]  ;;  %v9026_v60 = vld [vmem:[%s12600_s1 + $0x424] ss:$16 sps:$4 sm:$0xff]  }
  0x41   : > { %v9021_v59 = vld [vmem:[%s12600_s1 + $0x408] ss:$16 sps:$4 sm:$0xff]  }
  0x43   : > { %1854 = vmatpush1.bf16.msra.mxu0 %v8920_v1  ;;  %2306 = vmatpush1.bf16.msra.mxu1 %v8921_v2  ;;  %v510_v1 = vld [vmem:[%s10177_s25 + $0x270] sm:$0xff] }
  0x44   : > { %1936 = vmatprep.subr.bf16.mxu0 %v8924_v5  ;;  %2388 = vmatprep.subr.bf16.mxu1 %v8927_v6  ;;  %v8970_v2 = vld [vmem:[%s12600_s1 + $0x300] ss:$16 sps:$4 sm:$0xff]   ;;  %v8981_v5 = vld [vmem:[%s12600_s1 + $0x32c] ss:$16 sps:$4 sm:$0xff]  }
  0x45   : > { %v8976_v6 = vld [vmem:[%s12600_s1 + $0x320] ss:$16 sps:$4 sm:$0xff]  }
  0x46   : > { %1856 = vmatmul.mubr.bf16.vlgmr.msra.gmra.mrb[0].mxu0 %v544_v8  ;;  %2308 = vmatmul.mubr.bf16.vlgmr.msra.gmra.mrb[0].mxu1 %v544_v8  ;;  %v580_v8 = vpack.c.bf16 %v510_v1, %v503_v0  ;;  %v448_v1 = vld [vmem:[%s10177_s25 + $0x80] sm:$0xff] }
  0x47   : > { %1937 = vmatpush1.bf16.msra.mxu0 %v8922_v7  ;;  %2389 = vmatpush1.bf16.msra.mxu1 %v8925_v9  ;;  %v8979_v7 = vld [vmem:[%s12600_s1 + $0x328] ss:$16 sps:$4 sm:$0xff]   ;;  %v502_v9 = vld [vmem:[%s10177_s25 + $0x230] sm:$0xff] }
  0x48   : > { %1938 = vmatprep.subr.bf16.mxu0 %v8930_v12  ;;  %2390 = vmatprep.subr.bf16.mxu1 %v8933_v13  ;;  %v8987_v12 = vld [vmem:[%s12600_s1 + $0x34c] ss:$16 sps:$4 sm:$0xff]   ;;  %v8982_v13 = vld [vmem:[%s12600_s1 + $0x340] ss:$16 sps:$4 sm:$0xff]  }
  0x49   : > { %1865 = vmatprep.mubr.bf16.mxu0 %v552_v15  ;;  %2317 = vmatprep.mubr.bf16.mxu1 %v552_v15  ;;  %v8985_v15 = vld [vmem:[%s12600_s1 + $0x348] ss:$16 sps:$4 sm:$0xff]  }
  0x4b   : > { %1939 = vmatpush1.bf16.msra.mxu0 %v8928_v14  ;;  %2391 = vmatpush1.bf16.msra.mxu1 %v8931_v16  ;;  %v579_v14 = vpack.c.bf16 %v509_v10, %v502_v9  ;;  %v517_v16 = vld [vmem:[%s10177_s25 + $0x2a8] sm:$0xff]  ;;  %v9038_v10 = vld [vmem:[%s12600_s1 + $0x464] ss:$16 sps:$4 sm:$0xff]  }
  0x4c   : > { %1940 = vmatprep.subr.bf16.mxu0 %v8936_v19  ;;  %2392 = vmatprep.subr.bf16.mxu1 %v8939_v20  ;;  %v8993_v19 = vld [vmem:[%s12600_s1 + $0x36c] ss:$16 sps:$4 sm:$0xff]   ;;  %v8988_v20 = vld [vmem:[%s12600_s1 + $0x360] ss:$16 sps:$4 sm:$0xff]   ;;  %v9033_v9 = vld [vmem:[%s12600_s1 + $0x448] ss:$16 sps:$4 sm:$0xff]  }
  0x4e   : > { %1866 = vmatmul.mubr.bf16.gmra.mrb[4].mxu0 %v551_v23  ;;  %2318 = vmatmul.mubr.bf16.gmra.mrb[4].mxu1 %v551_v23  ;;  %v516_v23 = vld [vmem:[%s10177_s25 + $0x2a0] sm:$0xff] }
  0x4f   : > { %1941 = vmatpush1.bf16.msra.mxu0 %v8934_v21  ;;  %2393 = vmatpush1.bf16.msra.mxu1 %v8937_v22  ;;  %v587_v21 = vpack.c.bf16 %v524_v17, %v517_v16  ;;  %v8991_v22 = vld [vmem:[%s12600_s1 + $0x368] ss:$16 sps:$4 sm:$0xff]   ;;  %v9044_v17 = vld [vmem:[%s12600_s1 + $0x484] ss:$16 sps:$4 sm:$0xff]  }
  0x50   : > { %1942 = vmatprep.subr.bf16.mxu0 %v8942_v26  ;;  %2394 = vmatprep.subr.bf16.mxu1 %v8945_v27  ;;  %v8999_v26 = vld [vmem:[%s12600_s1 + $0x38c] ss:$16 sps:$4 sm:$0xff]   ;;  %v8994_v27 = vld [vmem:[%s12600_s1 + $0x380] ss:$16 sps:$4 sm:$0xff]  }
  0x51   : > { %1875 = vmatprep.mubr.bf16.mxu0 %v559_v28  ;;  %2327 = vmatprep.mubr.bf16.mxu1 %v559_v28  ;;  %v8997_v28 = vld [vmem:[%s12600_s1 + $0x388] ss:$16 sps:$4 sm:$0xff]  }
  0x52   : > { %v469_v16 = vld [vmem:[%s10177_s25 + $0x128] sm:$0xff] }
  0x53   : > { %1943 = vmatpush1.bf16.msra.mxu0 %v8940_v29  ;;  %2395 = vmatpush1.bf16.msra.mxu1 %v8943_v30  ;;  %v586_v29 = vpack.c.bf16 %v523_v24, %v516_v23  ;;  %v531_v30 = vld [vmem:[%s10177_s25 + $0x318] sm:$0xff]  ;;  %v484_v23 = vld [vmem:[%s10177_s25 + $0x1a0] sm:$0xff] }
  0x54   : > { %1944 = vmatprep.subr.bf16.mxu0 %v8948_v33  ;;  %2396 = vmatprep.subr.bf16.mxu1 %v8951_v34  ;;  %v9005_v33 = vld [vmem:[%s12600_s1 + $0x3ac] ss:$16 sps:$4 sm:$0xff]   ;;  %v594_v34 = vpack.c.bf16 %v538_v31, %v531_v30  ;;  %v9050_v24 = vld [vmem:[%s12600_s1 + $0x4a4] ss:$16 sps:$4 sm:$0xff]  }
  0x55   : > { %v483_v30 = vld [vmem:[%s10177_s25 + $0x198] sm:$0xff]  ;;  %v9056_v31 = vld [vmem:[%s12600_s1 + $0x4c4] ss:$16 sps:$4 sm:$0xff]  }
  0x56   : > { %1876 = vmatmul.mubr.bf16.gmra.mrb[8].mxu0 %v558_v37  ;;  %2328 = vmatmul.mubr.bf16.gmra.mrb[8].mxu1 %v558_v37  ;;  %v530_v37 = vld [vmem:[%s10177_s25 + $0x310] sm:$0xff] }
  0x57   : > { %1945 = vmatpush1.bf16.msra.mxu0 %v8946_v35  ;;  %2397 = vmatpush1.bf16.msra.mxu1 %v8949_v36  ;;  %v9000_v35 = vld [vmem:[%s12600_s1 + $0x3a0] ss:$16 sps:$4 sm:$0xff]   ;;  %v9003_v36 = vld [vmem:[%s12600_s1 + $0x3a8] ss:$16 sps:$4 sm:$0xff]  }
  0x58   : > { %1946 = vmatprep.subr.bf16.mxu0 %v8954_v40  ;;  %2398 = vmatprep.subr.bf16.mxu1 %v8957_v41  ;;  %v9011_v40 = vld [vmem:[%s12600_s1 + $0x3cc] ss:$16 sps:$4 sm:$0xff]   ;;  %v9006_v41 = vld [vmem:[%s12600_s1 + $0x3c0] ss:$16 sps:$4 sm:$0xff]  }
  0x59   : > { %1885 = vmatprep.mubr.bf16.mxu0 %v566_v43  ;;  %2337 = vmatprep.mubr.bf16.mxu1 %v566_v43  ;;  %v593_v43 = vpack.c.bf16 %v537_v38, %v530_v37  ;;  %v9057_v37 = vld [vmem:[%s12600_s1 + $0x4c8] ss:$16 sps:$4 sm:$0xff]   ;;  %v9062_v38 = vld [vmem:[%s12600_s1 + $0x4e4] ss:$16 sps:$4 sm:$0xff]  }
  0x5b   : > { %1947 = vmatpush1.bf16.msra.mxu0 %v8952_v42  ;;  %2399 = vmatpush1.bf16.msra.mxu1 %v8955_v44  ;;  %v9009_v42 = vld [vmem:[%s12600_s1 + $0x3c8] ss:$16 sps:$4 sm:$0xff]  }
  0x5c   : > { %1948 = vmatprep.subr.bf16.mxu0 %v8960_v47  ;;  %2400 = vmatprep.subr.bf16.mxu1 %v8963_v48  ;;  %v435_v44 = vld [vmem:[%s10177_s25 + $0x18] sm:$0xff]  ;;  %v9012_v48 = vld [vmem:[%s12600_s1 + $0x3e0] ss:$16 sps:$4 sm:$0xff]  }
  0x5d   : > { %v9017_v47 = vld [vmem:[%s12600_s1 + $0x3ec] ss:$16 sps:$4 sm:$0xff]  }
  0x5e   : > { %1886 = vmatmul.mubr.bf16.gmra.mrb[12].mxu0 %v565_v50  ;;  %2338 = vmatmul.mubr.bf16.gmra.mrb[12].mxu1 %v565_v50  ;;  %v9015_v50 = vld [vmem:[%s12600_s1 + $0x3e8] ss:$16 sps:$4 sm:$0xff]  }
  0x5f   : > { %1949 = vmatpush1.bf16.msra.mxu0 %v8958_v49  ;;  %2401 = vmatpush1.bf16.msra.mxu1 %v8961_v53  ;;  %v547_v49 = vpack.c.bf16 %v442_v45, %v435_v44  ;;  %v9020_v53 = vld [vmem:[%s12600_s1 + $0x404] ss:$16 sps:$4 sm:$0xff]   ;;  %v497_v44 = vld [vmem:[%s10177_s25 + $0x208] sm:$0xff] }
  0x60   : > { %1950 = vmatprep.subr.bf16.mxu0 %v8966_v54  ;;  %2402 = vmatprep.subr.bf16.mxu1 %v8969_v55  ;;  %v9023_v54 = vld [vmem:[%s12600_s1 + $0x40c] ss:$16 sps:$4 sm:$0xff]   ;;  %v9018_v55 = vld [vmem:[%s12600_s1 + $0x400] ss:$16 sps:$4 sm:$0xff]   ;;  %v9068_v45 = vld [vmem:[%s12600_s1 + $0x504] ss:$16 sps:$4 sm:$0xff]  }
  0x61   : > { %1895 = vmatprep.mubr.bf16.mxu0 %v573_v58  ;;  %2347 = vmatprep.mubr.bf16.mxu1 %v573_v58  ;;  %v456_v58 = vld [vmem:[%s10177_s25 + $0xc0] sm:$0xff] }
  0x63   : > { %1951 = vmatpush1.bf16.msra.mxu0 %v8964_v56  ;;  %2403 = vmatpush1.bf16.msra.mxu1 %v8967_v57  ;;  %v546_v56 = vpack.c.bf16 %v441_v52, %v434_v51  ;;  %v449_v57 = vld [vmem:[%s10177_s25 + $0x88] sm:$0xff]  ;;  %v9074_v52 = vld [vmem:[%s12600_s1 + $0x524] ss:$16 sps:$4 sm:$0xff]  }
  0x64   : > { %1952 = vmatprep.subr.bf16.mxu0 %v8972_v61  ;;  %2404 = vmatprep.subr.bf16.mxu1 %v8975_v62  ;;  %v9029_v61 = vld [vmem:[%s12600_s1 + $0x42c] ss:$16 sps:$4 sm:$0xff]   ;;  %v9024_v62 = vld [vmem:[%s12600_s1 + $0x420] ss:$16 sps:$4 sm:$0xff]   ;;  %v554_v0 = vpack.c.bf16 %v456_v58, %v449_v57  ;;  %v9069_v51 = vld [vmem:[%s12600_s1 + $0x508] ss:$16 sps:$4 sm:$0xff]  }
  0x65   : > { %v504_v57 = vld [vmem:[%s10177_s25 + $0x240] sm:$0xff]  ;;  %v511_v58 = vld [vmem:[%s10177_s25 + $0x278] sm:$0xff] }
  0x66   : > { %1896 = vmatmul.mubr.bf16.gmra.mrb[16].mxu0 %v572_v63  ;;  %2348 = vmatmul.mubr.bf16.gmra.mrb[16].mxu1 %v572_v63  ;;  %v9027_v63 = vld [vmem:[%s12600_s1 + $0x428] ss:$16 sps:$4 sm:$0xff]  }
  0x67   : > { %1953 = vmatpush1.bf16.msra.mxu0 %v8970_v2  ;;  %2405 = vmatpush1.bf16.msra.mxu1 %v8973_v3  ;;  %v455_v2 = vld [vmem:[%s10177_s25 + $0xb8] sm:$0xff]  ;;  %v9032_v3 = vld [vmem:[%s12600_s1 + $0x444] ss:$16 sps:$4 sm:$0xff]  }
  0x68   : > { %1954 = vmatprep.subr.bf16.mxu0 %v8978_v4  ;;  %2406 = vmatprep.subr.bf16.mxu1 %v8981_v5  ;;  %v9035_v4 = vld [vmem:[%s12600_s1 + $0x44c] ss:$16 sps:$4 sm:$0xff]   ;;  %v553_v5 = vpack.c.bf16 %v455_v2, %v448_v1  ;;  %v581_v1 = vpack.c.bf16 %v511_v58, %v504_v57  ;;  %v9086_v2 = vld [vmem:[%s12600_s1 + $0x564] ss:$16 sps:$4 sm:$0xff]  }
  0x69   : > { %1905 = vmatprep.mubr.bf16.mxu0 %v580_v8  ;;  %2357 = vmatprep.mubr.bf16.mxu1 %v580_v8  ;;  %v9030_v8 = vld [vmem:[%s12600_s1 + $0x440] ss:$16 sps:$4 sm:$0xff]  }
  0x6b   : > { %1955 = vmatpush1.bf16.msra.mxu0 %v8976_v6  ;;  %2407 = vmatpush1.bf16.msra.mxu1 %v8979_v7  ;;  %v463_v6 = vld [vmem:[%s10177_s25 + $0xf8] sm:$0xff]  ;;  %v470_v7 = vld [vmem:[%s10177_s25 + $0x130] sm:$0xff] }
  0x6c   : > { %1956 = vmatprep.subr.bf16.mxu0 %v8984_v11  ;;  %2408 = vmatprep.subr.bf16.mxu1 %v8987_v12  ;;  %v9041_v11 = vld [vmem:[%s12600_s1 + $0x46c] ss:$16 sps:$4 sm:$0xff]   ;;  %v9036_v12 = vld [vmem:[%s12600_s1 + $0x460] ss:$16 sps:$4 sm:$0xff]  }
  0x6e   : > { %1906 = vmatmul.mubr.bf16.gmra.mrb[20].mxu0 %v579_v14  ;;  %2358 = vmatmul.mubr.bf16.gmra.mrb[20].mxu1 %v579_v14  ;;  %v561_v14 = vpack.c.bf16 %v470_v7, %v463_v6  ;;  %v518_v7 = vld [vmem:[%s10177_s25 + $0x2b0] sm:$0xff] }
  0x6f   : > { %1957 = vmatpush1.bf16.msra.mxu0 %v8982_v13  ;;  %2409 = vmatpush1.bf16.msra.mxu1 %v8985_v15  ;;  %v9039_v13 = vld [vmem:[%s12600_s1 + $0x468] ss:$16 sps:$4 sm:$0xff]   ;;  %v462_v15 = vld [vmem:[%s10177_s25 + $0xf0] sm:$0xff] }
  0x70   : > { %1958 = vmatprep.subr.bf16.mxu0 %v8990_v18  ;;  %2410 = vmatprep.subr.bf16.mxu1 %v8993_v19  ;;  %v9047_v18 = vld [vmem:[%s12600_s1 + $0x48c] ss:$16 sps:$4 sm:$0xff]   ;;  %v9042_v19 = vld [vmem:[%s12600_s1 + $0x480] ss:$16 sps:$4 sm:$0xff]  }
  0x71   : > { %1915 = vmatprep.mubr.bf16.mxu0 %v587_v21  ;;  %2367 = vmatprep.mubr.bf16.mxu1 %v587_v21  ;;  %v9045_v21 = vld [vmem:[%s12600_s1 + $0x488] ss:$16 sps:$4 sm:$0xff]  }
  0x73   : > { %1959 = vmatpush1.bf16.msra.mxu0 %v8988_v20  ;;  %2411 = vmatpush1.bf16.msra.mxu1 %v8991_v22  ;;  %v560_v20 = vpack.c.bf16 %v469_v16, %v462_v15  ;;  %v477_v22 = vld [vmem:[%s10177_s25 + $0x168] sm:$0xff]  ;;  %v9098_v16 = vld [vmem:[%s12600_s1 + $0x5a4] ss:$16 sps:$4 sm:$0xff]  }
  0x74   : > { %1960 = vmatprep.subr.bf16.mxu0 %v8996_v25  ;;  %2412 = vmatprep.subr.bf16.mxu1 %v8999_v26  ;;  %v9053_v25 = vld [vmem:[%s12600_s1 + $0x4ac] ss:$16 sps:$4 sm:$0xff]   ;;  %v9048_v26 = vld [vmem:[%s12600_s1 + $0x4a0] ss:$16 sps:$4 sm:$0xff]  }
  0x76   : > { %1916 = vmatmul.mubr.bf16.gmra.mrb[24].mxu0 %v586_v29  ;;  %2368 = vmatmul.mubr.bf16.gmra.mrb[24].mxu1 %v586_v29  ;;  %v476_v29 = vld [vmem:[%s10177_s25 + $0x160] sm:$0xff] }
  0x77   : > { %1961 = vmatpush1.bf16.msra.mxu0 %v8994_v27  ;;  %2413 = vmatpush1.bf16.msra.mxu1 %v8997_v28  ;;  %v568_v27 = vpack.c.bf16 %v484_v23, %v477_v22  ;;  %v9051_v28 = vld [vmem:[%s12600_s1 + $0x4a8] ss:$16 sps:$4 sm:$0xff]   ;;  %v9104_v23 = vld [vmem:[%s12600_s1 + $0x5c4] ss:$16 sps:$4 sm:$0xff]  }
  0x78   : > { %1962 = vmatprep.subr.bf16.mxu0 %v9002_v32  ;;  %2414 = vmatprep.subr.bf16.mxu1 %v9005_v33  ;;  %v9059_v32 = vld [vmem:[%s12600_s1 + $0x4cc] ss:$16 sps:$4 sm:$0xff]   ;;  %v9054_v33 = vld [vmem:[%s12600_s1 + $0x4c0] ss:$16 sps:$4 sm:$0xff]  }
  0x79   : > { %1925 = vmatprep.mubr.bf16.mxu0 %v594_v34  ;;  %2377 = vmatprep.mubr.bf16.mxu1 %v594_v34  ;;  %v567_v34 = vpack.c.bf16 %v483_v30, %v476_v29  ;;  %v539_v22 = vld [vmem:[%s10177_s25 + $0x358] sm:$0xff]  ;;  %v9110_v30 = vld [vmem:[%s12600_s1 + $0x5e4] ss:$16 sps:$4 sm:$0xff]  }
  0x7b   : > { %1963 = vmatpush1.bf16.msra.mxu0 %v9000_v35  ;;  %2415 = vmatpush1.bf16.msra.mxu1 %v9003_v36  ;;  %v491_v35 = vld [vmem:[%s10177_s25 + $0x1d8] sm:$0xff]  ;;  %v498_v36 = vld [vmem:[%s10177_s25 + $0x210] sm:$0xff] }
  0x7c   : > { %1964 = vmatprep.subr.bf16.mxu0 %v9008_v39  ;;  %2416 = vmatprep.subr.bf16.mxu1 %v9011_v40  ;;  %v9065_v39 = vld [vmem:[%s12600_s1 + $0x4ec] ss:$16 sps:$4 sm:$0xff]   ;;  %v575_v40 = vpack.c.bf16 %v498_v36, %v491_v35  ;;  %v436_v35 = vld [vmem:[%s10177_s25 + $0x20] sm:$0xff] }
  0x7d   : > { %v443_v36 = vld [vmem:[%s10177_s25 + $0x58] sm:$0xff] }
  0x7e   : > { %1926 = vmatmul.mubr.bf16.gmra.mrb[28].mxu0 %v593_v43  ;;  %2378 = vmatmul.mubr.bf16.gmra.mrb[28].mxu1 %v593_v43  ;;  %v490_v43 = vld [vmem:[%s10177_s25 + $0x1d0] sm:$0xff] }
  0x7f   : > { %1965 = vmatpush1.bf16.msra.mxu0 %v9006_v41  ;;  %2417 = vmatpush1.bf16.msra.mxu1 %v9009_v42  ;;  %v9060_v41 = vld [vmem:[%s12600_s1 + $0x4e0] ss:$16 sps:$4 sm:$0xff]   ;;  %v9063_v42 = vld [vmem:[%s12600_s1 + $0x4e8] ss:$16 sps:$4 sm:$0xff]  }
  0x80   : > { %1966 = vmatprep.subr.bf16.mxu0 %v9014_v46  ;;  %2418 = vmatprep.subr.bf16.mxu1 %v9017_v47  ;;  %v9071_v46 = vld [vmem:[%s12600_s1 + $0x50c] ss:$16 sps:$4 sm:$0xff]   ;;  %v574_v47 = vpack.c.bf16 %v497_v44, %v490_v43  ;;  %v9117_v43 = vld [vmem:[%s12600_s1 + $0x608] ss:$16 sps:$4 sm:$0xff]  }
  0x81   : > { %1968 = vmatprep.mubr.bf16.mxu0 %v547_v49  ;;  %2420 = vmatprep.mubr.bf16.mxu1 %v547_v49  ;;  %v512_v49 = vld [vmem:[%s10177_s25 + $0x280] sm:$0xff] }
  0x83   : > { %1967 = vmatpush1.bf16.msra.mxu0 %v9012_v48  ;;  %2419 = vmatpush1.bf16.msra.mxu1 %v9015_v50  ;;  %v505_v48 = vld [vmem:[%s10177_s25 + $0x248] sm:$0xff]  ;;  %v9066_v50 = vld [vmem:[%s12600_s1 + $0x500] ss:$16 sps:$4 sm:$0xff]  }
  0x84   : > { %2049 = vmatprep.subr.bf16.mxu0 %v9020_v53  ;;  %2501 = vmatprep.subr.bf16.mxu1 %v9023_v54  ;;  %v9077_v53 = vld [vmem:[%s12600_s1 + $0x52c] ss:$16 sps:$4 sm:$0xff]   ;;  %v582_v54 = vpack.c.bf16 %v512_v49, %v505_v48 }
  0x85   : > { %v457_v48 = vld [vmem:[%s10177_s25 + $0xc8] sm:$0xff] }
  0x86   : > { %1969 = vmatmul.mubr.bf16.vlgmr.msra.gmra.mrb[0].mxu0 %v546_v56  ;;  %2421 = vmatmul.mubr.bf16.vlgmr.msra.gmra.mrb[0].mxu1 %v546_v56  ;;  %v9075_v56 = vld [vmem:[%s12600_s1 + $0x528] ss:$16 sps:$4 sm:$0xff]  }
  0x87   : > { %2050 = vmatpush1.bf16.msra.mxu0 %v9018_v55  ;;  %2502 = vmatpush1.bf16.msra.mxu1 %v9021_v59  ;;  %v9072_v55 = vld [vmem:[%s12600_s1 + $0x520] ss:$16 sps:$4 sm:$0xff]   ;;  %v9080_v59 = vld [vmem:[%s12600_s1 + $0x544] ss:$16 sps:$4 sm:$0xff]   ;;  %v465_v49 = vld [vmem:[%s10177_s25 + $0x108] sm:$0xff] }
  0x88   : > { %2051 = vmatprep.subr.bf16.mxu0 %v9026_v60  ;;  %2503 = vmatprep.subr.bf16.mxu1 %v9029_v61  ;;  %v9083_v60 = vld [vmem:[%s12600_s1 + $0x54c] ss:$16 sps:$4 sm:$0xff]   ;;  %v9078_v61 = vld [vmem:[%s12600_s1 + $0x540] ss:$16 sps:$4 sm:$0xff]  }
  0x89   : > { %1978 = vmatprep.mubr.bf16.mxu0 %v554_v0  ;;  %2430 = vmatprep.mubr.bf16.mxu1 %v554_v0  ;;  %v526_v0 = vld [vmem:[%s10177_s25 + $0x2f0] sm:$0xff] }
  0x8b   : > { %2052 = vmatpush1.bf16.msra.mxu0 %v9024_v62  ;;  %2504 = vmatpush1.bf16.msra.mxu1 %v9027_v63  ;;  %v9081_v62 = vld [vmem:[%s12600_s1 + $0x548] ss:$16 sps:$4 sm:$0xff]  }
  0x8c   : > { %2053 = vmatprep.subr.bf16.mxu0 %v9032_v3  ;;  %2505 = vmatprep.subr.bf16.mxu1 %v9035_v4  ;;  %v519_v63 = vld [vmem:[%s10177_s25 + $0x2b8] sm:$0xff]  ;;  %v9084_v4 = vld [vmem:[%s12600_s1 + $0x560] ss:$16 sps:$4 sm:$0xff]  }
  0x8d   : > { %v9089_v3 = vld [vmem:[%s12600_s1 + $0x56c] ss:$16 sps:$4 sm:$0xff]   ;;  %v589_v6 = vpack.c.bf16 %v526_v0, %v519_v63 }
  0x8e   : > { %1979 = vmatmul.mubr.bf16.gmra.mrb[4].mxu0 %v553_v5  ;;  %2431 = vmatmul.mubr.bf16.gmra.mrb[4].mxu1 %v553_v5  ;;  %v9087_v5 = vld [vmem:[%s12600_s1 + $0x568] ss:$16 sps:$4 sm:$0xff]  }
  0x8f   : > { %2054 = vmatpush1.bf16.msra.mxu0 %v9030_v8  ;;  %2506 = vmatpush1.bf16.msra.mxu1 %v9033_v9  ;;  %v525_v8 = vld [vmem:[%s10177_s25 + $0x2e8] sm:$0xff]  ;;  %v9092_v9 = vld [vmem:[%s12600_s1 + $0x584] ss:$16 sps:$4 sm:$0xff]  }
  0x90   : > { %2055 = vmatprep.subr.bf16.mxu0 %v9038_v10  ;;  %2507 = vmatprep.subr.bf16.mxu1 %v9041_v11  ;;  %v9095_v10 = vld [vmem:[%s12600_s1 + $0x58c] ss:$16 sps:$4 sm:$0xff]   ;;  %v588_v15 = vpack.c.bf16 %v525_v8, %v518_v7  ;;  %v506_v7 = vld [vmem:[%s10177_s25 + $0x250] sm:$0xff] }
  0x91   : > { %1988 = vmatprep.mubr.bf16.mxu0 %v561_v14  ;;  %2440 = vmatprep.mubr.bf16.mxu1 %v561_v14  ;;  %v533_v11 = vld [vmem:[%s10177_s25 + $0x328] sm:$0xff] }
  0x92   : > { %v9093_v14 = vld [vmem:[%s12600_s1 + $0x588] ss:$16 sps:$4 sm:$0xff]  }
  0x93   : > { %2056 = vmatpush1.bf16.msra.mxu0 %v9036_v12  ;;  %2508 = vmatpush1.bf16.msra.mxu1 %v9039_v13  ;;  %v540_v12 = vld [vmem:[%s10177_s25 + $0x360] sm:$0xff]  ;;  %v513_v8 = vld [vmem:[%s10177_s25 + $0x288] sm:$0xff] }
  0x94   : > { %2057 = vmatprep.subr.bf16.mxu0 %v9044_v17  ;;  %2509 = vmatprep.subr.bf16.mxu1 %v9047_v18  ;;  %v9090_v13 = vld [vmem:[%s12600_s1 + $0x580] ss:$16 sps:$4 sm:$0xff]   ;;  %v9101_v17 = vld [vmem:[%s12600_s1 + $0x5ac] ss:$16 sps:$4 sm:$0xff]  }
  0x95   : > { %v9096_v18 = vld [vmem:[%s12600_s1 + $0x5a0] ss:$16 sps:$4 sm:$0xff]  }
  0x96   : > { %1989 = vmatmul.mubr.bf16.gmra.mrb[8].mxu0 %v560_v20  ;;  %2441 = vmatmul.mubr.bf16.gmra.mrb[8].mxu1 %v560_v20  ;;  %v596_v20 = vpack.c.bf16 %v540_v12, %v533_v11  ;;  %v583_v11 = vpack.c.bf16 %v513_v8, %v506_v7  ;;  %v543_v7 = vld [vmem:[%s10177_s25 + $0x378] sm:$0xff] }
  0x97   : > { %2058 = vmatpush1.bf16.msra.mxu0 %v9042_v19  ;;  %2510 = vmatpush1.bf16.msra.mxu1 %v9045_v21  ;;  %v9099_v19 = vld [vmem:[%s12600_s1 + $0x5a8] ss:$16 sps:$4 sm:$0xff]   ;;  %v532_v21 = vld [vmem:[%s10177_s25 + $0x320] sm:$0xff] }
  0x98   : > { %2059 = vmatprep.subr.bf16.mxu0 %v9050_v24  ;;  %2511 = vmatprep.subr.bf16.mxu1 %v9053_v25  ;;  %v9107_v24 = vld [vmem:[%s12600_s1 + $0x5cc] ss:$16 sps:$4 sm:$0xff]   ;;  %v595_v29 = vpack.c.bf16 %v539_v22, %v532_v21  ;;  %v438_v22 = vld [vmem:[%s10177_s25 + $0x30] sm:$0xff] }
  0x99   : > { %1998 = vmatprep.mubr.bf16.mxu0 %v568_v27  ;;  %2450 = vmatprep.mubr.bf16.mxu1 %v568_v27  ;;  %v437_v25 = vld [vmem:[%s10177_s25 + $0x28] sm:$0xff]  ;;  %v9102_v27 = vld [vmem:[%s12600_s1 + $0x5c0] ss:$16 sps:$4 sm:$0xff]  }
  0x9b   : > { %2060 = vmatpush1.bf16.msra.mxu0 %v9048_v26  ;;  %2512 = vmatpush1.bf16.msra.mxu1 %v9051_v28  ;;  %v444_v26 = vld [vmem:[%s10177_s25 + $0x60] sm:$0xff]  ;;  %v9105_v28 = vld [vmem:[%s12600_s1 + $0x5c8] ss:$16 sps:$4 sm:$0xff]  }
  0x9c   : > { %2061 = vmatprep.subr.bf16.mxu0 %v9056_v31  ;;  %2513 = vmatprep.subr.bf16.mxu1 %v9059_v32  ;;  %v9113_v31 = vld [vmem:[%s12600_s1 + $0x5ec] ss:$16 sps:$4 sm:$0xff]   ;;  %v549_v32 = vpack.c.bf16 %v444_v26, %v437_v25  ;;  %v9121_v26 = vld [vmem:[%s12602_s3] sm:$0xff]  }
  0x9e   : > { %1999 = vmatmul.mubr.bf16.gmra.mrb[12].mxu0 %v567_v34  ;;  %2451 = vmatmul.mubr.bf16.gmra.mrb[12].mxu1 %v567_v34  ;;  %v9111_v34 = vld [vmem:[%s12600_s1 + $0x5e8] ss:$16 sps:$4 sm:$0xff]  }
  0x9f   : > { %2062 = vmatpush1.bf16.msra.mxu0 %v9054_v33  ;;  %2514 = vmatpush1.bf16.msra.mxu1 %v9057_v37  ;;  %v9108_v33 = vld [vmem:[%s12600_s1 + $0x5e0] ss:$16 sps:$4 sm:$0xff]   ;;  %v9116_v37 = vld [vmem:[%s12600_s1 + $0x604] ss:$16 sps:$4 sm:$0xff]  }
  0xa0   : > { %2063 = vmatprep.subr.bf16.mxu0 %v9062_v38  ;;  %2515 = vmatprep.subr.bf16.mxu1 %v9065_v39  ;;  %v9119_v38 = vld [vmem:[%s12600_s1 + $0x60c] ss:$16 sps:$4 sm:$0xff]  }
  0xa1   : > { %2008 = vmatprep.mubr.bf16.mxu0 %v575_v40  ;;  %2460 = vmatprep.mubr.bf16.mxu1 %v575_v40  ;;  %v451_v39 = vld [vmem:[%s10177_s25 + $0x98] sm:$0xff]  ;;  %v458_v40 = vld [vmem:[%s10177_s25 + $0xd0] sm:$0xff] }
  0xa2   : > { %v556_v44 = vpack.c.bf16 %v458_v40, %v451_v39  ;;  %v9132_v39 = vld [vmem:[%s12602_s3 + $0x58] sm:$0xff]  }
  0xa3   : > { %2064 = vmatpush1.bf16.msra.mxu0 %v9060_v41  ;;  %2516 = vmatpush1.bf16.msra.mxu1 %v9063_v42  ;;  %v548_v41 = vpack.c.bf16 %v443_v36, %v436_v35  ;;  %v9114_v42 = vld [vmem:[%s12600_s1 + $0x600] ss:$16 sps:$4 sm:$0xff]   ;;  %v9134_v40 = vld [vmem:[%s12602_s3 + $0xd8] sm:$0xff]  }
  0xa4   : > { %2065 = vmatprep.subr.bf16.mxu0 %v9068_v45  ;;  %2517 = vmatprep.subr.bf16.mxu1 %v9071_v46  ;;  %v9120_v45 = vld [vmem:[%s12602_s3 + $0x40] sm:$0xff]   ;;  %v9130_v35 = vld [vmem:[%s12602_s3 + $0xd0] sm:$0xff]  }
  0xa5   : > { %v9122_v46 = vld [vmem:[%s12602_s3 + $0xc0] sm:$0xff]  }
  0xa6   : > { %2009 = vmatmul.mubr.bf16.gmra.mrb[16].mxu0 %v574_v47  ;;  %2461 = vmatmul.mubr.bf16.gmra.mrb[16].mxu1 %v574_v47  ;;  %v450_v47 = vld [vmem:[%s10177_s25 + $0x90] sm:$0xff] }
  0xa7   : > { %2066 = vmatpush1.bf16.msra.mxu0 %v9066_v50  ;;  %2518 = vmatpush1.bf16.msra.mxu1 %v9069_v51  ;;  %v472_v50 = vld [vmem:[%s10177_s25 + $0x140] sm:$0xff]  ;;  %v555_v51 = vpack.c.bf16 %v457_v48, %v450_v47 }
  0xa8   : > { %2067 = vmatprep.subr.bf16.mxu0 %v9074_v52  ;;  %2519 = vmatprep.subr.bf16.mxu1 %v9077_v53  ;;  %v563_v52 = vpack.c.bf16 %v472_v50, %v465_v49  ;;  %v464_v53 = vld [vmem:[%s10177_s25 + $0x100] sm:$0xff]  ;;  %v9140_v50 = vld [vmem:[%s12602_s3 + $0x68] sm:$0xff]  }
  0xa9   : > { %2018 = vmatprep.mubr.bf16.mxu0 %v582_v54  ;;  %2470 = vmatprep.mubr.bf16.mxu1 %v582_v54  ;;  %v471_v54 = vld [vmem:[%s10177_s25 + $0x138] sm:$0xff]  ;;  %v9137_v48 = vld [vmem:[%s12602_s3 + $0x20] sm:$0xff]  }
  0xaa   : > { %v562_v57 = vpack.c.bf16 %v471_v54, %v464_v53  ;;  %v9139_v49 = vld [vmem:[%s12602_s3 + $0xa0] sm:$0xff]   ;;  %v487_v53 = vld [vmem:[%s10177_s25 + $0x1b8] sm:$0xff]  ;;  %v9141_v54 = vld [vmem:[%s12602_s3 + $0x28] sm:$0xff]  }
  0xab   : > { %2068 = vmatpush1.bf16.msra.mxu0 %v9072_v55  ;;  %2520 = vmatpush1.bf16.msra.mxu1 %v9075_v56  ;;  %v479_v55 = vld [vmem:[%s10177_s25 + $0x178] sm:$0xff]  ;;  %v486_v56 = vld [vmem:[%s10177_s25 + $0x1b0] sm:$0xff] }
  0xac   : > { %2069 = vmatprep.subr.bf16.mxu0 %v9080_v59  ;;  %2521 = vmatprep.subr.bf16.mxu1 %v9083_v60  ;;  %v570_v58 = vpack.c.bf16 %v486_v56, %v479_v55  ;;  %v478_v59 = vld [vmem:[%s10177_s25 + $0x170] sm:$0xff]  ;;  %v485_v60 = vld [vmem:[%s10177_s25 + $0x1a8] sm:$0xff] }
  0xad   : > { %v569_v63 = vpack.c.bf16 %v485_v60, %v478_v59  ;;  %v9143_v55 = vld [vmem:[%s12602_s3 + $0xa8] sm:$0xff]   ;;  %v9144_v56 = vld [vmem:[%s12602_s3 + $0x70] sm:$0xff]  }
  0xae   : > { %2019 = vmatmul.mubr.bf16.gmra.mrb[20].mxu0 %v581_v1  ;;  %2471 = vmatmul.mubr.bf16.gmra.mrb[20].mxu1 %v581_v1  ;;  %v492_v1 = vld [vmem:[%s10177_s25 + $0x1e0] sm:$0xff]  ;;  %v9145_v59 = vld [vmem:[%s12602_s3 + $0x30] sm:$0xff]  }
  0xaf   : > { %2070 = vmatpush1.bf16.msra.mxu0 %v9078_v61  ;;  %2522 = vmatpush1.bf16.msra.mxu1 %v9081_v62  ;;  %v493_v61 = vld [vmem:[%s10177_s25 + $0x1e8] sm:$0xff]  ;;  %v500_v62 = vld [vmem:[%s10177_s25 + $0x220] sm:$0xff]  ;;  %v9147_v60 = vld [vmem:[%s12602_s3 + $0xb0] sm:$0xff]  }
  0xb0   : > { %2071 = vmatprep.subr.bf16.mxu0 %v9086_v2  ;;  %2523 = vmatprep.subr.bf16.mxu1 %v9089_v3  ;;  %v577_v0 = vpack.c.bf16 %v500_v62, %v493_v61  ;;  %v499_v2 = vld [vmem:[%s10177_s25 + $0x218] sm:$0xff]  ;;  %v494_v61 = vld [vmem:[%s10177_s25 + $0x1f0] sm:$0xff]  ;;  %v501_v62 = vld [vmem:[%s10177_s25 + $0x228] sm:$0xff] }
  0xb1   : > { %2028 = vmatprep.mubr.bf16.mxu0 %v589_v6  ;;  %2480 = vmatprep.mubr.bf16.mxu1 %v589_v6  ;;  %v507_v3 = vld [vmem:[%s10177_s25 + $0x258] sm:$0xff] }
  0xb3   : > { %2072 = vmatpush1.bf16.msra.mxu0 %v9084_v4  ;;  %2524 = vmatpush1.bf16.msra.mxu1 %v9087_v5  ;;  %v514_v4 = vld [vmem:[%s10177_s25 + $0x290] sm:$0xff]  ;;  %v576_v5 = vpack.c.bf16 %v499_v2, %v492_v1  ;;  %v515_v1 = vld [vmem:[%s10177_s25 + $0x298] sm:$0xff] }
  0xb4   : > { %2073 = vmatprep.subr.bf16.mxu0 %v9092_v9  ;;  %2525 = vmatprep.subr.bf16.mxu1 %v9095_v10  ;;  %v584_v6 = vpack.c.bf16 %v514_v4, %v507_v3  ;;  %v521_v9 = vld [vmem:[%s10177_s25 + $0x2c8] sm:$0xff]  ;;  %v528_v10 = vld [vmem:[%s10177_s25 + $0x300] sm:$0xff]  ;;  %v522_v3 = vld [vmem:[%s10177_s25 + $0x2d0] sm:$0xff] }
  0xb5   : > { %v591_v12 = vpack.c.bf16 %v528_v10, %v521_v9  ;;  %v529_v4 = vld [vmem:[%s10177_s25 + $0x308] sm:$0xff]  ;;  %v9148_v9 = vld [vmem:[%s12602_s3 + $0x78] sm:$0xff]  }
  0xb6   : > { %2029 = vmatmul.mubr.bf16.gmra.mrb[24].mxu0 %v588_v15  ;;  %2481 = vmatmul.mubr.bf16.gmra.mrb[24].mxu1 %v588_v15  ;;  %v535_v15 = vld [vmem:[%s10177_s25 + $0x338] sm:$0xff] }
  0xb7   : > { %2074 = vmatpush1.bf16.msra.mxu0 %v9090_v13  ;;  %2526 = vmatpush1.bf16.msra.mxu1 %v9093_v14  ;;  %v520_v13 = vld [vmem:[%s10177_s25 + $0x2c0] sm:$0xff]  ;;  %v527_v14 = vld [vmem:[%s10177_s25 + $0x2f8] sm:$0xff] }
  0xb8   : > { %2075 = vmatprep.subr.bf16.mxu0 %v9098_v16  ;;  %2527 = vmatprep.subr.bf16.mxu1 %v9101_v17  ;;  %v542_v16 = vld [vmem:[%s10177_s25 + $0x370] sm:$0xff]  ;;  %v590_v17 = vpack.c.bf16 %v527_v14, %v520_v13  ;;  %v9150_v10 = vld [vmem:[%s12602_s3 + $0xf8] sm:$0xff]   ;;  %v798_v13 = vlaneseq }
  0xb9   : > { %2038 = vmatprep.mubr.bf16.mxu0 %v596_v20  ;;  %2490 = vmatprep.mubr.bf16.mxu1 %v596_v20  ;;  %v541_v20 = vld [vmem:[%s10177_s25 + $0x368] sm:$0xff] }
  0xba   : > { %v10875_v14 = vshrl.u32 %v798_v13, 7 }
  0xbb   : > { %2076 = vmatpush1.bf16.msra.mxu0 %v9096_v18  ;;  %2528 = vmatpush1.bf16.msra.mxu1 %v9099_v19  ;;  %v598_v18 = vpack.c.bf16 %v542_v16, %v535_v15  ;;  %v534_v19 = vld [vmem:[%s10177_s25 + $0x330] sm:$0xff] }
  0xbc   : > { %2077 = vmatprep.subr.bf16.mxu0 %v9104_v23  ;;  %2529 = vmatprep.subr.bf16.mxu1 %v9107_v24  ;;  %v597_v21 = vpack.c.bf16 %v541_v20, %v534_v19  ;;  %v445_v23 = vld [vmem:[%s10177_s25 + $0x68] sm:$0xff]  ;;  %v9967_v24 = vmov 0   ;;  %v10878_v15 = vsub.s32 0, %v10875_v14  ;;  %v10881_v16 = vsub.s32 2, %v10875_v14 }
  0xbd   : > { %v550_v25 = vpack.c.bf16 %v445_v23, %v438_v22  ;;  %v10890_v19 = vsub.s32 3, %v10875_v14 }
  0xbe   : > { %2039 = vmatmul.mubr.bf16.gmra.mrb[28].mxu0 %v595_v29  ;;  %2491 = vmatmul.mubr.bf16.gmra.mrb[28].mxu1 %v595_v29  ;;  %v9126_v29 = vld [vmem:[%s12602_s3 + $0xc8] sm:$0xff]  }
  0xbf   : > { %2078 = vmatpush1.bf16.msra.mxu0 %v9102_v27  ;;  %2530 = vmatpush1.bf16.msra.mxu1 %v9105_v28  ;;  %v9123_v27 = vld [vmem:[%s12602_s3 + $0x80] sm:$0xff]   ;;  %v9124_v28 = vld [vmem:[%s12602_s3 + $0x48] sm:$0xff]  }
  0xc0   : > { %2079 = vmatprep.subr.bf16.mxu0 %v9110_v30  ;;  %2531 = vmatprep.subr.bf16.mxu1 %v9113_v31  ;;  %v452_v30 = vld [vmem:[%s10177_s25 + $0xa0] sm:$0xff]  ;;  %v459_v31 = vld [vmem:[%s10177_s25 + $0xd8] sm:$0xff] }
  0xc1   : > { %2081 = vmatprep.mubr.bf16.mxu0 %v549_v32  ;;  %2533 = vmatprep.mubr.bf16.mxu1 %v549_v32  ;;  %v9125_v32 = vld [vmem:[%s12602_s3 + $0x8] sm:$0xff]   ;;  %v557_v36 = vpack.c.bf16 %v459_v31, %v452_v30 }
  0xc3   : > { %2080 = vmatpush1.bf16.msra.mxu0 %v9108_v33  ;;  %2532 = vmatpush1.bf16.msra.mxu1 %v9111_v34  ;;  %v9127_v33 = vld [vmem:[%s12602_s3 + $0x88] sm:$0xff]   ;;  %v9128_v34 = vld [vmem:[%s12602_s3 + $0x50] sm:$0xff]  }
  0xc4   : > { %2162 = vmatprep.subr.bf16.mxu0 %v9116_v37  ;;  %2614 = vmatprep.subr.bf16.mxu1 %v9119_v38  ;;  %v9129_v37 = vld [vmem:[%s12602_s3 + $0x10] sm:$0xff]  }
  0xc5   : > { %v9131_v38 = vld [vmem:[%s12602_s3 + $0x90] sm:$0xff]  }
  0xc6   : > { %2082 = vmatmul.mubr.bf16.vlgmr.msra.gmra.mrb[0].mxu0 %v548_v41  ;;  %2534 = vmatmul.mubr.bf16.vlgmr.msra.gmra.mrb[0].mxu1 %v548_v41  ;;  %v466_v41 = vld [vmem:[%s10177_s25 + $0x110] sm:$0xff] }
  0xc7   : > { %2163 = vmatpush1.bf16.msra.mxu0 %v9114_v42  ;;  %2615 = vmatpush1.bf16.msra.mxu1 %v9117_v43  ;;  %v473_v42 = vld [vmem:[%s10177_s25 + $0x148] sm:$0xff]  ;;  %v9133_v43 = vld [vmem:[%s12602_s3 + $0x18] sm:$0xff]  }
  0xc8   : > { %2091 = vmatprep.mubr.bf16.mxu0 %v556_v44  ;;  %2543 = vmatprep.mubr.bf16.mxu1 %v556_v44  ;;  %v9135_v44 = vld [vmem:[%s12602_s3 + $0x98] sm:$0xff]   ;;  %v564_v47 = vpack.c.bf16 %v473_v42, %v466_v41 }
  0xc9   : > { %8110 = vmatprep.subr.bf16.mxu0 %v9120_v45  ;;  %8174 = vmatprep.subr.bf16.mxu1 %v9122_v46  ;;  %v9136_v45 = vld [vmem:[%s12602_s3 + $0x60] sm:$0xff]  }
  0xca   : > { %v9138_v46 = vld [vmem:[%s12602_s3 + $0xe0] sm:$0xff]  }
  0xce   : > { %2092 = vmatmul.mubr.bf16.gmra.mrb[4].mxu0 %v555_v51  ;;  %2544 = vmatmul.mubr.bf16.gmra.mrb[4].mxu1 %v555_v51  ;;  %v9142_v51 = vld [vmem:[%s12602_s3 + $0xe8] sm:$0xff]  }
  0xcf   : > { %2101 = vmatprep.mubr.bf16.mxu0 %v563_v52  ;;  %2553 = vmatprep.mubr.bf16.mxu1 %v563_v52  ;;  %v480_v52 = vld [vmem:[%s10177_s25 + $0x180] sm:$0xff] }
  0xd6   : > { %2102 = vmatmul.mubr.bf16.gmra.mrb[8].mxu0 %v562_v57  ;;  %2554 = vmatmul.mubr.bf16.gmra.mrb[8].mxu1 %v562_v57  ;;  %v9146_v57 = vld [vmem:[%s12602_s3 + $0xf0] sm:$0xff]  }
  0xd7   : > { %2111 = vmatprep.mubr.bf16.mxu0 %v570_v58  ;;  %2563 = vmatprep.mubr.bf16.mxu1 %v570_v58  ;;  %v571_v58 = vpack.c.bf16 %v487_v53, %v480_v52 }
  0xde   : > { %2112 = vmatmul.mubr.bf16.gmra.mrb[12].mxu0 %v569_v63  ;;  %2564 = vmatmul.mubr.bf16.gmra.mrb[12].mxu1 %v569_v63  ;;  %v578_v63 = vpack.c.bf16 %v501_v62, %v494_v61 }
  0xdf   : > { %2121 = vmatprep.mubr.bf16.mxu0 %v577_v0  ;;  %2573 = vmatprep.mubr.bf16.mxu1 %v577_v0  ;;  %v508_v0 = vld [vmem:[%s10177_s25 + $0x260] sm:$0xff] }
  0xe0   : > { %v585_v2 = vpack.c.bf16 %v515_v1, %v508_v0 }
  0xe6   : > { %2122 = vmatmul.mubr.bf16.gmra.mrb[16].mxu0 %v576_v5  ;;  %2574 = vmatmul.mubr.bf16.gmra.mrb[16].mxu1 %v576_v5  ;;  %v592_v5 = vpack.c.bf16 %v529_v4, %v522_v3 }
  0xe7   : > { %2131 = vmatprep.mubr.bf16.mxu0 %v584_v6  ;;  %2583 = vmatprep.mubr.bf16.mxu1 %v584_v6  ;;  %v536_v6 = vld [vmem:[%s10177_s25 + $0x340] sm:$0xff] }
  0xe8   : > { %v599_v8 = vpack.c.bf16 %v543_v7, %v536_v6 }
  0xee   : > { %2132 = vmatmul.mubr.bf16.gmra.mrb[20].mxu0 %v583_v11  ;;  %2584 = vmatmul.mubr.bf16.gmra.mrb[20].mxu1 %v583_v11  ;;  %v9149_v11 = vld [vmem:[%s12602_s3 + $0x38] sm:$0xff]  }
  0xef   : > { %2141 = vmatprep.mubr.bf16.mxu0 %v591_v12  ;;  %2593 = vmatprep.mubr.bf16.mxu1 %v591_v12  ;;  %v9151_v12 = vld [vmem:[%s12602_s3 + $0xb8] sm:$0xff]  }
  0xf6   : > { %2142 = vmatmul.mubr.bf16.gmra.mrb[24].mxu0 %v590_v17  ;;  %2594 = vmatmul.mubr.bf16.gmra.mrb[24].mxu1 %v590_v17  ;;  %v796_v17 = vld [vmem:[%s12601_s2] sm:$0xf] }
  0xf7   : > { %2151 = vmatprep.mubr.bf16.mxu0 %v598_v18  ;;  %2603 = vmatprep.mubr.bf16.mxu1 %v598_v18  ;;  %v10887_v18 = vsub.s32 1, %v10875_v14  ;;  %v10893_v20 = vrot.slane %v796_v17, %v10878_v15  ;;  %v10902_v23 = vrot.slane %v796_v17, %v10890_v19 }
  0xf9   : > { %v10899_v22 = vrot.slane %v796_v17, %v10887_v18 }
  0xfe   : > { %2152 = vmatmul.mubr.bf16.gmra.mrb[28].mxu0 %v597_v21  ;;  %2604 = vmatmul.mubr.bf16.gmra.mrb[28].mxu1 %v597_v21  ;;  %v10896_v21 = vrot.slane %v796_v17, %v10881_v16 }
  0xff   : > { %2194 = vmatprep.mubr.bf16.mxu0 %v9967_v24  ;;  %2646 = vmatprep.mubr.bf16.mxu1 %v9967_v24 }
 0x106   : > { %7575 = vmatmul.mubr.msk.bf16.vlgmr.msra.gmra.mrb[0].mxu0 %vm1798_vm0, %v550_v25  ;;  %7583 = vmatmul.mubr.msk.bf16.vlgmr.msra.gmra.mrb[0].mxu1 %vm1798_vm0, %v550_v25 }
 0x107   : > { %2204 = vmatprep.mubr.bf16.mxu0 %v9967_v24  ;;  %2656 = vmatprep.mubr.bf16.mxu1 %v9967_v24 }
 0x108   : > { %8111 = vmatpush3.bf16.msra.mxu0 %v9121_v26  ;;  %8175 = vmatpush3.bf16.msra.mxu1 %v9123_v27 }
 0x109   : > { %8112 = vmatprep.subr.bf16.mxu0 %v9124_v28  ;;  %8176 = vmatprep.subr.bf16.mxu1 %v9126_v29 }
 0x10c   : > { %8113 = vmatpush3.bf16.msra.mxu0 %v9125_v32  ;;  %8177 = vmatpush3.bf16.msra.mxu1 %v9127_v33 }
 0x10d   : > { %8114 = vmatprep.subr.bf16.mxu0 %v9128_v34  ;;  %8178 = vmatprep.subr.bf16.mxu1 %v9130_v35 }
 0x10e   : > { %7576 = vmatmul.mubr.msk.bf16.gmra.mrb[4].mxu0 %vm1798_vm0, %v557_v36  ;;  %7584 = vmatmul.mubr.msk.bf16.gmra.mrb[4].mxu1 %vm1798_vm0, %v557_v36 }
 0x10f   : > { %2214 = vmatprep.mubr.bf16.mxu0 %v9967_v24  ;;  %2666 = vmatprep.mubr.bf16.mxu1 %v9967_v24 }
 0x110   : > { %8115 = vmatpush3.bf16.msra.mxu0 %v9129_v37  ;;  %8179 = vmatpush3.bf16.msra.mxu1 %v9131_v38 }
 0x111   : > { %8116 = vmatprep.subr.bf16.mxu0 %v9132_v39  ;;  %8180 = vmatprep.subr.bf16.mxu1 %v9134_v40 }
 0x114   : > { %8117 = vmatpush3.bf16.msra.mxu0 %v9133_v43  ;;  %8181 = vmatpush3.bf16.msra.mxu1 %v9135_v44 }
 0x115   : > { %8118 = vmatprep.subr.bf16.mxu0 %v9136_v45  ;;  %8182 = vmatprep.subr.bf16.mxu1 %v9138_v46 }
 0x116   : > { %7577 = vmatmul.mubr.msk.bf16.gmra.mrb[8].mxu0 %vm1798_vm0, %v564_v47  ;;  %7585 = vmatmul.mubr.msk.bf16.gmra.mrb[8].mxu1 %vm1798_vm0, %v564_v47 }
 0x117   : > { %2224 = vmatprep.mubr.bf16.mxu0 %v9967_v24  ;;  %2676 = vmatprep.mubr.bf16.mxu1 %v9967_v24 }
 0x118   : > { %8119 = vmatpush3.bf16.msra.mxu0 %v9137_v48  ;;  %8183 = vmatpush3.bf16.msra.mxu1 %v9139_v49 }
 0x119   : > { %8120 = vmatprep.subr.bf16.mxu0 %v9140_v50  ;;  %8184 = vmatprep.subr.bf16.mxu1 %v9142_v51 }
 0x11c   : > { %8121 = vmatpush3.bf16.msra.mxu0 %v9141_v54  ;;  %8185 = vmatpush3.bf16.msra.mxu1 %v9143_v55 }
 0x11d   : > { %8122 = vmatprep.subr.bf16.mxu0 %v9144_v56  ;;  %8186 = vmatprep.subr.bf16.mxu1 %v9146_v57 }
 0x11e   : > { %7578 = vmatmul.mubr.msk.bf16.gmra.mrb[12].mxu0 %vm1798_vm0, %v571_v58  ;;  %7586 = vmatmul.mubr.msk.bf16.gmra.mrb[12].mxu1 %vm1798_vm0, %v571_v58 }
 0x11f   : > { %2234 = vmatprep.mubr.bf16.mxu0 %v9967_v24  ;;  %2686 = vmatprep.mubr.bf16.mxu1 %v9967_v24 }
 0x120   : > { %8123 = vmatpush3.bf16.msra.mxu0 %v9145_v59  ;;  %8187 = vmatpush3.bf16.msra.mxu1 %v9147_v60 }
 0x121   : > { %8124 = vmatprep.subr.bf16.mxu0 %v9148_v9  ;;  %8188 = vmatprep.subr.bf16.mxu1 %v9150_v10 }
 0x124   : > { %8125 = vmatpush3.bf16.msra.mxu0 %v9149_v11  ;;  %8189 = vmatpush3.bf16.msra.mxu1 %v9151_v12 }
 0x126   : > { %7579 = vmatmul.mubr.msk.bf16.gmra.mrb[16].mxu0 %vm1798_vm0, %v578_v63  ;;  %7587 = vmatmul.mubr.msk.bf16.gmra.mrb[16].mxu1 %vm1798_vm0, %v578_v63 }
 0x127   : > { %2244 = vmatprep.mubr.bf16.mxu0 %v9967_v24  ;;  %2696 = vmatprep.mubr.bf16.mxu1 %v9967_v24 }
 0x12e   : > { %7580 = vmatmul.mubr.msk.bf16.gmra.mrb[20].mxu0 %vm1798_vm0, %v585_v2  ;;  %7588 = vmatmul.mubr.msk.bf16.gmra.mrb[20].mxu1 %vm1798_vm0, %v585_v2 }
 0x12f   : > { %2254 = vmatprep.mubr.bf16.mxu0 %v9967_v24  ;;  %2706 = vmatprep.mubr.bf16.mxu1 %v9967_v24 }
 0x136   : > { %7581 = vmatmul.mubr.msk.bf16.gmra.mrb[24].mxu0 %vm1798_vm0, %v592_v5  ;;  %7589 = vmatmul.mubr.msk.bf16.gmra.mrb[24].mxu1 %vm1798_vm0, %v592_v5 }
 0x137   : > { %2264 = vmatprep.mubr.bf16.mxu0 %v9967_v24  ;;  %2716 = vmatprep.mubr.bf16.mxu1 %v9967_v24 }
 0x13e   : > { %7582 = vmatmul.mubr.msk.bf16.gmra.mrb[28].mxu0 %vm1798_vm0, %v599_v8  ;;  %7590 = vmatmul.mubr.msk.bf16.gmra.mrb[28].mxu1 %vm1798_vm0, %v599_v8 }
 0x1d9   : > { %v2196_v25 = vpop.f32.mrb[0].mxu0  ;;  %v2648_v26 = vpop.f32.mrb[0].mxu1 }
 0x1da   : > { %v8366_v27 = vadd.f32 %v2196_v25, %v10893_v20  ;;  %v8398_v28 = vadd.f32 %v2648_v26, %v10896_v21  ;;  %v2198_v29 = vpop.f32.mrb[1].mxu0  ;;  %v2650_v30 = vpop.f32.mrb[1].mxu1 }
 0x1db   : > { %v8367_v31 = vadd.f32 %v2198_v29, %v10899_v22  ;;  %v8399_v32 = vadd.f32 %v2650_v30, %v10902_v23  ;;  %v2200_v33 = vpop.f32.mrb[2].mxu0  ;;  %v2652_v34 = vpop.f32.mrb[2].mxu1 }
 0x1dc   : > { %v8368_v35 = vadd.f32 %v2200_v33, %v10893_v20  ;;  %v8400_v36 = vadd.f32 %v2652_v34, %v10896_v21  ;;  %v2202_v37 = vpop.f32.mrb[3].mxu0  ;;  %v2654_v38 = vpop.f32.mrb[3].mxu1  ;;  %v2727_v41 = vmax.f32 %v8366_v27, 0.0  ;;  %v2729_v42 = vmax.f32 %v8398_v28, 0.0 }
 0x1dd   : > { %v8369_v39 = vadd.f32 %v2202_v37, %v10899_v22  ;;  %v8401_v40 = vadd.f32 %v2654_v38, %v10902_v23  ;;  %v2728_v45 = vmax.f32 %v8367_v31, 0.0  ;;  %v2730_v46 = vmax.f32 %v8399_v32, 0.0 }
 0x1de   : > { %v2731_v43 = vmax.f32 %v8368_v35, 0.0  ;;  %v2733_v44 = vmax.f32 %v8400_v36, 0.0 }
 0x1df   : > { %v2732_v47 = vmax.f32 %v8369_v39, 0.0  ;;  %v2734_v48 = vmax.f32 %v8401_v40, 0.0 }
 0x1e0   : > { %v2791_v49 = vpack.c.bf16 %v2731_v43, %v2727_v41  ;;  %v2793_v50 = vpack.c.bf16 %v2733_v44, %v2729_v42 }
 0x1e1   : > { %v2792_v51 = vpack.c.bf16 %v2732_v47, %v2728_v45  ;;  %v2794_v52 = vpack.c.bf16 %v2734_v48, %v2730_v46  ;;  %v2206_v53 = vpop.f32.mrb[4].mxu0  ;;  %v2658_v54 = vpop.f32.mrb[4].mxu1 }
 0x1e2   : > { %v8370_v55 = vadd.f32 %v2206_v53, %v10893_v20  ;;  %v8402_v56 = vadd.f32 %v2658_v54, %v10896_v21  ;;  %v2208_v57 = vpop.f32.mrb[5].mxu0  ;;  %v2660_v58 = vpop.f32.mrb[5].mxu1 }
 0x1e3   : > { %v8371_v59 = vadd.f32 %v2208_v57, %v10899_v22  ;;  %v8403_v60 = vadd.f32 %v2660_v58, %v10902_v23  ;;  %v2210_v61 = vpop.f32.mrb[6].mxu0  ;;  %v2662_v62 = vpop.f32.mrb[6].mxu1  ;;  %3118 = vmatprep.mubr.bf16.mxu0 %v2792_v51  ;;  %3215 = vmatprep.mubr.bf16.mxu1 %v2794_v52 }
 0x1e4   : > { %v8372_v63 = vadd.f32 %v2210_v61, %v10893_v20  ;;  %v8404_v0 = vadd.f32 %v2662_v62, %v10896_v21  ;;  %v2212_v1 = vpop.f32.mrb[7].mxu0  ;;  %v2664_v2 = vpop.f32.mrb[7].mxu1  ;;  %3119 = vmatmul.mubr.bf16.vlgmr.msra.gmra.mrb[32].mxu0 %v2791_v49  ;;  %3216 = vmatmul.mubr.bf16.vlgmr.msra.gmra.mrb[32].mxu1 %v2793_v50  ;;  %v2735_v5 = vmax.f32 %v8370_v55, 0.0  ;;  %v2737_v6 = vmax.f32 %v8402_v56, 0.0 }
 0x1e5   : > { %v8373_v3 = vadd.f32 %v2212_v1, %v10899_v22  ;;  %v8405_v4 = vadd.f32 %v2664_v2, %v10902_v23  ;;  %v2736_v9 = vmax.f32 %v8371_v59, 0.0  ;;  %v2738_v10 = vmax.f32 %v8403_v60, 0.0 }
 0x1e6   : > { %v2739_v7 = vmax.f32 %v8372_v63, 0.0  ;;  %v2741_v8 = vmax.f32 %v8404_v0, 0.0 }
 0x1e7   : > { %v2740_v11 = vmax.f32 %v8373_v3, 0.0  ;;  %v2742_v12 = vmax.f32 %v8405_v4, 0.0 }
 0x1e8   : > { %v2795_v13 = vpack.c.bf16 %v2739_v7, %v2735_v5  ;;  %v2797_v17 = vpack.c.bf16 %v2741_v8, %v2737_v6 }
 0x1e9   : > { %v2796_v25 = vpack.c.bf16 %v2740_v11, %v2736_v9  ;;  %v2798_v26 = vpack.c.bf16 %v2742_v12, %v2738_v10  ;;  %v2216_v27 = vpop.f32.mrb[8].mxu0  ;;  %v2668_v28 = vpop.f32.mrb[8].mxu1 }
 0x1ea   : > { %v8374_v29 = vadd.f32 %v2216_v27, %v10893_v20  ;;  %v8406_v30 = vadd.f32 %v2668_v28, %v10896_v21  ;;  %v2218_v31 = vpop.f32.mrb[9].mxu0  ;;  %v2670_v32 = vpop.f32.mrb[9].mxu1 }
 0x1eb   : > { %v8375_v33 = vadd.f32 %v2218_v31, %v10899_v22  ;;  %v8407_v34 = vadd.f32 %v2670_v32, %v10902_v23  ;;  %v2220_v35 = vpop.f32.mrb[10].mxu0  ;;  %v2672_v36 = vpop.f32.mrb[10].mxu1  ;;  %3126 = vmatprep.mubr.bf16.mxu0 %v2796_v25  ;;  %3223 = vmatprep.mubr.bf16.mxu1 %v2798_v26 }
 0x1ec   : > { %v8376_v37 = vadd.f32 %v2220_v35, %v10893_v20  ;;  %v8408_v38 = vadd.f32 %v2672_v36, %v10896_v21  ;;  %v2222_v39 = vpop.f32.mrb[11].mxu0  ;;  %v2674_v40 = vpop.f32.mrb[11].mxu1  ;;  %3127 = vmatmul.mubr.bf16.gmra.mrb[36].mxu0 %v2795_v13  ;;  %3224 = vmatmul.mubr.bf16.gmra.mrb[36].mxu1 %v2797_v17  ;;  %v2743_v43 = vmax.f32 %v8374_v29, 0.0  ;;  %v2745_v44 = vmax.f32 %v8406_v30, 0.0 }
 0x1ed   : > { %v8377_v41 = vadd.f32 %v2222_v39, %v10899_v22  ;;  %v8409_v42 = vadd.f32 %v2674_v40, %v10902_v23  ;;  %v2744_v47 = vmax.f32 %v8375_v33, 0.0  ;;  %v2746_v48 = vmax.f32 %v8407_v34, 0.0 }
 0x1ee   : > { %v2747_v45 = vmax.f32 %v8376_v37, 0.0  ;;  %v2749_v46 = vmax.f32 %v8408_v38, 0.0 }
 0x1ef   : > { %v2748_v49 = vmax.f32 %v8377_v41, 0.0  ;;  %v2750_v50 = vmax.f32 %v8409_v42, 0.0 }
 0x1f0   : > { %v2799_v51 = vpack.c.bf16 %v2747_v45, %v2743_v43  ;;  %v2801_v52 = vpack.c.bf16 %v2749_v46, %v2745_v44 }
 0x1f1   : > { %v2800_v53 = vpack.c.bf16 %v2748_v49, %v2744_v47  ;;  %v2802_v54 = vpack.c.bf16 %v2750_v50, %v2746_v48  ;;  %v2226_v55 = vpop.f32.mrb[12].mxu0  ;;  %v2678_v56 = vpop.f32.mrb[12].mxu1 }
 0x1f2   : > { %v8378_v57 = vadd.f32 %v2226_v55, %v10893_v20  ;;  %v8410_v58 = vadd.f32 %v2678_v56, %v10896_v21  ;;  %v2228_v59 = vpop.f32.mrb[13].mxu0  ;;  %v2680_v60 = vpop.f32.mrb[13].mxu1 }
 0x1f3   : > { %v8379_v61 = vadd.f32 %v2228_v59, %v10899_v22  ;;  %v8411_v62 = vadd.f32 %v2680_v60, %v10902_v23  ;;  %v2230_v63 = vpop.f32.mrb[14].mxu0  ;;  %v2682_v0 = vpop.f32.mrb[14].mxu1  ;;  %3134 = vmatprep.mubr.bf16.mxu0 %v2800_v53  ;;  %3231 = vmatprep.mubr.bf16.mxu1 %v2802_v54 }
 0x1f4   : > { %v8380_v1 = vadd.f32 %v2230_v63, %v10893_v20  ;;  %v8412_v2 = vadd.f32 %v2682_v0, %v10896_v21  ;;  %v2232_v3 = vpop.f32.mrb[15].mxu0  ;;  %v2684_v4 = vpop.f32.mrb[15].mxu1  ;;  %3135 = vmatmul.mubr.bf16.gmra.mrb[40].mxu0 %v2799_v51  ;;  %3232 = vmatmul.mubr.bf16.gmra.mrb[40].mxu1 %v2801_v52  ;;  %v2751_v7 = vmax.f32 %v8378_v57, 0.0  ;;  %v2753_v8 = vmax.f32 %v8410_v58, 0.0 }
 0x1f5   : > { %v8381_v5 = vadd.f32 %v2232_v3, %v10899_v22  ;;  %v8413_v6 = vadd.f32 %v2684_v4, %v10902_v23  ;;  %v2752_v11 = vmax.f32 %v8379_v61, 0.0  ;;  %v2754_v12 = vmax.f32 %v8411_v62, 0.0 }
 0x1f6   : > { %v2755_v9 = vmax.f32 %v8380_v1, 0.0  ;;  %v2757_v10 = vmax.f32 %v8412_v2, 0.0 }
 0x1f7   : > { %v2756_v13 = vmax.f32 %v8381_v5, 0.0  ;;  %v2758_v17 = vmax.f32 %v8413_v6, 0.0 }
 0x1f8   : > { %v2803_v25 = vpack.c.bf16 %v2755_v9, %v2751_v7  ;;  %v2805_v26 = vpack.c.bf16 %v2757_v10, %v2753_v8 }
 0x1f9   : > { %v2804_v27 = vpack.c.bf16 %v2756_v13, %v2752_v11  ;;  %v2806_v28 = vpack.c.bf16 %v2758_v17, %v2754_v12  ;;  %v2236_v29 = vpop.f32.mrb[16].mxu0  ;;  %v2688_v30 = vpop.f32.mrb[16].mxu1 }
 0x1fa   : > { %v8382_v31 = vadd.f32 %v2236_v29, %v10893_v20  ;;  %v8414_v32 = vadd.f32 %v2688_v30, %v10896_v21  ;;  %v2238_v33 = vpop.f32.mrb[17].mxu0  ;;  %v2690_v34 = vpop.f32.mrb[17].mxu1 }
 0x1fb   : > { %v8383_v35 = vadd.f32 %v2238_v33, %v10899_v22  ;;  %v8415_v36 = vadd.f32 %v2690_v34, %v10902_v23  ;;  %v2240_v37 = vpop.f32.mrb[18].mxu0  ;;  %v2692_v38 = vpop.f32.mrb[18].mxu1  ;;  %3142 = vmatprep.mubr.bf16.mxu0 %v2804_v27  ;;  %3239 = vmatprep.mubr.bf16.mxu1 %v2806_v28 }
 0x1fc   : > { %v8384_v39 = vadd.f32 %v2240_v37, %v10893_v20  ;;  %v8416_v40 = vadd.f32 %v2692_v38, %v10896_v21  ;;  %v2242_v41 = vpop.f32.mrb[19].mxu0  ;;  %v2694_v42 = vpop.f32.mrb[19].mxu1  ;;  %3143 = vmatmul.mubr.bf16.gmra.mrb[44].mxu0 %v2803_v25  ;;  %3240 = vmatmul.mubr.bf16.gmra.mrb[44].mxu1 %v2805_v26  ;;  %v2759_v45 = vmax.f32 %v8382_v31, 0.0  ;;  %v2761_v46 = vmax.f32 %v8414_v32, 0.0 }
 0x1fd   : > { %v8385_v43 = vadd.f32 %v2242_v41, %v10899_v22  ;;  %v8417_v44 = vadd.f32 %v2694_v42, %v10902_v23  ;;  %v2760_v49 = vmax.f32 %v8383_v35, 0.0  ;;  %v2762_v50 = vmax.f32 %v8415_v36, 0.0 }
 0x1fe   : > { %v2763_v47 = vmax.f32 %v8384_v39, 0.0  ;;  %v2765_v48 = vmax.f32 %v8416_v40, 0.0 }
 0x1ff   : > { %v2764_v51 = vmax.f32 %v8385_v43, 0.0  ;;  %v2766_v52 = vmax.f32 %v8417_v44, 0.0 }
 0x200   : > { %v2807_v53 = vpack.c.bf16 %v2763_v47, %v2759_v45  ;;  %v2809_v54 = vpack.c.bf16 %v2765_v48, %v2761_v46 }
 0x201   : > { %v2808_v55 = vpack.c.bf16 %v2764_v51, %v2760_v49  ;;  %v2810_v56 = vpack.c.bf16 %v2766_v52, %v2762_v50  ;;  %v2246_v57 = vpop.f32.mrb[20].mxu0  ;;  %v2698_v58 = vpop.f32.mrb[20].mxu1 }
 0x202   : > { %v8386_v59 = vadd.f32 %v2246_v57, %v10893_v20  ;;  %v8418_v60 = vadd.f32 %v2698_v58, %v10896_v21  ;;  %v2248_v61 = vpop.f32.mrb[21].mxu0  ;;  %v2700_v62 = vpop.f32.mrb[21].mxu1 }
 0x203   : > { %v8387_v63 = vadd.f32 %v2248_v61, %v10899_v22  ;;  %v8419_v0 = vadd.f32 %v2700_v62, %v10902_v23  ;;  %v2250_v1 = vpop.f32.mrb[22].mxu0  ;;  %v2702_v2 = vpop.f32.mrb[22].mxu1  ;;  %3150 = vmatprep.mubr.bf16.mxu0 %v2808_v55  ;;  %3247 = vmatprep.mubr.bf16.mxu1 %v2810_v56 }
 0x204   : > { %v8388_v3 = vadd.f32 %v2250_v1, %v10893_v20  ;;  %v8420_v4 = vadd.f32 %v2702_v2, %v10896_v21  ;;  %v2252_v5 = vpop.f32.mrb[23].mxu0  ;;  %v2704_v6 = vpop.f32.mrb[23].mxu1  ;;  %3151 = vmatmul.mubr.bf16.gmra.mrb[48].mxu0 %v2807_v53  ;;  %3248 = vmatmul.mubr.bf16.gmra.mrb[48].mxu1 %v2809_v54  ;;  %v2767_v9 = vmax.f32 %v8386_v59, 0.0  ;;  %v2769_v10 = vmax.f32 %v8418_v60, 0.0 }
 0x205   : > { %v8389_v7 = vadd.f32 %v2252_v5, %v10899_v22  ;;  %v8421_v8 = vadd.f32 %v2704_v6, %v10902_v23  ;;  %v2768_v13 = vmax.f32 %v8387_v63, 0.0  ;;  %v2770_v17 = vmax.f32 %v8419_v0, 0.0 }
 0x206   : > { %v2771_v11 = vmax.f32 %v8388_v3, 0.0  ;;  %v2773_v12 = vmax.f32 %v8420_v4, 0.0 }
 0x207   : > { %v2772_v25 = vmax.f32 %v8389_v7, 0.0  ;;  %v2774_v26 = vmax.f32 %v8421_v8, 0.0 }
 0x208   : > { %v2811_v27 = vpack.c.bf16 %v2771_v11, %v2767_v9  ;;  %v2813_v28 = vpack.c.bf16 %v2773_v12, %v2769_v10 }
 0x209   : > { %v2812_v29 = vpack.c.bf16 %v2772_v25, %v2768_v13  ;;  %v2814_v30 = vpack.c.bf16 %v2774_v26, %v2770_v17  ;;  %v2256_v31 = vpop.f32.mrb[24].mxu0  ;;  %v2708_v32 = vpop.f32.mrb[24].mxu1 }
 0x20a   : > { %v8390_v33 = vadd.f32 %v2256_v31, %v10893_v20  ;;  %v8422_v34 = vadd.f32 %v2708_v32, %v10896_v21  ;;  %v2258_v35 = vpop.f32.mrb[25].mxu0  ;;  %v2710_v36 = vpop.f32.mrb[25].mxu1 }
 0x20b   : > { %v8391_v37 = vadd.f32 %v2258_v35, %v10899_v22  ;;  %v8423_v38 = vadd.f32 %v2710_v36, %v10902_v23  ;;  %v2260_v39 = vpop.f32.mrb[26].mxu0  ;;  %v2712_v40 = vpop.f32.mrb[26].mxu1  ;;  %3158 = vmatprep.mubr.bf16.mxu0 %v2812_v29  ;;  %3255 = vmatprep.mubr.bf16.mxu1 %v2814_v30 }
 0x20c   : > { %v8392_v41 = vadd.f32 %v2260_v39, %v10893_v20  ;;  %v8424_v42 = vadd.f32 %v2712_v40, %v10896_v21  ;;  %v2262_v43 = vpop.f32.mrb[27].mxu0  ;;  %v2714_v44 = vpop.f32.mrb[27].mxu1  ;;  %3159 = vmatmul.mubr.bf16.gmra.mrb[52].mxu0 %v2811_v27  ;;  %3256 = vmatmul.mubr.bf16.gmra.mrb[52].mxu1 %v2813_v28  ;;  %v2775_v47 = vmax.f32 %v8390_v33, 0.0  ;;  %v2777_v48 = vmax.f32 %v8422_v34, 0.0  ;;  %v10979_v33 = vld [vmem:[%s12603_s4] ss:$0 sm:$0xff] }
 0x20d   : > { %v8393_v45 = vadd.f32 %v2262_v43, %v10899_v22  ;;  %v8425_v46 = vadd.f32 %v2714_v44, %v10902_v23  ;;  %v2776_v51 = vmax.f32 %v8391_v37, 0.0  ;;  %v2778_v52 = vmax.f32 %v8423_v38, 0.0 }
 0x20e   : > { %v2779_v49 = vmax.f32 %v8392_v41, 0.0  ;;  %v2781_v50 = vmax.f32 %v8424_v42, 0.0 }
 0x20f   : > { %v2780_v53 = vmax.f32 %v8393_v45, 0.0  ;;  %v2782_v54 = vmax.f32 %v8425_v46, 0.0 }
 0x210   : > { %v2815_v55 = vpack.c.bf16 %v2779_v49, %v2775_v47  ;;  %v2817_v56 = vpack.c.bf16 %v2781_v50, %v2777_v48 }
 0x211   : > { %v2816_v57 = vpack.c.bf16 %v2780_v53, %v2776_v51  ;;  %v2818_v58 = vpack.c.bf16 %v2782_v54, %v2778_v52  ;;  %v2266_v59 = vpop.f32.mrb[28].mxu0  ;;  %v2718_v60 = vpop.f32.mrb[28].mxu1 }
 0x212   : > { %v8394_v61 = vadd.f32 %v2266_v59, %v10893_v20  ;;  %v8426_v62 = vadd.f32 %v2718_v60, %v10896_v21  ;;  %v2268_v63 = vpop.f32.mrb[29].mxu0  ;;  %v2720_v0 = vpop.f32.mrb[29].mxu1 }
 0x213   : > { %v8395_v1 = vadd.f32 %v2268_v63, %v10899_v22  ;;  %v8427_v2 = vadd.f32 %v2720_v0, %v10902_v23  ;;  %v2270_v3 = vpop.f32.mrb[30].mxu0  ;;  %v2722_v4 = vpop.f32.mrb[30].mxu1  ;;  %3166 = vmatprep.mubr.bf16.mxu0 %v2816_v57  ;;  %3263 = vmatprep.mubr.bf16.mxu1 %v2818_v58 }
 0x214   : > { %v8396_v5 = vadd.f32 %v2270_v3, %v10893_v20  ;;  %v8428_v6 = vadd.f32 %v2722_v4, %v10896_v21  ;;  %v2272_v7 = vpop.f32.mrb[31].mxu0  ;;  %v2724_v8 = vpop.f32.mrb[31].mxu1  ;;  %3167 = vmatmul.mubr.bf16.gmra.mrb[56].mxu0 %v2815_v55  ;;  %3264 = vmatmul.mubr.bf16.gmra.mrb[56].mxu1 %v2817_v56  ;;  %v2783_v11 = vmax.f32 %v8394_v61, 0.0  ;;  %v2785_v12 = vmax.f32 %v8426_v62, 0.0  ;;  %v9157_v3 = vld [vmem:[%s12604_s5 + $0xc] ss:$16 sps:$4 sm:$0xff]  }
 0x215   : > { %v8397_v9 = vadd.f32 %v2272_v7, %v10899_v22  ;;  %v8429_v10 = vadd.f32 %v2724_v8, %v10902_v23  ;;  %v2784_v25 = vmax.f32 %v8395_v1, 0.0  ;;  %v2786_v26 = vmax.f32 %v8427_v2, 0.0  ;;  %v9152_v22 = vld [vmem:[%s12604_s5] ss:$16 sps:$4 sm:$0xff]   ;;  %v9154_v23 = vld [vmem:[%s12604_s5 + $0x4] ss:$16 sps:$4 sm:$0xff]   ;;  %3631 = vmatprep.subr.bf16.mxu1 %v9157_v3 }
 0x216   : > { %v2787_v13 = vmax.f32 %v8396_v5, 0.0  ;;  %v2789_v17 = vmax.f32 %v8428_v6, 0.0  ;;  %3518 = vmatprep.subr.bf16.mxu0 %v9154_v23  ;;  %v9155_v8 = vld [vmem:[%s12604_s5 + $0x8] ss:$16 sps:$4 sm:$0xff]  }
 0x217   : > { %v2788_v27 = vmax.f32 %v8397_v9, 0.0  ;;  %v2790_v28 = vmax.f32 %v8429_v10, 0.0  ;;  %3519 = vmatpush1.bf16.msra.mxu0 %v9152_v22  ;;  %3632 = vmatpush1.bf16.msra.mxu1 %v9155_v8 }
 0x218   : > { %v2819_v29 = vpack.c.bf16 %v2787_v13, %v2783_v11  ;;  %v2821_v20 = vpack.c.bf16 %v2789_v17, %v2785_v12 }
 0x219   : > { %v2820_v30 = vpack.c.bf16 %v2788_v27, %v2784_v25  ;;  %v2822_v21 = vpack.c.bf16 %v2790_v28, %v2786_v26 }
 0x21b   : > { %3174 = vmatprep.mubr.bf16.mxu0 %v2820_v30  ;;  %3271 = vmatprep.mubr.bf16.mxu1 %v2822_v21 }
 0x21c   : > { %3175 = vmatmul.mubr.bf16.gmra.mrb[60].mxu0 %v2819_v29  ;;  %3272 = vmatmul.mubr.bf16.gmra.mrb[60].mxu1 %v2821_v20 }
 0x21d   : > { %3550 = vmatprep.mubr.bf16.mxu0 %v9967_v24  ;;  %3663 = vmatprep.mubr.bf16.mxu1 %v9967_v24 }
 0x2b7   : > { %v8126_v31 = vpop.f32.mrb[32].mxu0  ;;  %v8190_v32 = vpop.f32.mrb[32].mxu1 }
 0x2b8   : > { %v8127_v34 = vpop.f32.mrb[33].mxu0  ;;  %v8191_v35 = vpop.f32.mrb[33].mxu1 }
 0x2b9   : > { %v8128_v36 = vadd.f32 %v8127_v34, %v8126_v31  ;;  %v8192_v37 = vadd.f32 %v8191_v35, %v8190_v32  ;;  %v8129_v38 = vpop.f32.mrb[34].mxu0  ;;  %v8193_v39 = vpop.f32.mrb[34].mxu1 }
 0x2ba   : > { %v8130_v40 = vpop.f32.mrb[35].mxu0  ;;  %v8194_v41 = vpop.f32.mrb[35].mxu1 }
 0x2bb   : > { %v3121_v42 = vadd.f32 %v8128_v36, %v10979_v33  ;;  %v8131_v43 = vadd.f32 %v8130_v40, %v8129_v38  ;;  %v8195_v44 = vadd.f32 %v8194_v41, %v8193_v39 }
 0x2bd   : > { %v10990_v45 = vadd.f32 %v8192_v37, %v3121_v42  ;;  %v3124_v46 = vadd.f32 %v8131_v43, %v10979_v33 }
 0x2bf   : > { %v3296_v47 = vmul.f32 0.5, %v10990_v45  ;;  %7246 = vst [vmem:[%s10988_s19] sm:$0xff] %v10990_v45  ;;  %v10996_v48 = vadd.f32 %v8195_v44, %v3124_v46  ;;  %v8132_v49 = vpop.f32.mrb[36].mxu0  ;;  %v8196_v50 = vpop.f32.mrb[36].mxu1 }
 0x2c0   : > { %v8133_v51 = vpop.f32.mrb[37].mxu0  ;;  %v8197_v52 = vpop.f32.mrb[37].mxu1 }
 0x2c1   : > { %v3312_v53 = vmul.f32 1.442695, %v3296_v47  ;;  %v3297_v54 = vmul.f32 0.5, %v10996_v48  ;;  %7247 = vst [vmem:[%s10988_s19 + $0x8] sm:$0xff] %v10996_v48  ;;  %v8134_v55 = vadd.f32 %v8133_v51, %v8132_v49  ;;  %v8198_v56 = vadd.f32 %v8197_v52, %v8196_v50  ;;  %v8135_v57 = vpop.f32.mrb[38].mxu0  ;;  %v8199_v58 = vpop.f32.mrb[38].mxu1 }
 0x2c2   : > { %v8136_v59 = vpop.f32.mrb[39].mxu0  ;;  %v8200_v60 = vpop.f32.mrb[39].mxu1 }
 0x2c3   : > { %9478 = vpow2.f32 %v3312_v53  ;;  %v3314_v61 = vmul.f32 1.442695, %v3297_v54  ;;  %v3129_v62 = vadd.f32 %v8134_v55, %v10979_v33  ;;  %v8137_v63 = vadd.f32 %v8136_v59, %v8135_v57 }
 0x2c4   : > { %v8201_v0 = vadd.f32 %v8200_v60, %v8199_v58 }
 0x2c5   : > { %v11002_v1 = vadd.f32 %v8198_v56, %v3129_v62  ;;  %v3132_v2 = vadd.f32 %v8137_v63, %v10979_v33  ;;  %9480 = vpow2.f32 %v3314_v61 }
 0x2c7   : > { %v3298_v4 = vmul.f32 0.5, %v11002_v1  ;;  %7248 = vst [vmem:[%s10988_s19 + $0x10] sm:$0xff] %v11002_v1  ;;  %v11011_v5 = vadd.f32 %v8201_v0, %v3132_v2  ;;  %v8138_v6 = vpop.f32.mrb[40].mxu0  ;;  %v8202_v7 = vpop.f32.mrb[40].mxu1 }
 0x2c8   : > { %v8139_v9 = vpop.f32.mrb[41].mxu0  ;;  %v8203_v10 = vpop.f32.mrb[41].mxu1 }
 0x2c9   : > { %v3316_v11 = vmul.f32 1.442695, %v3298_v4  ;;  %v3299_v12 = vmul.f32 0.5, %v11011_v5  ;;  %7249 = vst [vmem:[%s10988_s19 + $0x18] sm:$0xff] %v11011_v5  ;;  %v8140_v13 = vadd.f32 %v8139_v9, %v8138_v6  ;;  %v8204_v17 = vadd.f32 %v8203_v10, %v8202_v7  ;;  %v8141_v25 = vpop.f32.mrb[42].mxu0  ;;  %v8205_v26 = vpop.f32.mrb[42].mxu1 }
 0x2ca   : > { %v8142_v27 = vpop.f32.mrb[43].mxu0  ;;  %v8206_v28 = vpop.f32.mrb[43].mxu1 }
 0x2cb   : > { %9482 = vpow2.f32 %v3316_v11  ;;  %v3318_v29 = vmul.f32 1.442695, %v3299_v12  ;;  %v3137_v20 = vadd.f32 %v8140_v13, %v10979_v33  ;;  %v8143_v30 = vadd.f32 %v8142_v27, %v8141_v25 }
 0x2cc   : > { %v8207_v21 = vadd.f32 %v8206_v28, %v8205_v26 }
 0x2cd   : > { %v9479_v22 = vpop.eup %9478  ;;  %v11020_v23 = vadd.f32 %v8204_v17, %v3137_v20  ;;  %v3140_v31 = vadd.f32 %v8143_v30, %v10979_v33  ;;  %9484 = vpow2.f32 %v3318_v29 }
 0x2ce   : > { %3360 = vrot.lane.b32.xlu0 %v9479_v22, %s9968_s24 }
 0x2cf   : > { %v3300_v32 = vmul.f32 0.5, %v11020_v23  ;;  %7250 = vst [vmem:[%s10988_s19 + $0x20] sm:$0xff] %v11020_v23  ;;  %v11027_v34 = vadd.f32 %v8207_v21, %v3140_v31  ;;  %v8144_v35 = vpop.f32.mrb[44].mxu0  ;;  %v8208_v36 = vpop.f32.mrb[44].mxu1 }
 0x2d0   : > { %v8145_v37 = vpop.f32.mrb[45].mxu0  ;;  %v8209_v38 = vpop.f32.mrb[45].mxu1 }
 0x2d1   : > { %v9481_v39 = vpop.eup %9480  ;;  %v3320_v40 = vmul.f32 1.442695, %v3300_v32  ;;  %v3301_v41 = vmul.f32 0.5, %v11027_v34  ;;  %7251 = vst [vmem:[%s10988_s19 + $0x28] sm:$0xff] %v11027_v34  ;;  %v8146_v42 = vadd.f32 %v8145_v37, %v8144_v35  ;;  %v8210_v43 = vadd.f32 %v8209_v38, %v8208_v36  ;;  %v8147_v44 = vpop.f32.mrb[46].mxu0 }
 0x2d2   : > { %v8211_v46 = vpop.f32.mrb[46].mxu1  ;;  %v8148_v47 = vpop.f32.mrb[47].mxu0  ;;  %3362 = vrot.lane.b32.xlu0 %v9481_v39, %s9968_s24 }
 0x2d3   : > { %v8212_v49 = vpop.f32.mrb[47].mxu1  ;;  %9486 = vpow2.f32 %v3320_v40  ;;  %v3322_v50 = vmul.f32 1.442695, %v3301_v41  ;;  %v3145_v51 = vadd.f32 %v8146_v42, %v10979_v33  ;;  %v8149_v52 = vadd.f32 %v8148_v47, %v8147_v44 }
 0x2d4   : > { %v8213_v53 = vadd.f32 %v8212_v49, %v8211_v46 }
 0x2d5   : > { %v9483_v54 = vpop.eup %9482  ;;  %9488 = vpow2.f32 %v3322_v50  ;;  %v11034_v55 = vadd.f32 %v8210_v43, %v3145_v51  ;;  %v3148_v56 = vadd.f32 %v8149_v52, %v10979_v33 }
 0x2d6   : > { %3364 = vrot.lane.b32.xlu1 %v9483_v54, %s9968_s24 }
 0x2d7   : > { %v3302_v57 = vmul.f32 0.5, %v11034_v55  ;;  %7252 = vst [vmem:[%s10988_s19 + $0x30] sm:$0xff] %v11034_v55  ;;  %v11041_v58 = vadd.f32 %v8213_v53, %v3148_v56  ;;  %v8150_v59 = vpop.f32.mrb[48].mxu0  ;;  %v8214_v60 = vpop.f32.mrb[48].mxu1 }
 0x2d8   : > { %v8151_v61 = vpop.f32.mrb[49].mxu0  ;;  %v8215_v62 = vpop.f32.mrb[49].mxu1 }
 0x2d9   : > { %v9485_v63 = vpop.eup %9484  ;;  %v3324_v0 = vmul.f32 1.442695, %v3302_v57  ;;  %v3303_v2 = vmul.f32 0.5, %v11041_v58  ;;  %7253 = vst [vmem:[%s10988_s19 + $0x38] sm:$0xff] %v11041_v58  ;;  %v8152_v3 = vadd.f32 %v8151_v61, %v8150_v59  ;;  %v8216_v4 = vadd.f32 %v8215_v62, %v8214_v60  ;;  %v8153_v6 = vpop.f32.mrb[50].mxu0 }
 0x2da   : > { %v8217_v7 = vpop.f32.mrb[50].mxu1  ;;  %v8154_v8 = vpop.f32.mrb[51].mxu0  ;;  %3366 = vrot.lane.b32.xlu1 %v9485_v63, %s9968_s24 }
 0x2db   : > { %v8218_v9 = vpop.f32.mrb[51].mxu1  ;;  %9490 = vpow2.f32 %v3324_v0  ;;  %v3326_v10 = vmul.f32 1.442695, %v3303_v2  ;;  %v3153_v11 = vadd.f32 %v8152_v3, %v10979_v33  ;;  %v8155_v12 = vadd.f32 %v8154_v8, %v8153_v6 }
 0x2dc   : > { %v8219_v13 = vadd.f32 %v8218_v9, %v8217_v7 }
 0x2dd   : > { %v9487_v17 = vpop.eup %9486  ;;  %9492 = vpow2.f32 %v3326_v10  ;;  %v11048_v25 = vadd.f32 %v8216_v4, %v3153_v11  ;;  %v3156_v26 = vadd.f32 %v8155_v12, %v10979_v33 }
 0x2de   : > { %3368 = vrot.lane.b32.xlu0 %v9487_v17, %s9968_s24 }
 0x2df   : > { %v9489_v27 = vpop.eup %9488  ;;  %v3304_v28 = vmul.f32 0.5, %v11048_v25  ;;  %7254 = vst [vmem:[%s10988_s19 + $0x40] sm:$0xff] %v11048_v25  ;;  %v11055_v29 = vadd.f32 %v8219_v13, %v3156_v26  ;;  %v8156_v20 = vpop.f32.mrb[52].mxu0 }
 0x2e0   : > { %v8220_v30 = vpop.f32.mrb[52].mxu1  ;;  %v8157_v21 = vpop.f32.mrb[53].mxu0  ;;  %3370 = vrot.lane.b32.xlu1 %v9489_v27, %s9968_s24 }
 0x2e1   : > { %v8221_v22 = vpop.f32.mrb[53].mxu1  ;;  %v3328_v31 = vmul.f32 1.442695, %v3304_v28  ;;  %v3305_v32 = vmul.f32 0.5, %v11055_v29  ;;  %7255 = vst [vmem:[%s10988_s19 + $0x48] sm:$0xff] %v11055_v29  ;;  %v8158_v35 = vadd.f32 %v8157_v21, %v8156_v20  ;;  %v8159_v37 = vpop.f32.mrb[54].mxu0 }
 0x2e2   : > { %v8222_v36 = vadd.f32 %v8221_v22, %v8220_v30  ;;  %v8223_v38 = vpop.f32.mrb[54].mxu1  ;;  %v8160_v39 = vpop.f32.mrb[55].mxu0 }
 0x2e3   : > { %v8224_v40 = vpop.f32.mrb[55].mxu1  ;;  %9494 = vpow2.f32 %v3328_v31  ;;  %v3330_v41 = vmul.f32 1.442695, %v3305_v32  ;;  %v3161_v42 = vadd.f32 %v8158_v35, %v10979_v33  ;;  %v8161_v43 = vadd.f32 %v8160_v39, %v8159_v37 }
 0x2e4   : > { %v8225_v44 = vadd.f32 %v8224_v40, %v8223_v38 }
 0x2e5   : > { %v9491_v46 = vpop.eup %9490  ;;  %9496 = vpow2.f32 %v3330_v41  ;;  %v11062_v47 = vadd.f32 %v8222_v36, %v3161_v42  ;;  %v3164_v49 = vadd.f32 %v8161_v43, %v10979_v33 }
 0x2e6   : > { %3372 = vrot.lane.b32.xlu0 %v9491_v46, %s9968_s24 }
 0x2e7   : > { %v9493_v50 = vpop.eup %9492  ;;  %v3306_v51 = vmul.f32 0.5, %v11062_v47  ;;  %7256 = vst [vmem:[%s10988_s19 + $0x50] sm:$0xff] %v11062_v47  ;;  %v11069_v52 = vadd.f32 %v8225_v44, %v3164_v49  ;;  %v8162_v53 = vpop.f32.mrb[56].mxu0 }
 0x2e8   : > { %v8226_v54 = vpop.f32.mrb[56].mxu1  ;;  %v8163_v56 = vpop.f32.mrb[57].mxu0  ;;  %3374 = vrot.lane.b32.xlu1 %v9493_v50, %s9968_s24 }
 0x2e9   : > { %v8227_v57 = vpop.f32.mrb[57].mxu1  ;;  %v3332_v59 = vmul.f32 1.442695, %v3306_v51  ;;  %v3307_v60 = vmul.f32 0.5, %v11069_v52  ;;  %7257 = vst [vmem:[%s10988_s19 + $0x58] sm:$0xff] %v11069_v52  ;;  %v8164_v61 = vadd.f32 %v8163_v56, %v8162_v53  ;;  %v8165_v63 = vpop.f32.mrb[58].mxu0 }
 0x2ea   : > { %v8228_v62 = vadd.f32 %v8227_v57, %v8226_v54  ;;  %v8229_v0 = vpop.f32.mrb[58].mxu1  ;;  %v8166_v2 = vpop.f32.mrb[59].mxu0  ;;  %v9160_v57 = vld [vmem:[%s12606_s7 + $0x4] ss:$28 sps:$4 sm:$0xff]  }
 0x2eb   : > { %v8230_v3 = vpop.f32.mrb[59].mxu1  ;;  %9498 = vpow2.f32 %v3332_v59  ;;  %v3334_v4 = vmul.f32 1.442695, %v3307_v60  ;;  %v3169_v6 = vadd.f32 %v8164_v61, %v10979_v33  ;;  %v8167_v7 = vadd.f32 %v8166_v2, %v8165_v63  ;;  %v9163_v59 = vld [vmem:[%s12606_s7 + $0xc] ss:$28 sps:$4 sm:$0xff]   ;;  %5285 = vmatprep.subr.bf16.mxu0 %v9160_v57 }
 0x2ec   : > { %v8231_v8 = vadd.f32 %v8230_v3, %v8229_v0  ;;  %5511 = vmatprep.subr.bf16.mxu1 %v9163_v59  ;;  %v3281_v0 = vld [vmem:[%s11118_s14 + $0x8] sm:$0xff]  ;;  %v3287_v59 = vld [vmem:[%s11118_s14 + $0x38] sm:$0xff] }
 0x2ed   : > { %v9495_v9 = vpop.eup %9494  ;;  %9500 = vpow2.f32 %v3334_v4  ;;  %v11076_v10 = vadd.f32 %v8228_v62, %v3169_v6  ;;  %v3172_v11 = vadd.f32 %v8167_v7, %v10979_v33  ;;  %v3280_v62 = vld [vmem:[%s11118_s14] sm:$0xff] }
 0x2ee   : > { %3376 = vrot.lane.b32.xlu0 %v9495_v9, %s9968_s24 }
 0x2ef   : > { %v9497_v12 = vpop.eup %9496  ;;  %v3308_v13 = vmul.f32 0.5, %v11076_v10  ;;  %7258 = vst [vmem:[%s10988_s19 + $0x60] sm:$0xff] %v11076_v10  ;;  %v11083_v17 = vadd.f32 %v8231_v8, %v3172_v11  ;;  %v8168_v26 = vpop.f32.mrb[60].mxu0  ;;  %v3282_v8 = vld [vmem:[%s11118_s14 + $0x10] sm:$0xff] }
 0x2f0   : > { %v8232_v27 = vpop.f32.mrb[60].mxu1  ;;  %v8169_v28 = vpop.f32.mrb[61].mxu0  ;;  %3378 = vrot.lane.b32.xlu1 %v9497_v12, %s9968_s24  ;;  %v9158_v12 = vld [vmem:[%s12606_s7] ss:$28 sps:$4 sm:$0xff]  }
 0x2f1   : > { %v8233_v20 = vpop.f32.mrb[61].mxu1  ;;  %v3336_v30 = vmul.f32 1.442695, %v3308_v13  ;;  %v3309_v21 = vmul.f32 0.5, %v11083_v17  ;;  %7259 = vst [vmem:[%s10988_s19 + $0x68] sm:$0xff] %v11083_v17  ;;  %v8170_v22 = vadd.f32 %v8169_v28, %v8168_v26  ;;  %v8171_v32 = vpop.f32.mrb[62].mxu0 }
 0x2f2   : > { %v8234_v31 = vadd.f32 %v8233_v20, %v8232_v27  ;;  %v8235_v35 = vpop.f32.mrb[62].mxu1  ;;  %v8172_v36 = vpop.f32.mrb[63].mxu0  ;;  %v9161_v13 = vld [vmem:[%s12606_s7 + $0x8] ss:$28 sps:$4 sm:$0xff]   ;;  %v3283_v26 = vld [vmem:[%s11118_s14 + $0x18] sm:$0xff] }
 0x2f3   : > { %v8236_v37 = vpop.f32.mrb[63].mxu1  ;;  %9502 = vpow2.f32 %v3336_v30  ;;  %v3338_v38 = vmul.f32 1.442695, %v3309_v21  ;;  %v3177_v39 = vadd.f32 %v8170_v22, %v10979_v33  ;;  %v8173_v40 = vadd.f32 %v8172_v36, %v8171_v32  ;;  %v9166_v27 = vld [vmem:[%s12606_s7 + $0x3c] ss:$28 sps:$4 sm:$0xff]   ;;  %v3284_v36 = vld [vmem:[%s11118_s14 + $0x20] sm:$0xff] }
 0x2f4   : > { %v8237_v41 = vadd.f32 %v8236_v37, %v8235_v35  ;;  %v9164_v30 = vld [vmem:[%s12606_s7 + $0x38] ss:$28 sps:$4 sm:$0xff]   ;;  %v9167_v21 = vld [vmem:[%s12606_s7 + $0x40] ss:$28 sps:$4 sm:$0xff]  }
 0x2f5   : > { %v9499_v42 = vpop.eup %9498  ;;  %9504 = vpow2.f32 %v3338_v38  ;;  %v11090_v43 = vadd.f32 %v8234_v31, %v3177_v39  ;;  %v3180_v44 = vadd.f32 %v8173_v40, %v10979_v33  ;;  %v9172_v22 = vld [vmem:[%s12606_s7 + $0x74] ss:$28 sps:$4 sm:$0xff]   ;;  %v9175_v31 = vld [vmem:[%s12606_s7 + $0x7c] ss:$28 sps:$4 sm:$0xff]   ;;  %v3285_v38 = vld [vmem:[%s11118_s14 + $0x28] sm:$0xff] }
 0x2f6   : > { %3380 = vrot.lane.b32.xlu0 %v9499_v42, %s9968_s24  ;;  %v9170_v40 = vld [vmem:[%s12606_s7 + $0x70] ss:$28 sps:$4 sm:$0xff]  }
 0x2f7   : > { %v9501_v46 = vpop.eup %9500  ;;  %v3310_v49 = vmul.f32 0.5, %v11090_v43  ;;  %7260 = vst [vmem:[%s10988_s19 + $0x70] sm:$0xff] %v11090_v43  ;;  %v11097_v50 = vadd.f32 %v8237_v41, %v3180_v44  ;;  %v9173_v41 = vld [vmem:[%s12606_s7 + $0x78] ss:$28 sps:$4 sm:$0xff]  }
 0x2f8   : > { %3382 = vrot.lane.b32.xlu1 %v9501_v46, %s9968_s24 }
 0x2f9   : > { %v3340_v51 = vmul.f32 1.442695, %v3310_v49  ;;  %v3311_v53 = vmul.f32 0.5, %v11097_v50  ;;  %7261 = vst [vmem:[%s10988_s19 + $0x78] sm:$0xff] %v11097_v50 }
 0x2fb   : > { %9506 = vpow2.f32 %v3340_v51  ;;  %v3342_v54 = vmul.f32 1.442695, %v3311_v53  ;;  %v9176_v51 = vld [vmem:[%s12606_s7 + $0xa8] ss:$28 sps:$4 sm:$0xff]   ;;  %v9179_v53 = vld [vmem:[%s12606_s7 + $0xb0] ss:$28 sps:$4 sm:$0xff]  }
 0x2fd   : > { %v9503_v33 = vpop.eup %9502  ;;  %9508 = vpow2.f32 %v3342_v54  ;;  %v9184_v54 = vld [vmem:[%s12606_s7 + $0xe4] ss:$28 sps:$4 sm:$0xff]  }
 0x2fe   : > { %3384 = vrot.lane.b32.xlu0 %v9503_v33, %s9968_s24 }
 0x2ff   : > { %v9505_v56 = vpop.eup %9504 }
 0x300   : > { %3386 = vrot.lane.b32.xlu1 %v9505_v56, %s9968_s24  ;;  %v3286_v56 = vld [vmem:[%s11118_s14 + $0x30] sm:$0xff] }
 0x305   : > { %v9507_v60 = vpop.eup %9506 }
 0x306   : > { %3388 = vrot.lane.b32.xlu0 %v9507_v60, %s9968_s24 }
 0x307   : > { %v9509_v61 = vpop.eup %9508 }
 0x308   : > { %3390 = vrot.lane.b32.xlu1 %v9509_v61, %s9968_s24  ;;  %v9182_v61 = vld [vmem:[%s12606_s7 + $0xe0] ss:$28 sps:$4 sm:$0xff]  }
 0x340   : > { %v3361_v63 = vpop.permute.xlu0 %3360 }
 0x341   : > { %v3408_v2 = vmul.f32 %v3361_v63, %v3280_v62  ;;  %v9185_v62 = vld [vmem:[%s12606_s7 + $0xe8] ss:$28 sps:$4 sm:$0xff]  }
 0x343   : > { %v3424_v6 = vadd.f32 %v3408_v2, %v10990_v45  ;;  %v9169_v45 = vld [vmem:[%s12606_s7 + $0x44] ss:$28 sps:$4 sm:$0xff]  }
 0x344   : > { %v3363_v3 = vpop.permute.xlu0 %3362 }
 0x345   : > { %v3409_v4 = vmul.f32 %v3363_v3, %v3281_v0  ;;  %v9193_v0 = vld [vmem:[%s12606_s7 + $0x124] ss:$28 sps:$4 sm:$0xff]  }
 0x347   : > { %v3425_v7 = vadd.f32 %v3409_v4, %v10996_v48 }
 0x348   : > { %v3365_v9 = vpop.permute.xlu1 %3364 }
 0x349   : > { %v3440_v11 = vpack.c.bf16 %v3425_v7, %v3424_v6  ;;  %v3410_v48 = vmul.f32 %v3365_v9, %v3282_v8  ;;  %v9188_v6 = vld [vmem:[%s12606_s7 + $0x118] ss:$28 sps:$4 sm:$0xff]   ;;  %v9191_v7 = vld [vmem:[%s12606_s7 + $0x120] ss:$28 sps:$4 sm:$0xff]  }
 0x34a   : > { %v9196_v8 = vld [vmem:[%s12606_s7 + $0x154] ss:$28 sps:$4 sm:$0xff]  }
 0x34b   : > { %7628 = vmatmul.mubr.msk.bf16.vlgmr.msra.gmra.mrb[64].mxu0 %vm1798_vm0, %v3440_v11  ;;  %7636 = vmatmul.mubr.msk.bf16.vlgmr.msra.gmra.mrb[64].mxu1 %vm1798_vm0, %v3440_v11  ;;  %v3426_v32 = vadd.f32 %v3410_v48, %v11002_v1  ;;  %v9178_v1 = vld [vmem:[%s12606_s7 + $0xac] ss:$28 sps:$4 sm:$0xff]   ;;  %v3288_v11 = vld [vmem:[%s11118_s14 + $0x40] sm:$0xff] }
 0x34c   : > { %v3367_v28 = vpop.permute.xlu1 %3366  ;;  %3560 = vmatprep.mubr.bf16.mxu0 %v9967_v24  ;;  %3673 = vmatprep.mubr.bf16.mxu1 %v9967_v24 }
 0x34d   : > { %v3411_v20 = vmul.f32 %v3367_v28, %v3283_v26  ;;  %5286 = vmatpush1.bf16.msra.mxu0 %v9158_v12  ;;  %5512 = vmatpush1.bf16.msra.mxu1 %v9161_v13  ;;  %v3289_v13 = vld [vmem:[%s11118_s14 + $0x48] sm:$0xff]  ;;  %v9205_v28 = vld [vmem:[%s12606_s7 + $0x194] ss:$28 sps:$4 sm:$0xff]  }
 0x34e   : > { %5287 = vmatprep.subr.bf16.mxu0 %v9166_v27  ;;  %5513 = vmatprep.subr.bf16.mxu1 %v9169_v45  ;;  %v9194_v27 = vld [vmem:[%s12606_s7 + $0x150] ss:$28 sps:$4 sm:$0xff]   ;;  %v9197_v45 = vld [vmem:[%s12606_s7 + $0x158] ss:$28 sps:$4 sm:$0xff]  }
 0x34f   : > { %v3427_v35 = vadd.f32 %v3411_v20, %v11011_v5  ;;  %v9181_v5 = vld [vmem:[%s12606_s7 + $0xb4] ss:$28 sps:$4 sm:$0xff]  }
 0x350   : > { %v3369_v37 = vpop.permute.xlu0 %3368 }
 0x351   : > { %v3441_v39 = vpack.c.bf16 %v3427_v35, %v3426_v32  ;;  %5288 = vmatpush1.bf16.msra.mxu0 %v9164_v30  ;;  %5514 = vmatpush1.bf16.msra.mxu1 %v9167_v21  ;;  %v3412_v44 = vmul.f32 %v3369_v37, %v3284_v36  ;;  %v9208_v32 = vld [vmem:[%s12606_s7 + $0x1c4] ss:$28 sps:$4 sm:$0xff]   ;;  %v3290_v36 = vld [vmem:[%s11118_s14 + $0x50] sm:$0xff] }
 0x352   : > { %v3371_v42 = vpop.permute.xlu1 %3370  ;;  %5289 = vmatprep.subr.bf16.mxu0 %v9172_v22  ;;  %5515 = vmatprep.subr.bf16.mxu1 %v9175_v31  ;;  %v9200_v22 = vld [vmem:[%s12606_s7 + $0x188] ss:$28 sps:$4 sm:$0xff]   ;;  %v9203_v31 = vld [vmem:[%s12606_s7 + $0x190] ss:$28 sps:$4 sm:$0xff]  }
 0x353   : > { %v3413_v46 = vmul.f32 %v3371_v42, %v3285_v38  ;;  %7629 = vmatmul.mubr.msk.bf16.gmra.mrb[68].mxu0 %vm1798_vm0, %v3441_v39  ;;  %7637 = vmatmul.mubr.msk.bf16.gmra.mrb[68].mxu1 %vm1798_vm0, %v3441_v39  ;;  %v3428_v33 = vadd.f32 %v3412_v44, %v11020_v23  ;;  %v9190_v23 = vld [vmem:[%s12606_s7 + $0x11c] ss:$28 sps:$4 sm:$0xff]  }
 0x354   : > { %3570 = vmatprep.mubr.bf16.mxu0 %v9967_v24  ;;  %3683 = vmatprep.mubr.bf16.mxu1 %v9967_v24  ;;  %v3291_v38 = vld [vmem:[%s11118_s14 + $0x58] sm:$0xff] }
 0x355   : > { %v3429_v49 = vadd.f32 %v3413_v46, %v11027_v34  ;;  %5290 = vmatpush1.bf16.msra.mxu0 %v9170_v40  ;;  %5516 = vmatpush1.bf16.msra.mxu1 %v9173_v41  ;;  %v9187_v34 = vld [vmem:[%s12606_s7 + $0xec] ss:$28 sps:$4 sm:$0xff]   ;;  %v9206_v40 = vld [vmem:[%s12606_s7 + $0x1c0] ss:$28 sps:$4 sm:$0xff]  }
 0x356   : > { %5291 = vmatprep.subr.bf16.mxu0 %v9178_v1  ;;  %5517 = vmatprep.subr.bf16.mxu1 %v9181_v5  ;;  %v9209_v41 = vld [vmem:[%s12606_s7 + $0x1c8] ss:$28 sps:$4 sm:$0xff]  }
 0x357   : > { %v3442_v60 = vpack.c.bf16 %v3429_v49, %v3428_v33  ;;  %v9217_v1 = vld [vmem:[%s12606_s7 + $0x204] ss:$28 sps:$4 sm:$0xff]   ;;  %v9212_v49 = vld [vmem:[%s12606_s7 + $0x1f8] ss:$28 sps:$4 sm:$0xff]  }
 0x358   : > { %v3373_v57 = vpop.permute.xlu0 %3372 }
 0x359   : > { %5292 = vmatpush1.bf16.msra.mxu0 %v9176_v51  ;;  %5518 = vmatpush1.bf16.msra.mxu1 %v9179_v53  ;;  %v3414_v2 = vmul.f32 %v3373_v57, %v3286_v56  ;;  %v9215_v51 = vld [vmem:[%s12606_s7 + $0x200] ss:$28 sps:$4 sm:$0xff]   ;;  %v9220_v53 = vld [vmem:[%s12606_s7 + $0x234] ss:$28 sps:$4 sm:$0xff]   ;;  %v3293_v56 = vld [vmem:[%s11118_s14 + $0x68] sm:$0xff] }
 0x35a   : > { %v3375_v63 = vpop.permute.xlu1 %3374  ;;  %5293 = vmatprep.subr.bf16.mxu0 %v9184_v54  ;;  %5519 = vmatprep.subr.bf16.mxu1 %v9187_v34  ;;  %v3292_v34 = vld [vmem:[%s11118_s14 + $0x60] sm:$0xff] }
 0x35b   : > { %v3415_v3 = vmul.f32 %v3375_v63, %v3287_v59  ;;  %7630 = vmatmul.mubr.msk.bf16.gmra.mrb[72].mxu0 %vm1798_vm0, %v3442_v60  ;;  %7638 = vmatmul.mubr.msk.bf16.gmra.mrb[72].mxu1 %vm1798_vm0, %v3442_v60  ;;  %v3430_v9 = vadd.f32 %v3414_v2, %v11034_v55  ;;  %v9202_v55 = vld [vmem:[%s12606_s7 + $0x18c] ss:$28 sps:$4 sm:$0xff]   ;;  %v9221_v60 = vld [vmem:[%s12606_s7 + $0x238] ss:$28 sps:$4 sm:$0xff]  }
 0x35c   : > { %3580 = vmatprep.mubr.bf16.mxu0 %v9967_v24  ;;  %3693 = vmatprep.mubr.bf16.mxu1 %v9967_v24  ;;  %v9218_v59 = vld [vmem:[%s12606_s7 + $0x230] ss:$28 sps:$4 sm:$0xff]   ;;  %v9224_v2 = vld [vmem:[%s12606_s7 + $0x268] ss:$28 sps:$4 sm:$0xff]  }
 0x35d   : > { %v3431_v4 = vadd.f32 %v3415_v3, %v11041_v58  ;;  %5294 = vmatpush1.bf16.msra.mxu0 %v9182_v61  ;;  %5520 = vmatpush1.bf16.msra.mxu1 %v9185_v62  ;;  %v9199_v58 = vld [vmem:[%s12606_s7 + $0x15c] ss:$28 sps:$4 sm:$0xff]   ;;  %v9229_v62 = vld [vmem:[%s12606_s7 + $0x274] ss:$28 sps:$4 sm:$0xff]  }
 0x35e   : > { %5295 = vmatprep.subr.bf16.mxu0 %v9190_v23  ;;  %5521 = vmatprep.subr.bf16.mxu1 %v9193_v0  ;;  %v9227_v3 = vld [vmem:[%s12606_s7 + $0x270] ss:$28 sps:$4 sm:$0xff]  }
 0x35f   : > { %v3443_v26 = vpack.c.bf16 %v3431_v4, %v3430_v9  ;;  %v9232_v4 = vld [vmem:[%s12606_s7 + $0x2a4] ss:$28 sps:$4 sm:$0xff]  }
 0x360   : > { %v3377_v12 = vpop.permute.xlu0 %3376 }
 0x361   : > { %5296 = vmatpush1.bf16.msra.mxu0 %v9188_v6  ;;  %5522 = vmatpush1.bf16.msra.mxu1 %v9191_v7  ;;  %v3416_v20 = vmul.f32 %v3377_v12, %v3288_v11  ;;  %v3294_v7 = vld [vmem:[%s11118_s14 + $0x70] sm:$0xff]  ;;  %v9230_v11 = vld [vmem:[%s12606_s7 + $0x2a0] ss:$28 sps:$4 sm:$0xff]   ;;  %v9233_v12 = vld [vmem:[%s12606_s7 + $0x2a8] ss:$28 sps:$4 sm:$0xff]  }
 0x362   : > { %v3379_v48 = vpop.permute.xlu1 %3378  ;;  %5297 = vmatprep.subr.bf16.mxu0 %v9196_v8  ;;  %5523 = vmatprep.subr.bf16.mxu1 %v9199_v58  ;;  %v3295_v58 = vld [vmem:[%s11118_s14 + $0x78] sm:$0xff] }
 0x363   : > { %v3417_v30 = vmul.f32 %v3379_v48, %v3289_v13  ;;  %7631 = vmatmul.mubr.msk.bf16.gmra.mrb[76].mxu0 %vm1798_vm0, %v3443_v26  ;;  %7639 = vmatmul.mubr.msk.bf16.gmra.mrb[76].mxu1 %vm1798_vm0, %v3443_v26  ;;  %v3432_v35 = vadd.f32 %v3416_v20, %v11048_v25  ;;  %v9214_v25 = vld [vmem:[%s12606_s7 + $0x1fc] ss:$28 sps:$4 sm:$0xff]   ;;  %v9241_v26 = vld [vmem:[%s12606_s7 + $0x2e4] ss:$28 sps:$4 sm:$0xff]  }
 0x364   : > { %3590 = vmatprep.mubr.bf16.mxu0 %v9967_v24  ;;  %3703 = vmatprep.mubr.bf16.mxu1 %v9967_v24 }
 0x365   : > { %v3433_v21 = vadd.f32 %v3417_v30, %v11055_v29  ;;  %5298 = vmatpush1.bf16.msra.mxu0 %v9194_v27  ;;  %5524 = vmatpush1.bf16.msra.mxu1 %v9197_v45  ;;  %v9211_v29 = vld [vmem:[%s12606_s7 + $0x1cc] ss:$28 sps:$4 sm:$0xff]  }
 0x366   : > { %5299 = vmatprep.subr.bf16.mxu0 %v9202_v55  ;;  %5525 = vmatprep.subr.bf16.mxu1 %v9205_v28  ;;  %v9236_v55 = vld [vmem:[%s12606_s7 + $0x2d8] ss:$28 sps:$4 sm:$0xff]   ;;  %v9239_v28 = vld [vmem:[%s12606_s7 + $0x2e0] ss:$28 sps:$4 sm:$0xff]  }
 0x367   : > { %v3444_v39 = vpack.c.bf16 %v3433_v21, %v3432_v35  ;;  %v9242_v21 = vld [vmem:[%s12606_s7 + $0x310] ss:$28 sps:$4 sm:$0xff]   ;;  %v9256_v35 = vld [vmem:[%s12606_s7 + $0x384] ss:$28 sps:$4 sm:$0xff]  }
 0x368   : > { %v3381_v37 = vpop.permute.xlu0 %3380 }
 0x369   : > { %5300 = vmatpush1.bf16.msra.mxu0 %v9200_v22  ;;  %5526 = vmatpush1.bf16.msra.mxu1 %v9203_v31  ;;  %v3418_v5 = vmul.f32 %v3381_v37, %v3290_v36  ;;  %v9250_v22 = vld [vmem:[%s12606_s7 + $0x34c] ss:$28 sps:$4 sm:$0xff]   ;;  %v9253_v31 = vld [vmem:[%s12606_s7 + $0x354] ss:$28 sps:$4 sm:$0xff]   ;;  %v3452_v37 = vld [vmem:[%s12605_s6] sm:$0xf] }
 0x36a   : > { %v3383_v42 = vpop.permute.xlu1 %3382  ;;  %5301 = vmatprep.subr.bf16.mxu0 %v9208_v32  ;;  %5527 = vmatprep.subr.bf16.mxu1 %v9211_v29  ;;  %v9248_v32 = vld [vmem:[%s12606_s7 + $0x348] ss:$28 sps:$4 sm:$0xff]   ;;  %v9251_v29 = vld [vmem:[%s12606_s7 + $0x350] ss:$28 sps:$4 sm:$0xff]  }
 0x36b   : > { %v3419_v44 = vmul.f32 %v3383_v42, %v3291_v38  ;;  %7632 = vmatmul.mubr.msk.bf16.gmra.mrb[80].mxu0 %vm1798_vm0, %v3444_v39  ;;  %7640 = vmatmul.mubr.msk.bf16.gmra.mrb[80].mxu1 %vm1798_vm0, %v3444_v39  ;;  %v3434_v54 = vadd.f32 %v3418_v5, %v11062_v47  ;;  %v9226_v47 = vld [vmem:[%s12606_s7 + $0x26c] ss:$28 sps:$4 sm:$0xff]   ;;  %v11378_v38 = vrot.slane %v3452_v37, %v10878_v15 }
 0x36c   : > { %3600 = vmatprep.mubr.bf16.mxu0 %v9967_v24  ;;  %3713 = vmatprep.mubr.bf16.mxu1 %v9967_v24  ;;  %v9259_v36 = vld [vmem:[%s12606_s7 + $0x38c] ss:$28 sps:$4 sm:$0xff]   ;;  %v11381_v39 = vrot.slane %v3452_v37, %v10881_v16 }
 0x36d   : > { %v3435_v46 = vadd.f32 %v3419_v44, %v11069_v52  ;;  %5302 = vmatpush1.bf16.msra.mxu0 %v9206_v40  ;;  %5528 = vmatpush1.bf16.msra.mxu1 %v9209_v41  ;;  %v9223_v52 = vld [vmem:[%s12606_s7 + $0x23c] ss:$28 sps:$4 sm:$0xff]   ;;  %v11384_v40 = vrot.slane %v3452_v37, %v10887_v18  ;;  %v11387_v41 = vrot.slane %v3452_v37, %v10890_v19 }
 0x36e   : > { %5303 = vmatprep.subr.bf16.mxu0 %v9214_v25  ;;  %5529 = vmatprep.subr.bf16.mxu1 %v9217_v1 }
 0x36f   : > { %v3445_v57 = vpack.c.bf16 %v3435_v46, %v3434_v54 }
 0x370   : > { %v3385_v33 = vpop.permute.xlu0 %3384 }
 0x371   : > { %5304 = vmatpush1.bf16.msra.mxu0 %v9212_v49  ;;  %5530 = vmatpush1.bf16.msra.mxu1 %v9215_v51  ;;  %v3420_v63 = vmul.f32 %v3385_v33, %v3292_v34 }
 0x372   : > { %v3387_v61 = vpop.permute.xlu1 %3386  ;;  %5305 = vmatprep.subr.bf16.mxu0 %v9220_v53  ;;  %5531 = vmatprep.subr.bf16.mxu1 %v9223_v52 }
 0x373   : > { %v3421_v23 = vmul.f32 %v3387_v61, %v3293_v56  ;;  %7633 = vmatmul.mubr.msk.bf16.gmra.mrb[84].mxu0 %vm1798_vm0, %v3445_v57  ;;  %7641 = vmatmul.mubr.msk.bf16.gmra.mrb[84].mxu1 %vm1798_vm0, %v3445_v57  ;;  %v3436_v6 = vadd.f32 %v3420_v63, %v11076_v10  ;;  %v9238_v10 = vld [vmem:[%s12606_s7 + $0x2dc] ss:$28 sps:$4 sm:$0xff]  }
 0x374   : > { %3610 = vmatprep.mubr.bf16.mxu0 %v9967_v24  ;;  %3723 = vmatprep.mubr.bf16.mxu1 %v9967_v24 }
 0x375   : > { %v3437_v0 = vadd.f32 %v3421_v23, %v11083_v17  ;;  %5306 = vmatpush1.bf16.msra.mxu0 %v9218_v59  ;;  %5532 = vmatpush1.bf16.msra.mxu1 %v9221_v60  ;;  %v9235_v17 = vld [vmem:[%s12606_s7 + $0x2ac] ss:$28 sps:$4 sm:$0xff]  }
 0x376   : > { %5307 = vmatprep.subr.bf16.mxu0 %v9226_v47  ;;  %5533 = vmatprep.subr.bf16.mxu1 %v9229_v62 }
 0x377   : > { %v3446_v9 = vpack.c.bf16 %v3437_v0, %v3436_v6 }
 0x378   : > { %v3389_v8 = vpop.permute.xlu0 %3388 }
 0x379   : > { %5308 = vmatpush1.bf16.msra.mxu0 %v9224_v2  ;;  %5534 = vmatpush1.bf16.msra.mxu1 %v9227_v3  ;;  %v3422_v27 = vmul.f32 %v3389_v8, %v3294_v7 }
 0x37a   : > { %v3391_v13 = vpop.permute.xlu1 %3390  ;;  %5309 = vmatprep.subr.bf16.mxu0 %v9232_v4  ;;  %5535 = vmatprep.subr.bf16.mxu1 %v9235_v17 }
 0x37b   : > { %v3423_v45 = vmul.f32 %v3391_v13, %v3295_v58  ;;  %7634 = vmatmul.mubr.msk.bf16.gmra.mrb[88].mxu0 %vm1798_vm0, %v3446_v9  ;;  %7642 = vmatmul.mubr.msk.bf16.gmra.mrb[88].mxu1 %vm1798_vm0, %v3446_v9  ;;  %v3438_v20 = vadd.f32 %v3422_v27, %v11090_v43  ;;  %v9245_v43 = vld [vmem:[%s12606_s7 + $0x318] ss:$28 sps:$4 sm:$0xff]   ;;  %v9254_v58 = vld [vmem:[%s12606_s7 + $0x380] ss:$28 sps:$4 sm:$0xff]   ;;  %v9257_v9 = vld [vmem:[%s12606_s7 + $0x388] ss:$28 sps:$4 sm:$0xff]  }
 0x37c   : > { %3620 = vmatprep.mubr.bf16.mxu0 %v9967_v24  ;;  %3733 = vmatprep.mubr.bf16.mxu1 %v9967_v24  ;;  %v9244_v24 = vld [vmem:[%s12606_s7 + $0x314] ss:$28 sps:$4 sm:$0xff]   ;;  %v9265_v27 = vld [vmem:[%s12606_s7 + $0x3c4] ss:$28 sps:$4 sm:$0xff]  }
 0x37d   : > { %v3439_v48 = vadd.f32 %v3423_v45, %v11097_v50  ;;  %5310 = vmatpush1.bf16.msra.mxu0 %v9230_v11  ;;  %5536 = vmatpush1.bf16.msra.mxu1 %v9233_v12  ;;  %v9247_v50 = vld [vmem:[%s12606_s7 + $0x31c] ss:$28 sps:$4 sm:$0xff]  }
 0x37e   : > { %5311 = vmatprep.subr.bf16.mxu0 %v9238_v10  ;;  %5537 = vmatprep.subr.bf16.mxu1 %v9241_v26  ;;  %v9262_v26 = vld [vmem:[%s12606_s7 + $0x3bc] ss:$28 sps:$4 sm:$0xff]  }
 0x37f   : > { %v3447_v30 = vpack.c.bf16 %v3439_v48, %v3438_v20 }
 0x381   : > { %5312 = vmatpush1.bf16.msra.mxu0 %v9236_v55  ;;  %5538 = vmatpush1.bf16.msra.mxu1 %v9239_v28 }
 0x382   : > { %5313 = vmatprep.subr.bf16.mxu0 %v9244_v24  ;;  %5539 = vmatprep.subr.bf16.mxu1 %v9247_v50 }
 0x383   : > { %7635 = vmatmul.mubr.msk.bf16.gmra.mrb[92].mxu0 %vm1798_vm0, %v3447_v30  ;;  %7643 = vmatmul.mubr.msk.bf16.gmra.mrb[92].mxu1 %vm1798_vm0, %v3447_v30 }
 0x385   : > { %5314 = vmatpush1.bf16.msra.mxu0 %v9242_v21  ;;  %5540 = vmatpush1.bf16.msra.mxu1 %v9245_v43 }
 0x386   : > { %5315 = vmatprep.subr.bf16.mxu0 %v9250_v22  ;;  %5541 = vmatprep.subr.bf16.mxu1 %v9253_v31  ;;  %v9260_v22 = vld [vmem:[%s12606_s7 + $0x3b8] ss:$28 sps:$4 sm:$0xff]   ;;  %v9263_v31 = vld [vmem:[%s12606_s7 + $0x3c0] ss:$28 sps:$4 sm:$0xff]  }
 0x389   : > { %5316 = vmatpush1.bf16.msra.mxu0 %v9248_v32  ;;  %5542 = vmatpush1.bf16.msra.mxu1 %v9251_v29  ;;  %v9268_v32 = vld [vmem:[%s12606_s7 + $0x3f4] ss:$28 sps:$4 sm:$0xff]  }
 0x38a   : > { %5398 = vmatprep.subr.bf16.mxu0 %v9256_v35  ;;  %5624 = vmatprep.subr.bf16.mxu1 %v9259_v36 }
 0x41e   : > { %v3552_v42 = vpop.f32.mrb[64].mxu0  ;;  %v3665_v25 = vpop.f32.mrb[64].mxu1 }
 0x41f   : > { %v3553_v1 = vadd.f32 %v3552_v42, %v11378_v38  ;;  %v3666_v5 = vadd.f32 %v3665_v25, %v11381_v39  ;;  %v3554_v44 = vpop.f32.mrb[65].mxu0  ;;  %v3667_v46 = vpop.f32.mrb[65].mxu1  ;;  %v9271_v42 = vld [vmem:[%s12606_s7 + $0x3fc] ss:$28 sps:$4 sm:$0xff]  }
 0x420   : > { %v3555_v49 = vadd.f32 %v3554_v44, %v11384_v40  ;;  %v3668_v51 = vadd.f32 %v3667_v46, %v11387_v41  ;;  %v3556_v53 = vpop.f32.mrb[66].mxu0  ;;  %v3669_v52 = vpop.f32.mrb[66].mxu1 }
 0x421   : > { %v3557_v54 = vadd.f32 %v3556_v53, %v11378_v38  ;;  %v3670_v34 = vadd.f32 %v3669_v52, %v11381_v39  ;;  %v3558_v33 = vpop.f32.mrb[67].mxu0  ;;  %v3671_v56 = vpop.f32.mrb[67].mxu1  ;;  %v3744_v60 = vmax.f32 %v3553_v1, 0.0  ;;  %v3746_v61 = vmax.f32 %v3666_v5, 0.0 }
 0x422   : > { %v3559_v57 = vadd.f32 %v3558_v33, %v11384_v40  ;;  %v3672_v59 = vadd.f32 %v3671_v56, %v11387_v41  ;;  %v3745_v63 = vmax.f32 %v3555_v49, 0.0  ;;  %v3747_v23 = vmax.f32 %v3668_v51, 0.0  ;;  %v9269_v33 = vld [vmem:[%s12606_s7 + $0x3f8] ss:$28 sps:$4 sm:$0xff]  }
 0x423   : > { %v3748_v47 = vmax.f32 %v3557_v54, 0.0  ;;  %v3750_v62 = vmax.f32 %v3670_v34, 0.0  ;;  %v9266_v34 = vld [vmem:[%s12606_s7 + $0x3f0] ss:$28 sps:$4 sm:$0xff]  }
 0x424   : > { %v3749_v0 = vmax.f32 %v3559_v57, 0.0  ;;  %v3751_v2 = vmax.f32 %v3672_v59, 0.0 }
 0x425   : > { %v11397_v3 = vpack.c.bf16 %v3748_v47, %v3744_v60  ;;  %v11399_v4 = vpack.c.bf16 %v3750_v62, %v3746_v61  ;;  %v9274_v61 = vld [vmem:[%s12606_s7 + $0x42c] ss:$28 sps:$4 sm:$0xff]   ;;  %v9277_v47 = vld [vmem:[%s12606_s7 + $0x434] ss:$28 sps:$4 sm:$0xff]  }
 0x426   : > { %v11401_v17 = vpack.c.bf16 %v3749_v0, %v3745_v63  ;;  %v11403_v6 = vpack.c.bf16 %v3751_v2, %v3747_v23  ;;  %v3562_v7 = vpop.f32.mrb[68].mxu0  ;;  %v3675_v8 = vpop.f32.mrb[68].mxu1 }
 0x427   : > { %v3563_v11 = vadd.f32 %v3562_v7, %v11378_v38  ;;  %v3676_v12 = vadd.f32 %v3675_v8, %v11381_v39  ;;  %v3564_v13 = vpop.f32.mrb[69].mxu0  ;;  %v3677_v10 = vpop.f32.mrb[69].mxu1 }
 0x428   : > { %v3565_v45 = vadd.f32 %v3564_v13, %v11384_v40  ;;  %v3678_v48 = vadd.f32 %v3677_v10, %v11387_v41  ;;  %v3566_v55 = vpop.f32.mrb[70].mxu0  ;;  %v3679_v28 = vpop.f32.mrb[70].mxu1  ;;  %5317 = vmatprep.mubr.bf16.mxu0 %v11401_v17  ;;  %5543 = vmatprep.mubr.bf16.mxu1 %v11401_v17  ;;  %v9275_v13 = vld [vmem:[%s12606_s7 + $0x430] ss:$28 sps:$4 sm:$0xff]   ;;  %v9280_v10 = vld [vmem:[%s12606_s7 + $0x464] ss:$28 sps:$4 sm:$0xff]  }
 0x429   : > { %v3567_v20 = vadd.f32 %v3566_v55, %v11378_v38  ;;  %v3680_v30 = vadd.f32 %v3679_v28, %v11381_v39  ;;  %v3568_v24 = vpop.f32.mrb[71].mxu0  ;;  %v3681_v50 = vpop.f32.mrb[71].mxu1  ;;  %5318 = vmatmul.mubr.bf16.vlgmr.msra.gmra.mrb[96].mxu0 %v11397_v3  ;;  %5544 = vmatmul.mubr.bf16.vlgmr.msra.gmra.mrb[96].mxu1 %v11397_v3  ;;  %v3752_v29 = vmax.f32 %v3563_v11, 0.0  ;;  %v3754_v35 = vmax.f32 %v3676_v12, 0.0  ;;  %v9272_v12 = vld [vmem:[%s12606_s7 + $0x428] ss:$28 sps:$4 sm:$0xff]  }
 0x42a   : > { %v3569_v21 = vadd.f32 %v3568_v24, %v11384_v40  ;;  %v3682_v43 = vadd.f32 %v3681_v50, %v11387_v41  ;;  %5399 = vmatpush1.bf16.msra.mxu0 %v9254_v58  ;;  %5625 = vmatpush1.bf16.msra.mxu1 %v9257_v9  ;;  %v3753_v25 = vmax.f32 %v3565_v45, 0.0  ;;  %v3755_v1 = vmax.f32 %v3678_v48, 0.0  ;;  %v9283_v55 = vld [vmem:[%s12606_s7 + $0x46c] ss:$28 sps:$4 sm:$0xff]  }
 0x42b   : > { %v3756_v36 = vmax.f32 %v3567_v20, 0.0  ;;  %v3758_v37 = vmax.f32 %v3680_v30, 0.0  ;;  %5400 = vmatprep.subr.bf16.mxu0 %v9262_v26  ;;  %5626 = vmatprep.subr.bf16.mxu1 %v9265_v27 }
 0x42c   : > { %v3757_v5 = vmax.f32 %v3569_v21, 0.0  ;;  %v3759_v44 = vmax.f32 %v3682_v43, 0.0 }
 0x42d   : > { %v11441_v46 = vpack.c.bf16 %v3756_v36, %v3752_v29  ;;  %v11443_v49 = vpack.c.bf16 %v3758_v37, %v3754_v35  ;;  %v9278_v29 = vld [vmem:[%s12606_s7 + $0x460] ss:$28 sps:$4 sm:$0xff]   ;;  %v9281_v35 = vld [vmem:[%s12606_s7 + $0x468] ss:$28 sps:$4 sm:$0xff]  }
 0x42e   : > { %v11445_v51 = vpack.c.bf16 %v3757_v5, %v3753_v25  ;;  %v11447_v53 = vpack.c.bf16 %v3759_v44, %v3755_v1  ;;  %v3572_v52 = vpop.f32.mrb[72].mxu0  ;;  %v3685_v54 = vpop.f32.mrb[72].mxu1  ;;  %5401 = vmatpush1.bf16.msra.mxu0 %v9260_v22  ;;  %5627 = vmatpush1.bf16.msra.mxu1 %v9263_v31  ;;  %v9286_v1 = vld [vmem:[%s12606_s7 + $0x49c] ss:$28 sps:$4 sm:$0xff]   ;;  %v9289_v5 = vld [vmem:[%s12606_s7 + $0x4a4] ss:$28 sps:$4 sm:$0xff]  }
 0x42f   : > { %v3573_v56 = vadd.f32 %v3572_v52, %v11378_v38  ;;  %v3686_v57 = vadd.f32 %v3685_v54, %v11381_v39  ;;  %v3574_v59 = vpop.f32.mrb[73].mxu0  ;;  %v3687_v60 = vpop.f32.mrb[73].mxu1  ;;  %5402 = vmatprep.subr.bf16.mxu0 %v9268_v32  ;;  %5628 = vmatprep.subr.bf16.mxu1 %v9271_v42 }
 0x430   : > { %v3575_v62 = vadd.f32 %v3574_v59, %v11384_v40  ;;  %v3688_v63 = vadd.f32 %v3687_v60, %v11387_v41  ;;  %v3576_v23 = vpop.f32.mrb[74].mxu0  ;;  %v3689_v0 = vpop.f32.mrb[74].mxu1  ;;  %5327 = vmatprep.mubr.bf16.mxu0 %v11445_v51  ;;  %5553 = vmatprep.mubr.bf16.mxu1 %v11445_v51 }
 0x431   : > { %v3577_v2 = vadd.f32 %v3576_v23, %v11378_v38  ;;  %v3690_v7 = vadd.f32 %v3689_v0, %v11381_v39  ;;  %v3578_v8 = vpop.f32.mrb[75].mxu0  ;;  %v3691_v58 = vpop.f32.mrb[75].mxu1  ;;  %5328 = vmatmul.mubr.bf16.gmra.mrb[100].mxu0 %v11441_v46  ;;  %5554 = vmatmul.mubr.bf16.gmra.mrb[100].mxu1 %v11441_v46  ;;  %v3760_v26 = vmax.f32 %v3573_v56, 0.0  ;;  %v3762_v27 = vmax.f32 %v3686_v57, 0.0 }
 0x432   : > { %v3579_v9 = vadd.f32 %v3578_v8, %v11384_v40  ;;  %v3692_v11 = vadd.f32 %v3691_v58, %v11387_v41  ;;  %5403 = vmatpush1.bf16.msra.mxu0 %v9266_v34  ;;  %5629 = vmatpush1.bf16.msra.mxu1 %v9269_v33  ;;  %v3761_v28 = vmax.f32 %v3575_v62, 0.0  ;;  %v3763_v20 = vmax.f32 %v3688_v63, 0.0  ;;  %v9287_v62 = vld [vmem:[%s12606_s7 + $0x4a0] ss:$28 sps:$4 sm:$0xff]   ;;  %v9292_v63 = vld [vmem:[%s12606_s7 + $0x4d4] ss:$28 sps:$4 sm:$0xff]  }
 0x433   : > { %v3764_v45 = vmax.f32 %v3577_v2, 0.0  ;;  %v3766_v48 = vmax.f32 %v3690_v7, 0.0  ;;  %5404 = vmatprep.subr.bf16.mxu0 %v9274_v61  ;;  %5630 = vmatprep.subr.bf16.mxu1 %v9277_v47  ;;  %v9284_v47 = vld [vmem:[%s12606_s7 + $0x498] ss:$28 sps:$4 sm:$0xff]  }
 0x434   : > { %v3765_v30 = vmax.f32 %v3579_v9, 0.0  ;;  %v3767_v24 = vmax.f32 %v3692_v11, 0.0  ;;  %v9295_v8 = vld [vmem:[%s12606_s7 + $0x4dc] ss:$28 sps:$4 sm:$0xff]  }
 0x435   : > { %v11485_v50 = vpack.c.bf16 %v3764_v45, %v3760_v26  ;;  %v11487_v21 = vpack.c.bf16 %v3766_v48, %v3762_v27 }
 0x436   : > { %v11489_v43 = vpack.c.bf16 %v3765_v30, %v3761_v28  ;;  %v11491_v22 = vpack.c.bf16 %v3767_v24, %v3763_v20  ;;  %v3582_v31 = vpop.f32.mrb[76].mxu0  ;;  %v3695_v32 = vpop.f32.mrb[76].mxu1  ;;  %5405 = vmatpush1.bf16.msra.mxu0 %v9272_v12  ;;  %5631 = vmatpush1.bf16.msra.mxu1 %v9275_v13  ;;  %v9293_v28 = vld [vmem:[%s12606_s7 + $0x4d8] ss:$28 sps:$4 sm:$0xff]  }
 0x437   : > { %v3583_v36 = vadd.f32 %v3582_v31, %v11378_v38  ;;  %v3696_v37 = vadd.f32 %v3695_v32, %v11381_v39  ;;  %v3584_v42 = vpop.f32.mrb[77].mxu0  ;;  %v3697_v25 = vpop.f32.mrb[77].mxu1  ;;  %5406 = vmatprep.subr.bf16.mxu0 %v9280_v10  ;;  %5632 = vmatprep.subr.bf16.mxu1 %v9283_v55  ;;  %v9290_v55 = vld [vmem:[%s12606_s7 + $0x4d0] ss:$28 sps:$4 sm:$0xff]  }
 0x438   : > { %v3585_v44 = vadd.f32 %v3584_v42, %v11384_v40  ;;  %v3698_v52 = vadd.f32 %v3697_v25, %v11387_v41  ;;  %v3586_v54 = vpop.f32.mrb[78].mxu0  ;;  %v3699_v34 = vpop.f32.mrb[78].mxu1  ;;  %5337 = vmatprep.mubr.bf16.mxu0 %v11489_v43  ;;  %5563 = vmatprep.mubr.bf16.mxu1 %v11489_v43  ;;  %v9298_v32 = vld [vmem:[%s12606_s7 + $0x50c] ss:$28 sps:$4 sm:$0xff]  }
 0x439   : > { %v3587_v33 = vadd.f32 %v3586_v54, %v11378_v38  ;;  %v3700_v56 = vadd.f32 %v3699_v34, %v11381_v39  ;;  %v3588_v57 = vpop.f32.mrb[79].mxu0  ;;  %v3701_v59 = vpop.f32.mrb[79].mxu1  ;;  %5338 = vmatmul.mubr.bf16.gmra.mrb[104].mxu0 %v11485_v50  ;;  %5564 = vmatmul.mubr.bf16.gmra.mrb[104].mxu1 %v11485_v50  ;;  %v3768_v23 = vmax.f32 %v3583_v36, 0.0  ;;  %v3770_v0 = vmax.f32 %v3696_v37, 0.0  ;;  %v9296_v34 = vld [vmem:[%s12606_s7 + $0x508] ss:$28 sps:$4 sm:$0xff]  }
 0x43a   : > { %v3589_v60 = vadd.f32 %v3588_v57, %v11384_v40  ;;  %v3702_v61 = vadd.f32 %v3701_v59, %v11387_v41  ;;  %5407 = vmatpush1.bf16.msra.mxu0 %v9278_v29  ;;  %5633 = vmatpush1.bf16.msra.mxu1 %v9281_v35  ;;  %v3769_v58 = vmax.f32 %v3585_v44, 0.0  ;;  %v3771_v9 = vmax.f32 %v3698_v52, 0.0  ;;  %v9301_v29 = vld [vmem:[%s12606_s7 + $0x514] ss:$28 sps:$4 sm:$0xff]  }
 0x43b   : > { %v3772_v2 = vmax.f32 %v3587_v33, 0.0  ;;  %v3774_v7 = vmax.f32 %v3700_v56, 0.0  ;;  %5408 = vmatprep.subr.bf16.mxu0 %v9286_v1  ;;  %5634 = vmatprep.subr.bf16.mxu1 %v9289_v5  ;;  %v9299_v33 = vld [vmem:[%s12606_s7 + $0x510] ss:$28 sps:$4 sm:$0xff]   ;;  %v9304_v56 = vld [vmem:[%s12606_s7 + $0x544] ss:$28 sps:$4 sm:$0xff]  }
 0x43c   : > { %v3773_v11 = vmax.f32 %v3589_v60, 0.0  ;;  %v3775_v12 = vmax.f32 %v3702_v61, 0.0 }
 0x43d   : > { %v11529_v13 = vpack.c.bf16 %v3772_v2, %v3768_v23  ;;  %v11531_v10 = vpack.c.bf16 %v3774_v7, %v3770_v0 }
 0x43e   : > { %v11533_v26 = vpack.c.bf16 %v3773_v11, %v3769_v58  ;;  %v11535_v27 = vpack.c.bf16 %v3775_v12, %v3771_v9  ;;  %v3592_v45 = vpop.f32.mrb[80].mxu0  ;;  %v3705_v48 = vpop.f32.mrb[80].mxu1  ;;  %5409 = vmatpush1.bf16.msra.mxu0 %v9284_v47  ;;  %5635 = vmatpush1.bf16.msra.mxu1 %v9287_v62  ;;  %v9307_v47 = vld [vmem:[%s12606_s7 + $0x54c] ss:$28 sps:$4 sm:$0xff]   ;;  %v9302_v12 = vld [vmem:[%s12606_s7 + $0x540] ss:$28 sps:$4 sm:$0xff]  }
 0x43f   : > { %v3593_v20 = vadd.f32 %v3592_v45, %v11378_v38  ;;  %v3706_v30 = vadd.f32 %v3705_v48, %v11381_v39  ;;  %v3594_v24 = vpop.f32.mrb[81].mxu0  ;;  %v3707_v31 = vpop.f32.mrb[81].mxu1  ;;  %5410 = vmatprep.subr.bf16.mxu0 %v9292_v63  ;;  %5636 = vmatprep.subr.bf16.mxu1 %v9295_v8  ;;  %v9305_v45 = vld [vmem:[%s12606_s7 + $0x548] ss:$28 sps:$4 sm:$0xff]  }
 0x440   : > { %v3595_v35 = vadd.f32 %v3594_v24, %v11384_v40  ;;  %v3708_v36 = vadd.f32 %v3707_v31, %v11387_v41  ;;  %v3596_v37 = vpop.f32.mrb[82].mxu0  ;;  %v3709_v42 = vpop.f32.mrb[82].mxu1  ;;  %5347 = vmatprep.mubr.bf16.mxu0 %v11533_v26  ;;  %5573 = vmatprep.mubr.bf16.mxu1 %v11533_v26  ;;  %v9313_v24 = vld [vmem:[%s12606_s7 + $0x584] ss:$28 sps:$4 sm:$0xff]  }
 0x441   : > { %v3597_v25 = vadd.f32 %v3596_v37, %v11378_v38  ;;  %v3710_v1 = vadd.f32 %v3709_v42, %v11381_v39  ;;  %v3598_v5 = vpop.f32.mrb[83].mxu0  ;;  %v3711_v44 = vpop.f32.mrb[83].mxu1  ;;  %5348 = vmatmul.mubr.bf16.gmra.mrb[108].mxu0 %v11529_v13  ;;  %5574 = vmatmul.mubr.bf16.gmra.mrb[108].mxu1 %v11529_v13  ;;  %v3776_v57 = vmax.f32 %v3593_v20, 0.0  ;;  %v3778_v59 = vmax.f32 %v3706_v30, 0.0  ;;  %v9310_v30 = vld [vmem:[%s12606_s7 + $0x57c] ss:$28 sps:$4 sm:$0xff]  }
 0x442   : > { %v3599_v52 = vadd.f32 %v3598_v5, %v11384_v40  ;;  %v3712_v54 = vadd.f32 %v3711_v44, %v11387_v41  ;;  %5411 = vmatpush1.bf16.msra.mxu0 %v9290_v55  ;;  %5637 = vmatpush1.bf16.msra.mxu1 %v9293_v28  ;;  %v3777_v62 = vmax.f32 %v3595_v35, 0.0  ;;  %v3779_v63 = vmax.f32 %v3708_v36, 0.0  ;;  %v9308_v44 = vld [vmem:[%s12606_s7 + $0x578] ss:$28 sps:$4 sm:$0xff]  }
 0x443   : > { %v3780_v60 = vmax.f32 %v3597_v25, 0.0  ;;  %v3782_v61 = vmax.f32 %v3710_v1, 0.0  ;;  %5412 = vmatprep.subr.bf16.mxu0 %v9298_v32  ;;  %5638 = vmatprep.subr.bf16.mxu1 %v9301_v29 }
 0x444   : > { %v3781_v23 = vmax.f32 %v3599_v52, 0.0  ;;  %v3783_v0 = vmax.f32 %v3712_v54, 0.0  ;;  %v9311_v52 = vld [vmem:[%s12606_s7 + $0x580] ss:$28 sps:$4 sm:$0xff]   ;;  %v9316_v54 = vld [vmem:[%s12606_s7 + $0x5b4] ss:$28 sps:$4 sm:$0xff]  }
 0x445   : > { %v11573_v2 = vpack.c.bf16 %v3780_v60, %v3776_v57  ;;  %v11575_v7 = vpack.c.bf16 %v3782_v61, %v3778_v59  ;;  %v9319_v59 = vld [vmem:[%s12606_s7 + $0x5bc] ss:$28 sps:$4 sm:$0xff]  }
 0x446   : > { %v11577_v8 = vpack.c.bf16 %v3781_v23, %v3777_v62  ;;  %v11579_v58 = vpack.c.bf16 %v3783_v0, %v3779_v63  ;;  %v3602_v9 = vpop.f32.mrb[84].mxu0  ;;  %v3715_v11 = vpop.f32.mrb[84].mxu1  ;;  %5413 = vmatpush1.bf16.msra.mxu0 %v9296_v34  ;;  %5639 = vmatpush1.bf16.msra.mxu1 %v9299_v33 }
 0x447   : > { %v3603_v48 = vadd.f32 %v3602_v9, %v11378_v38  ;;  %v3716_v55 = vadd.f32 %v3715_v11, %v11381_v39  ;;  %v3604_v28 = vpop.f32.mrb[85].mxu0  ;;  %v3717_v20 = vpop.f32.mrb[85].mxu1  ;;  %5414 = vmatprep.subr.bf16.mxu0 %v9304_v56  ;;  %5640 = vmatprep.subr.bf16.mxu1 %v9307_v47 }
 0x448   : > { %v3605_v31 = vadd.f32 %v3604_v28, %v11384_v40  ;;  %v3718_v32 = vadd.f32 %v3717_v20, %v11387_v41  ;;  %v3606_v29 = vpop.f32.mrb[86].mxu0  ;;  %v3719_v35 = vpop.f32.mrb[86].mxu1  ;;  %5357 = vmatprep.mubr.bf16.mxu0 %v11577_v8  ;;  %5583 = vmatprep.mubr.bf16.mxu1 %v11577_v8 }
 0x449   : > { %v3607_v36 = vadd.f32 %v3606_v29, %v11378_v38  ;;  %v3720_v37 = vadd.f32 %v3719_v35, %v11381_v39  ;;  %v3608_v42 = vpop.f32.mrb[87].mxu0  ;;  %v3721_v25 = vpop.f32.mrb[87].mxu1  ;;  %5358 = vmatmul.mubr.bf16.gmra.mrb[112].mxu0 %v11573_v2  ;;  %5584 = vmatmul.mubr.bf16.gmra.mrb[112].mxu1 %v11573_v2  ;;  %v3784_v34 = vmax.f32 %v3603_v48, 0.0  ;;  %v3786_v33 = vmax.f32 %v3716_v55, 0.0  ;;  %v9317_v48 = vld [vmem:[%s12606_s7 + $0x5b8] ss:$28 sps:$4 sm:$0xff]  }
 0x44a   : > { %v3609_v1 = vadd.f32 %v3608_v42, %v11384_v40  ;;  %v3722_v5 = vadd.f32 %v3721_v25, %v11387_v41  ;;  %5415 = vmatpush1.bf16.msra.mxu0 %v9302_v12  ;;  %5641 = vmatpush1.bf16.msra.mxu1 %v9305_v45  ;;  %v3785_v60 = vmax.f32 %v3605_v31, 0.0  ;;  %v3787_v61 = vmax.f32 %v3718_v32, 0.0  ;;  %v9314_v45 = vld [vmem:[%s12606_s7 + $0x5b0] ss:$28 sps:$4 sm:$0xff]  }
 0x44b   : > { %v3788_v56 = vmax.f32 %v3607_v36, 0.0  ;;  %v3790_v57 = vmax.f32 %v3720_v37, 0.0  ;;  %5416 = vmatprep.subr.bf16.mxu0 %v9310_v30  ;;  %5642 = vmatprep.subr.bf16.mxu1 %v9313_v24  ;;  %v9322_v24 = vld [vmem:[%s12606_s7 + $0x5ec] ss:$28 sps:$4 sm:$0xff]   ;;  %v9325_v31 = vld [vmem:[%s12606_s7 + $0x5f4] ss:$28 sps:$4 sm:$0xff]  }
 0x44c   : > { %v3789_v47 = vmax.f32 %v3609_v1, 0.0  ;;  %v3791_v62 = vmax.f32 %v3722_v5, 0.0 }
 0x44d   : > { %v11617_v63 = vpack.c.bf16 %v3788_v56, %v3784_v34  ;;  %v11619_v23 = vpack.c.bf16 %v3790_v57, %v3786_v33  ;;  %v9328_v34 = vld [vmem:[%s12606_s7 + $0x624] ss:$28 sps:$4 sm:$0xff]  }
 0x44e   : > { %v11621_v0 = vpack.c.bf16 %v3789_v47, %v3785_v60  ;;  %v11623_v9 = vpack.c.bf16 %v3791_v62, %v3787_v61  ;;  %v3612_v11 = vpop.f32.mrb[88].mxu0  ;;  %v3725_v12 = vpop.f32.mrb[88].mxu1  ;;  %5417 = vmatpush1.bf16.msra.mxu0 %v9308_v44  ;;  %5643 = vmatpush1.bf16.msra.mxu1 %v9311_v52  ;;  %v9320_v52 = vld [vmem:[%s12606_s7 + $0x5e8] ss:$28 sps:$4 sm:$0xff]  }
 0x44f   : > { %v3613_v55 = vadd.f32 %v3612_v11, %v11378_v38  ;;  %v3726_v28 = vadd.f32 %v3725_v12, %v11381_v39  ;;  %v3614_v20 = vpop.f32.mrb[89].mxu0  ;;  %v3727_v30 = vpop.f32.mrb[89].mxu1  ;;  %5418 = vmatprep.subr.bf16.mxu0 %v9316_v54  ;;  %5644 = vmatprep.subr.bf16.mxu1 %v9319_v59  ;;  %v9323_v54 = vld [vmem:[%s12606_s7 + $0x5f0] ss:$28 sps:$4 sm:$0xff]  }
 0x450   : > { %v3615_v32 = vadd.f32 %v3614_v20, %v11384_v40  ;;  %v3728_v29 = vadd.f32 %v3727_v30, %v11387_v41  ;;  %v3616_v35 = vpop.f32.mrb[90].mxu0  ;;  %v3729_v36 = vpop.f32.mrb[90].mxu1  ;;  %5367 = vmatprep.mubr.bf16.mxu0 %v11621_v0  ;;  %5593 = vmatprep.mubr.bf16.mxu1 %v11621_v0  ;;  %v9331_v60 = vld [vmem:[%s12606_s7 + $0x62c] ss:$28 sps:$4 sm:$0xff]   ;;  %v9326_v30 = vld [vmem:[%s12606_s7 + $0x620] ss:$28 sps:$4 sm:$0xff]  }
 0x451   : > { %v3617_v37 = vadd.f32 %v3616_v35, %v11378_v38  ;;  %v3730_v42 = vadd.f32 %v3729_v36, %v11381_v39  ;;  %v3618_v25 = vpop.f32.mrb[91].mxu0  ;;  %v3731_v1 = vpop.f32.mrb[91].mxu1  ;;  %5368 = vmatmul.mubr.bf16.gmra.mrb[116].mxu0 %v11617_v63  ;;  %5594 = vmatmul.mubr.bf16.gmra.mrb[116].mxu1 %v11617_v63  ;;  %v3792_v33 = vmax.f32 %v3613_v55, 0.0  ;;  %v3794_v56 = vmax.f32 %v3726_v28, 0.0  ;;  %v9334_v36 = vld [vmem:[%s12606_s7 + $0x65c] ss:$28 sps:$4 sm:$0xff]  }
 0x452   : > { %v3619_v5 = vadd.f32 %v3618_v25, %v11384_v40  ;;  %v3732_v44 = vadd.f32 %v3731_v1, %v11387_v41  ;;  %5419 = vmatpush1.bf16.msra.mxu0 %v9314_v45  ;;  %5645 = vmatpush1.bf16.msra.mxu1 %v9317_v48  ;;  %v3793_v61 = vmax.f32 %v3615_v32, 0.0  ;;  %v3795_v47 = vmax.f32 %v3728_v29, 0.0 }
 0x453   : > { %v3796_v57 = vmax.f32 %v3617_v37, 0.0  ;;  %v3798_v59 = vmax.f32 %v3730_v42, 0.0  ;;  %5420 = vmatprep.subr.bf16.mxu0 %v9322_v24  ;;  %5646 = vmatprep.subr.bf16.mxu1 %v9325_v31  ;;  %v9329_v24 = vld [vmem:[%s12606_s7 + $0x628] ss:$28 sps:$4 sm:$0xff]  }
 0x454   : > { %v3797_v62 = vmax.f32 %v3619_v5, 0.0  ;;  %v3799_v11 = vmax.f32 %v3732_v44, 0.0  ;;  %v9337_v37 = vld [vmem:[%s12606_s7 + $0x664] ss:$28 sps:$4 sm:$0xff]  }
 0x455   : > { %v11661_v12 = vpack.c.bf16 %v3796_v57, %v3792_v33  ;;  %v11663_v45 = vpack.c.bf16 %v3798_v59, %v3794_v56  ;;  %v9332_v57 = vld [vmem:[%s12606_s7 + $0x658] ss:$28 sps:$4 sm:$0xff]  }
 0x456   : > { %v11665_v48 = vpack.c.bf16 %v3797_v62, %v3793_v61  ;;  %v11667_v55 = vpack.c.bf16 %v3799_v11, %v3795_v47  ;;  %v3622_v28 = vpop.f32.mrb[92].mxu0  ;;  %v3735_v20 = vpop.f32.mrb[92].mxu1  ;;  %5421 = vmatpush1.bf16.msra.mxu0 %v9320_v52  ;;  %5647 = vmatpush1.bf16.msra.mxu1 %v9323_v54 }
 0x457   : > { %v3623_v31 = vadd.f32 %v3622_v28, %v11378_v38  ;;  %v3736_v32 = vadd.f32 %v3735_v20, %v11381_v39  ;;  %v3624_v29 = vpop.f32.mrb[93].mxu0  ;;  %v3737_v35 = vpop.f32.mrb[93].mxu1  ;;  %5422 = vmatprep.subr.bf16.mxu0 %v9328_v34  ;;  %5648 = vmatprep.subr.bf16.mxu1 %v9331_v60 }
 0x458   : > { %v3625_v42 = vadd.f32 %v3624_v29, %v11384_v40  ;;  %v3738_v25 = vadd.f32 %v3737_v35, %v11387_v41  ;;  %v3626_v1 = vpop.f32.mrb[94].mxu0  ;;  %v3739_v5 = vpop.f32.mrb[94].mxu1  ;;  %5377 = vmatprep.mubr.bf16.mxu0 %v11665_v48  ;;  %5603 = vmatprep.mubr.bf16.mxu1 %v11665_v48  ;;  %v9341_v29 = vld [vmem:[%s12606_s7 + $0x698] ss:$28 sps:$4 sm:$0xff]   ;;  %v9346_v35 = vld [vmem:[%s12606_s7 + $0x6cc] ss:$28 sps:$4 sm:$0xff]  }
 0x459   : > { %v3627_v44 = vadd.f32 %v3626_v1, %v11378_v38  ;;  %v3740_v52 = vadd.f32 %v3739_v5, %v11381_v39  ;;  %v3628_v54 = vpop.f32.mrb[95].mxu0  ;;  %v3741_v34 = vpop.f32.mrb[95].mxu1  ;;  %5378 = vmatmul.mubr.bf16.gmra.mrb[120].mxu0 %v11661_v12  ;;  %5604 = vmatmul.mubr.bf16.gmra.mrb[120].mxu1 %v11661_v12  ;;  %v9335_v38 = vld [vmem:[%s12606_s7 + $0x660] ss:$28 sps:$4 sm:$0xff]   ;;  %v9340_v39 = vld [vmem:[%s12606_s7 + $0x694] ss:$28 sps:$4 sm:$0xff]  }
 0x45a   : > { %v3629_v33 = vadd.f32 %v3628_v54, %v11384_v40  ;;  %v3742_v56 = vadd.f32 %v3741_v34, %v11387_v41  ;;  %5423 = vmatpush1.bf16.msra.mxu0 %v9326_v30  ;;  %5649 = vmatpush1.bf16.msra.mxu1 %v9329_v24  ;;  %v3800_v59 = vmax.f32 %v3623_v31, 0.0  ;;  %v3802_v60 = vmax.f32 %v3736_v32, 0.0  ;;  %v9343_v41 = vld [vmem:[%s12606_s7 + $0x69c] ss:$28 sps:$4 sm:$0xff]   ;;  %v9338_v32 = vld [vmem:[%s12606_s7 + $0x690] ss:$28 sps:$4 sm:$0xff]  }
 0x45b   : > { %v3804_v61 = vmax.f32 %v3627_v44, 0.0  ;;  %v3806_v40 = vmax.f32 %v3740_v52, 0.0  ;;  %5424 = vmatprep.subr.bf16.mxu0 %v9334_v36  ;;  %5650 = vmatprep.subr.bf16.mxu1 %v9337_v37  ;;  %v3801_v47 = vmax.f32 %v3625_v42, 0.0  ;;  %v3803_v62 = vmax.f32 %v3738_v25, 0.0  ;;  %v9349_v36 = vld [vmem:[%s12606_s7 + $0x6d4] ss:$28 sps:$4 sm:$0xff]  }
 0x45c   : > { %v3805_v11 = vmax.f32 %v3629_v33, 0.0  ;;  %v3807_v28 = vmax.f32 %v3742_v56, 0.0  ;;  %v9344_v37 = vld [vmem:[%s12606_s7 + $0x6c8] ss:$28 sps:$4 sm:$0xff]   ;;  %v9347_v42 = vld [vmem:[%s12606_s7 + $0x6d0] ss:$28 sps:$4 sm:$0xff]  }
 0x45d   : > { %v11705_v20 = vpack.c.bf16 %v3804_v61, %v3800_v59  ;;  %v11707_v30 = vpack.c.bf16 %v3806_v40, %v3802_v60  ;;  %v9352_v25 = vld [vmem:[%s12606_s7 + $0x14] ss:$28 sps:$4 sm:$0xff]   ;;  %v9357_v52 = vld [vmem:[%s12606_s7 + $0x4c] ss:$28 sps:$4 sm:$0xff]   ;;  %v9360_v33 = vld [vmem:[%s12606_s7 + $0x84] ss:$28 sps:$4 sm:$0xff]  }
 0x45e   : > { %v11709_v24 = vpack.c.bf16 %v3805_v11, %v3801_v47  ;;  %v11711_v31 = vpack.c.bf16 %v3807_v28, %v3803_v62  ;;  %5425 = vmatpush1.bf16.msra.mxu0 %v9332_v57  ;;  %5651 = vmatpush1.bf16.msra.mxu1 %v9335_v38  ;;  %v9353_v1 = vld [vmem:[%s12606_s7 + $0x1d8] ss:$28 sps:$4 sm:$0xff]   ;;  %v9350_v5 = vld [vmem:[%s12606_s7 + $0x10] ss:$28 sps:$4 sm:$0xff]   ;;  %v9355_v34 = vld [vmem:[%s12606_s7 + $0x48] ss:$28 sps:$4 sm:$0xff]  }
 0x45f   : > { %5426 = vmatprep.subr.bf16.mxu0 %v9340_v39  ;;  %5652 = vmatprep.subr.bf16.mxu1 %v9343_v41  ;;  %v9354_v44 = vld [vmem:[%s12606_s7 + $0x18] ss:$28 sps:$4 sm:$0xff]   ;;  %v9361_v54 = vld [vmem:[%s12606_s7 + $0x210] ss:$28 sps:$4 sm:$0xff]   ;;  %v9369_v57 = vld [vmem:[%s12606_s7 + $0x248] ss:$28 sps:$4 sm:$0xff]  }
 0x460   : > { %5387 = vmatprep.mubr.bf16.mxu0 %v11709_v24  ;;  %5613 = vmatprep.mubr.bf16.mxu1 %v11709_v24  ;;  %v9362_v56 = vld [vmem:[%s12606_s7 + $0x50] ss:$28 sps:$4 sm:$0xff]   ;;  %v9358_v38 = vld [vmem:[%s12606_s7 + $0x80] ss:$28 sps:$4 sm:$0xff]   ;;  %v9370_v59 = vld [vmem:[%s12606_s7 + $0x88] ss:$28 sps:$4 sm:$0xff]  }
 0x461   : > { %5388 = vmatmul.mubr.bf16.gmra.mrb[124].mxu0 %v11705_v20  ;;  %5614 = vmatmul.mubr.bf16.gmra.mrb[124].mxu1 %v11705_v20  ;;  %v9365_v39 = vld [vmem:[%s12606_s7 + $0xbc] ss:$28 sps:$4 sm:$0xff]   ;;  %v9368_v40 = vld [vmem:[%s12606_s7 + $0xf4] ss:$28 sps:$4 sm:$0xff]   ;;  %v9373_v11 = vld [vmem:[%s12606_s7 + $0x12c] ss:$28 sps:$4 sm:$0xff]  }
 0x462   : > { %5427 = vmatpush1.bf16.msra.mxu0 %v9338_v32  ;;  %5430 = vmatprep.mubr.bf16.mxu0 %v11403_v6  ;;  %v9377_v60 = vld [vmem:[%s12606_s7 + $0x280] ss:$28 sps:$4 sm:$0xff]   ;;  %v9363_v61 = vld [vmem:[%s12606_s7 + $0xb8] ss:$28 sps:$4 sm:$0xff]   ;;  %v9366_v62 = vld [vmem:[%s12606_s7 + $0xf0] ss:$28 sps:$4 sm:$0xff]  }
 0x463   : > { %5653 = vmatpush1.bf16.msra.mxu1 %v9341_v29  ;;  %5656 = vmatprep.mubr.bf16.mxu1 %v11403_v6  ;;  %v9378_v41 = vld [vmem:[%s12606_s7 + $0xc0] ss:$28 sps:$4 sm:$0xff]   ;;  %v9385_v47 = vld [vmem:[%s12606_s7 + $0x2b8] ss:$28 sps:$4 sm:$0xff]   ;;  %v9393_v32 = vld [vmem:[%s12606_s7 + $0x2f0] ss:$28 sps:$4 sm:$0xff]  }
 0x464   : > { %5428 = vmatprep.subr.bf16.mxu0 %v9346_v35  ;;  %5654 = vmatprep.subr.bf16.mxu1 %v9349_v36  ;;  %v9386_v28 = vld [vmem:[%s12606_s7 + $0xf8] ss:$28 sps:$4 sm:$0xff]   ;;  %v9371_v29 = vld [vmem:[%s12606_s7 + $0x128] ss:$28 sps:$4 sm:$0xff]   ;;  %v9394_v36 = vld [vmem:[%s12606_s7 + $0x130] ss:$28 sps:$4 sm:$0xff]  }
 0x465   : > { %v9376_v35 = vld [vmem:[%s12606_s7 + $0x164] ss:$28 sps:$4 sm:$0xff]  }
 0x466   : > { %5429 = vmatpush1.bf16.msra.mxu0 %v9344_v37  ;;  %v9401_v37 = vld [vmem:[%s12606_s7 + $0x328] ss:$28 sps:$4 sm:$0xff]  }
 0x467   : > { %5655 = vmatpush1.bf16.msra.mxu1 %v9347_v42  ;;  %5737 = vmatprep.subr.bf16.mxu0 %v9352_v25  ;;  %v9374_v42 = vld [vmem:[%s12606_s7 + $0x160] ss:$28 sps:$4 sm:$0xff]  }
 0x468   : > { %8238 = vmatprep.subr.bf16.mxu1 %v9353_v1  ;;  %v9381_v25 = vld [vmem:[%s12606_s7 + $0x19c] ss:$28 sps:$4 sm:$0xff]   ;;  %v9402_v1 = vld [vmem:[%s12606_s7 + $0x168] ss:$28 sps:$4 sm:$0xff]  }
 0x469   : > { %5431 = vmatmul.mubr.bf16.vlgmr.msra.gmra.mrb[96].mxu0 %v11399_v4 }
 0x46a   : > { %5657 = vmatmul.mubr.bf16.vlgmr.msra.gmra.mrb[96].mxu1 %v11399_v4  ;;  %5440 = vmatprep.mubr.bf16.mxu0 %v11447_v53 }
 0x46b   : > { %5666 = vmatprep.mubr.bf16.mxu1 %v11447_v53  ;;  %5738 = vmatpush1.bf16.msra.mxu0 %v9350_v5  ;;  %v9409_v5 = vld [vmem:[%s12606_s7 + $0x360] ss:$28 sps:$4 sm:$0xff]  }
 0x46c   : > { %8239 = vmatpush3.bf16.msra.mxu1 %v9354_v44  ;;  %5739 = vmatprep.subr.bf16.mxu0 %v9357_v52  ;;  %v9379_v44 = vld [vmem:[%s12606_s7 + $0x198] ss:$28 sps:$4 sm:$0xff]  }
 0x46d   : > { %8240 = vmatprep.subr.bf16.mxu1 %v9361_v54  ;;  %v9384_v52 = vld [vmem:[%s12606_s7 + $0x1d4] ss:$28 sps:$4 sm:$0xff]   ;;  %v9410_v54 = vld [vmem:[%s12606_s7 + $0x1a0] ss:$28 sps:$4 sm:$0xff]  }
 0x46f   : > { %5740 = vmatpush1.bf16.msra.mxu0 %v9355_v34  ;;  %v9417_v34 = vld [vmem:[%s12606_s7 + $0x558] ss:$28 sps:$4 sm:$0xff]  }
 0x470   : > { %5741 = vmatprep.subr.bf16.mxu0 %v9360_v33  ;;  %8241 = vmatpush3.bf16.msra.mxu1 %v9362_v56  ;;  %v9382_v33 = vld [vmem:[%s12606_s7 + $0x1d0] ss:$28 sps:$4 sm:$0xff]  }
 0x471   : > { %5441 = vmatmul.mubr.bf16.gmra.mrb[100].mxu0 %v11443_v49  ;;  %8242 = vmatprep.subr.bf16.mxu1 %v9369_v57  ;;  %v9389_v56 = vld [vmem:[%s12606_s7 + $0x20c] ss:$28 sps:$4 sm:$0xff]  }
 0x472   : > { %5667 = vmatmul.mubr.bf16.gmra.mrb[100].mxu1 %v11443_v49  ;;  %5450 = vmatprep.mubr.bf16.mxu0 %v11491_v22  ;;  %v9387_v57 = vld [vmem:[%s12606_s7 + $0x208] ss:$28 sps:$4 sm:$0xff]  }
 0x473   : > { %5676 = vmatprep.mubr.bf16.mxu1 %v11491_v22  ;;  %5742 = vmatpush1.bf16.msra.mxu0 %v9358_v38  ;;  %v9392_v38 = vld [vmem:[%s12606_s7 + $0x244] ss:$28 sps:$4 sm:$0xff]  }
 0x474   : > { %5743 = vmatprep.subr.bf16.mxu0 %v9365_v39  ;;  %8243 = vmatpush3.bf16.msra.mxu1 %v9370_v59  ;;  %v9390_v39 = vld [vmem:[%s12606_s7 + $0x240] ss:$28 sps:$4 sm:$0xff]  }
 0x475   : > { %8244 = vmatprep.subr.bf16.mxu1 %v9377_v60  ;;  %v9397_v59 = vld [vmem:[%s12606_s7 + $0x27c] ss:$28 sps:$4 sm:$0xff]  }
 0x476   : > { %v9395_v60 = vld [vmem:[%s12606_s7 + $0x278] ss:$28 sps:$4 sm:$0xff]  }
 0x477   : > { %5744 = vmatpush1.bf16.msra.mxu0 %v9363_v61  ;;  %v9400_v61 = vld [vmem:[%s12606_s7 + $0x2b4] ss:$28 sps:$4 sm:$0xff]  }
 0x478   : > { %5745 = vmatprep.subr.bf16.mxu0 %v9368_v40  ;;  %8245 = vmatpush3.bf16.msra.mxu1 %v9378_v41  ;;  %v9398_v40 = vld [vmem:[%s12606_s7 + $0x2b0] ss:$28 sps:$4 sm:$0xff]  }
 0x479   : > { %5451 = vmatmul.mubr.bf16.gmra.mrb[104].mxu0 %v11487_v21  ;;  %8246 = vmatprep.subr.bf16.mxu1 %v9385_v47  ;;  %v9405_v41 = vld [vmem:[%s12606_s7 + $0x2ec] ss:$28 sps:$4 sm:$0xff]  }
 0x47a   : > { %5677 = vmatmul.mubr.bf16.gmra.mrb[104].mxu1 %v11487_v21  ;;  %5460 = vmatprep.mubr.bf16.mxu0 %v11535_v27  ;;  %v9403_v47 = vld [vmem:[%s12606_s7 + $0x2e8] ss:$28 sps:$4 sm:$0xff]  }
 0x47b   : > { %5686 = vmatprep.mubr.bf16.mxu1 %v11535_v27  ;;  %5746 = vmatpush1.bf16.msra.mxu0 %v9366_v62  ;;  %v9408_v62 = vld [vmem:[%s12606_s7 + $0x324] ss:$28 sps:$4 sm:$0xff]  }
 0x47c   : > { %5747 = vmatprep.subr.bf16.mxu0 %v9373_v11  ;;  %8247 = vmatpush3.bf16.msra.mxu1 %v9386_v28  ;;  %v9406_v11 = vld [vmem:[%s12606_s7 + $0x320] ss:$28 sps:$4 sm:$0xff]  }
 0x47d   : > { %8248 = vmatprep.subr.bf16.mxu1 %v9393_v32  ;;  %v9413_v28 = vld [vmem:[%s12606_s7 + $0x35c] ss:$28 sps:$4 sm:$0xff]  }
 0x47e   : > { %v9411_v32 = vld [vmem:[%s12606_s7 + $0x358] ss:$28 sps:$4 sm:$0xff]  }
 0x47f   : > { %5748 = vmatpush1.bf16.msra.mxu0 %v9371_v29  ;;  %v9416_v29 = vld [vmem:[%s12606_s7 + $0x394] ss:$28 sps:$4 sm:$0xff]  }
 0x480   : > { %5749 = vmatprep.subr.bf16.mxu0 %v9376_v35  ;;  %8249 = vmatpush3.bf16.msra.mxu1 %v9394_v36  ;;  %v9414_v35 = vld [vmem:[%s12606_s7 + $0x390] ss:$28 sps:$4 sm:$0xff]   ;;  %v9418_v36 = vld [vmem:[%s12606_s7 + $0x398] ss:$28 sps:$4 sm:$0xff]  }
 0x481   : > { %5461 = vmatmul.mubr.bf16.gmra.mrb[108].mxu0 %v11531_v10  ;;  %8250 = vmatprep.subr.bf16.mxu1 %v9401_v37  ;;  %v9425_v37 = vld [vmem:[%s12606_s7 + $0x590] ss:$28 sps:$4 sm:$0xff]  }
 0x482   : > { %5687 = vmatmul.mubr.bf16.gmra.mrb[108].mxu1 %v11531_v10  ;;  %5470 = vmatprep.mubr.bf16.mxu0 %v11579_v58 }
 0x483   : > { %5696 = vmatprep.mubr.bf16.mxu1 %v11579_v58  ;;  %5750 = vmatpush1.bf16.msra.mxu0 %v9374_v42  ;;  %v9419_v42 = vld [vmem:[%s12606_s7 + $0x3c8] ss:$28 sps:$4 sm:$0xff]  }
 0x484   : > { %5751 = vmatprep.subr.bf16.mxu0 %v9381_v25  ;;  %8251 = vmatpush3.bf16.msra.mxu1 %v9402_v1  ;;  %v9424_v25 = vld [vmem:[%s12606_s7 + $0x404] ss:$28 sps:$4 sm:$0xff]   ;;  %v9426_v1 = vld [vmem:[%s12606_s7 + $0x3d0] ss:$28 sps:$4 sm:$0xff]  }
 0x485   : > { %8252 = vmatprep.subr.bf16.mxu1 %v9409_v5  ;;  %v9429_v5 = vld [vmem:[%s12606_s7 + $0x43c] ss:$28 sps:$4 sm:$0xff]  }
 0x487   : > { %5752 = vmatpush1.bf16.msra.mxu0 %v9379_v44  ;;  %v9434_v44 = vld [vmem:[%s12606_s7 + $0x408] ss:$28 sps:$4 sm:$0xff]  }
 0x488   : > { %5753 = vmatprep.subr.bf16.mxu0 %v9384_v52  ;;  %8253 = vmatpush3.bf16.msra.mxu1 %v9410_v54  ;;  %v9441_v52 = vld [vmem:[%s12606_s7 + $0x600] ss:$28 sps:$4 sm:$0xff]   ;;  %v9427_v54 = vld [vmem:[%s12606_s7 + $0x438] ss:$28 sps:$4 sm:$0xff]  }
 0x489   : > { %5471 = vmatmul.mubr.bf16.gmra.mrb[112].mxu0 %v11575_v7  ;;  %8302 = vmatprep.subr.bf16.mxu1 %v9417_v34  ;;  %v9432_v34 = vld [vmem:[%s12606_s7 + $0x474] ss:$28 sps:$4 sm:$0xff]  }
 0x48a   : > { %5697 = vmatmul.mubr.bf16.gmra.mrb[112].mxu1 %v11575_v7  ;;  %5480 = vmatprep.mubr.bf16.mxu0 %v11623_v9 }
 0x48b   : > { %5706 = vmatprep.mubr.bf16.mxu1 %v11623_v9  ;;  %5754 = vmatpush1.bf16.msra.mxu0 %v9382_v33  ;;  %v9430_v33 = vld [vmem:[%s12606_s7 + $0x470] ss:$28 sps:$4 sm:$0xff]  }
 0x48c   : > { %5755 = vmatprep.subr.bf16.mxu0 %v9389_v56  ;;  %v9449_v56 = vld [vmem:[%s12606_s7 + $0x638] ss:$28 sps:$4 sm:$0xff]  }
 0x48f   : > { %5756 = vmatpush1.bf16.msra.mxu0 %v9387_v57  ;;  %v9450_v57 = vld [vmem:[%s12606_s7 + $0x478] ss:$28 sps:$4 sm:$0xff]  }
 0x490   : > { %5757 = vmatprep.subr.bf16.mxu0 %v9392_v38  ;;  %v9435_v38 = vld [vmem:[%s12606_s7 + $0x4a8] ss:$28 sps:$4 sm:$0xff]  }
 0x491   : > { %5481 = vmatmul.mubr.bf16.gmra.mrb[116].mxu0 %v11619_v23 }
 0x492   : > { %5707 = vmatmul.mubr.bf16.gmra.mrb[116].mxu1 %v11619_v23  ;;  %5490 = vmatprep.mubr.bf16.mxu0 %v11667_v55 }
 0x493   : > { %5716 = vmatprep.mubr.bf16.mxu1 %v11667_v55  ;;  %5758 = vmatpush1.bf16.msra.mxu0 %v9390_v39  ;;  %v9457_v39 = vld [vmem:[%s12606_s7 + $0x670] ss:$28 sps:$4 sm:$0xff]  }
 0x494   : > { %5759 = vmatprep.subr.bf16.mxu0 %v9397_v59  ;;  %v9438_v59 = vld [vmem:[%s12606_s7 + $0x4e0] ss:$28 sps:$4 sm:$0xff]  }
 0x497   : > { %5760 = vmatpush1.bf16.msra.mxu0 %v9395_v60  ;;  %v9445_v60 = vld [vmem:[%s12606_s7 + $0x51c] ss:$28 sps:$4 sm:$0xff]  }
 0x498   : > { %5761 = vmatprep.subr.bf16.mxu0 %v9400_v61  ;;  %v9465_v61 = vld [vmem:[%s12606_s7 + $0x6a8] ss:$28 sps:$4 sm:$0xff]  }
 0x499   : > { %5491 = vmatmul.mubr.bf16.gmra.mrb[120].mxu0 %v11663_v45 }
 0x49a   : > { %5717 = vmatmul.mubr.bf16.gmra.mrb[120].mxu1 %v11663_v45  ;;  %5500 = vmatprep.mubr.bf16.mxu0 %v11711_v31 }
 0x49b   : > { %5726 = vmatprep.mubr.bf16.mxu1 %v11711_v31  ;;  %5762 = vmatpush1.bf16.msra.mxu0 %v9398_v40  ;;  %v9443_v40 = vld [vmem:[%s12606_s7 + $0x518] ss:$28 sps:$4 sm:$0xff]  }
 0x49c   : > { %5763 = vmatprep.subr.bf16.mxu0 %v9405_v41  ;;  %v9448_v41 = vld [vmem:[%s12606_s7 + $0x554] ss:$28 sps:$4 sm:$0xff]  }
 0x49f   : > { %5764 = vmatpush1.bf16.msra.mxu0 %v9403_v47  ;;  %v9446_v47 = vld [vmem:[%s12606_s7 + $0x550] ss:$28 sps:$4 sm:$0xff]  }
 0x4a0   : > { %5765 = vmatprep.subr.bf16.mxu0 %v9408_v62  ;;  %v9473_v62 = vld [vmem:[%s12606_s7 + $0x6e0] ss:$28 sps:$4 sm:$0xff]  }
 0x4a1   : > { %5501 = vmatmul.mubr.bf16.gmra.mrb[124].mxu0 %v11707_v30 }
 0x4a2   : > { %5727 = vmatmul.mubr.bf16.gmra.mrb[124].mxu1 %v11707_v30  ;;  %5769 = vmatprep.mubr.bf16.mxu0 %v11401_v17 }
 0x4a3   : > { %5766 = vmatpush1.bf16.msra.mxu0 %v9406_v11  ;;  %5995 = vmatprep.mubr.bf16.mxu1 %v11401_v17  ;;  %v9421_v17 = vld [vmem:[%s12606_s7 + $0x3cc] ss:$28 sps:$4 sm:$0xff]   ;;  %v9474_v11 = vld [vmem:[%s12606_s7 + $0x520] ss:$28 sps:$4 sm:$0xff]  }
 0x4a4   : > { %5767 = vmatprep.subr.bf16.mxu0 %v9413_v28  ;;  %v9451_v28 = vld [vmem:[%s12606_s7 + $0x588] ss:$28 sps:$4 sm:$0xff]  }
 0x4a7   : > { %5768 = vmatpush1.bf16.msra.mxu0 %v9411_v32  ;;  %v9456_v32 = vld [vmem:[%s12606_s7 + $0x5c4] ss:$28 sps:$4 sm:$0xff]  }
 0x4a8   : > { %5850 = vmatprep.subr.bf16.mxu0 %v9416_v29  ;;  %v9461_v29 = vld [vmem:[%s12606_s7 + $0x5fc] ss:$28 sps:$4 sm:$0xff]  }
 0x4aa   : > { %5770 = vmatmul.mubr.bf16.vlgmr.msra.gmra.mrb[128].mxu0 %v11397_v3  ;;  %5996 = vmatmul.mubr.bf16.vlgmr.msra.gmra.mrb[128].mxu1 %v11397_v3  ;;  %v9433_v3 = vld [vmem:[%s12606_s7 + $0x5c8] ss:$28 sps:$4 sm:$0xff]  }
 0x4ab   : > { %5779 = vmatprep.mubr.bf16.mxu0 %v11445_v51  ;;  %5851 = vmatpush1.bf16.msra.mxu0 %v9414_v35  ;;  %v9464_v35 = vld [vmem:[%s12606_s7 + $0x634] ss:$28 sps:$4 sm:$0xff]  }
 0x4ac   : > { %6003 = vmatprep.mubr.bf16.mxu1 %v11445_v51  ;;  %8303 = vmatpush3.bf16.msra.mxu1 %v9418_v36  ;;  %v9422_v51 = vld [vmem:[%s12606_s7 + $0x400] ss:$28 sps:$4 sm:$0xff]   ;;  %v9462_v36 = vld [vmem:[%s12606_s7 + $0x630] ss:$28 sps:$4 sm:$0xff]  }
 0x4ad   : > { %5852 = vmatprep.subr.bf16.mxu0 %v9421_v17  ;;  %8304 = vmatprep.subr.bf16.mxu1 %v9425_v37  ;;  %v9472_v17 = vld [vmem:[%s12606_s7 + $0x6a4] ss:$28 sps:$4 sm:$0xff]  }
 0x4ae   : > { %v9470_v37 = vld [vmem:[%s12606_s7 + $0x6a0] ss:$28 sps:$4 sm:$0xff]  }
 0x4af   : > { %5853 = vmatpush1.bf16.msra.mxu0 %v9419_v42 }
 0x4b0   : > { %5854 = vmatprep.subr.bf16.mxu0 %v9424_v25  ;;  %8305 = vmatpush3.bf16.msra.mxu1 %v9426_v1 }
 0x4b1   : > { %8306 = vmatprep.subr.bf16.mxu1 %v9433_v3 }
 0x4b2   : > { %5780 = vmatmul.mubr.bf16.gmra.mrb[132].mxu0 %v11441_v46  ;;  %6004 = vmatmul.mubr.bf16.gmra.mrb[132].mxu1 %v11441_v46  ;;  %v9442_v46 = vld [vmem:[%s12606_s7 + $0x440] ss:$28 sps:$4 sm:$0xff]  }
 0x4b3   : > { %5789 = vmatprep.mubr.bf16.mxu0 %v11489_v43  ;;  %5855 = vmatpush1.bf16.msra.mxu0 %v9422_v51 }
 0x4b4   : > { %6011 = vmatprep.mubr.bf16.mxu1 %v11489_v43  ;;  %5856 = vmatprep.subr.bf16.mxu0 %v9429_v5  ;;  %v9437_v43 = vld [vmem:[%s12606_s7 + $0x4ac] ss:$28 sps:$4 sm:$0xff]  }
 0x4b5   : > { %8307 = vmatpush3.bf16.msra.mxu1 %v9434_v44 }
 0x4b6   : > { %8308 = vmatprep.subr.bf16.mxu1 %v9441_v52 }
 0x4b7   : > { %5857 = vmatpush1.bf16.msra.mxu0 %v9427_v54 }
 0x4b8   : > { %5858 = vmatprep.subr.bf16.mxu0 %v9432_v34 }
 0x4b9   : > { %8309 = vmatpush3.bf16.msra.mxu1 %v9442_v46 }
 0x4ba   : > { %5790 = vmatmul.mubr.bf16.gmra.mrb[136].mxu0 %v11485_v50  ;;  %6012 = vmatmul.mubr.bf16.gmra.mrb[136].mxu1 %v11485_v50  ;;  %v9440_v50 = vld [vmem:[%s12606_s7 + $0x4e4] ss:$28 sps:$4 sm:$0xff]  }
 0x4bb   : > { %5799 = vmatprep.mubr.bf16.mxu0 %v11533_v26  ;;  %5859 = vmatpush1.bf16.msra.mxu0 %v9430_v33 }
 0x4bc   : > { %6019 = vmatprep.mubr.bf16.mxu1 %v11533_v26  ;;  %5860 = vmatprep.subr.bf16.mxu0 %v9437_v43  ;;  %v9458_v26 = vld [vmem:[%s12606_s7 + $0x4b0] ss:$28 sps:$4 sm:$0xff]  }
 0x4bd   : > { %8310 = vmatprep.subr.bf16.mxu1 %v9449_v56 }
 0x4be   : > { %8311 = vmatpush3.bf16.msra.mxu1 %v9450_v57 }
 0x4bf   : > { %5861 = vmatpush1.bf16.msra.mxu0 %v9435_v38  ;;  %8312 = vmatprep.subr.bf16.mxu1 %v9457_v39 }
 0x4c0   : > { %5862 = vmatprep.subr.bf16.mxu0 %v9440_v50 }
 0x4c2   : > { %5800 = vmatmul.mubr.bf16.gmra.mrb[140].mxu0 %v11529_v13  ;;  %6020 = vmatmul.mubr.bf16.gmra.mrb[140].mxu1 %v11529_v13  ;;  %v9466_v13 = vld [vmem:[%s12606_s7 + $0x4e8] ss:$28 sps:$4 sm:$0xff]  }
 0x4c3   : > { %5809 = vmatprep.mubr.bf16.mxu0 %v11577_v8  ;;  %5863 = vmatpush1.bf16.msra.mxu0 %v9438_v59 }
 0x4c4   : > { %6027 = vmatprep.mubr.bf16.mxu1 %v11577_v8  ;;  %5864 = vmatprep.subr.bf16.mxu0 %v9445_v60  ;;  %v9453_v8 = vld [vmem:[%s12606_s7 + $0x58c] ss:$28 sps:$4 sm:$0xff]  }
 0x4c5   : > { %8313 = vmatpush3.bf16.msra.mxu1 %v9458_v26 }
 0x4c6   : > { %8314 = vmatprep.subr.bf16.mxu1 %v9465_v61 }
 0x4c7   : > { %5865 = vmatpush1.bf16.msra.mxu0 %v9443_v40 }
 0x4c8   : > { %5866 = vmatprep.subr.bf16.mxu0 %v9448_v41 }
 0x4c9   : > { %8315 = vmatpush3.bf16.msra.mxu1 %v9466_v13 }
 0x4ca   : > { %5810 = vmatmul.mubr.bf16.gmra.mrb[144].mxu0 %v11573_v2  ;;  %6028 = vmatmul.mubr.bf16.gmra.mrb[144].mxu1 %v11573_v2  ;;  %v9454_v2 = vld [vmem:[%s12606_s7 + $0x5c0] ss:$28 sps:$4 sm:$0xff]  }
 0x4cb   : > { %5819 = vmatprep.mubr.bf16.mxu0 %v11621_v0  ;;  %5867 = vmatpush1.bf16.msra.mxu0 %v9446_v47 }
 0x4cc   : > { %6035 = vmatprep.mubr.bf16.mxu1 %v11621_v0  ;;  %5868 = vmatprep.subr.bf16.mxu0 %v9453_v8  ;;  %v9459_v0 = vld [vmem:[%s12606_s7 + $0x5f8] ss:$28 sps:$4 sm:$0xff]  }
 0x4cd   : > { %8316 = vmatprep.subr.bf16.mxu1 %v9473_v62 }
 0x4ce   : > { %8317 = vmatpush3.bf16.msra.mxu1 %v9474_v11 }
 0x4cf   : > { %5869 = vmatpush1.bf16.msra.mxu0 %v9451_v28 }
 0x4d0   : > { %5870 = vmatprep.subr.bf16.mxu0 %v9456_v32 }
 0x4d2   : > { %5820 = vmatmul.mubr.bf16.gmra.mrb[148].mxu0 %v11617_v63  ;;  %6036 = vmatmul.mubr.bf16.gmra.mrb[148].mxu1 %v11617_v63  ;;  %v9469_v63 = vld [vmem:[%s12606_s7 + $0x66c] ss:$28 sps:$4 sm:$0xff]  }
 0x4d3   : > { %5829 = vmatprep.mubr.bf16.mxu0 %v11665_v48  ;;  %5871 = vmatpush1.bf16.msra.mxu0 %v9454_v2 }
 0x4d4   : > { %6043 = vmatprep.mubr.bf16.mxu1 %v11665_v48  ;;  %5872 = vmatprep.subr.bf16.mxu0 %v9461_v29  ;;  %v9467_v48 = vld [vmem:[%s12606_s7 + $0x668] ss:$28 sps:$4 sm:$0xff]  }
 0x4d7   : > { %5873 = vmatpush1.bf16.msra.mxu0 %v9459_v0 }
 0x4d8   : > { %5874 = vmatprep.subr.bf16.mxu0 %v9464_v35 }
 0x4da   : > { %5830 = vmatmul.mubr.bf16.gmra.mrb[152].mxu0 %v11661_v12  ;;  %6044 = vmatmul.mubr.bf16.gmra.mrb[152].mxu1 %v11661_v12  ;;  %v9477_v12 = vld [vmem:[%s12606_s7 + $0x6dc] ss:$28 sps:$4 sm:$0xff]  }
 0x4db   : > { %5839 = vmatprep.mubr.bf16.mxu0 %v11709_v24  ;;  %5875 = vmatpush1.bf16.msra.mxu0 %v9462_v36 }
 0x4dc   : > { %6051 = vmatprep.mubr.bf16.mxu1 %v11709_v24  ;;  %5876 = vmatprep.subr.bf16.mxu0 %v9469_v63  ;;  %v9475_v24 = vld [vmem:[%s12606_s7 + $0x6d8] ss:$28 sps:$4 sm:$0xff]  }
 0x4df   : > { %5877 = vmatpush1.bf16.msra.mxu0 %v9467_v48 }
 0x4e0   : > { %5878 = vmatprep.subr.bf16.mxu0 %v9472_v17 }
 0x4e2   : > { %5840 = vmatmul.mubr.bf16.gmra.mrb[156].mxu0 %v11705_v20  ;;  %6052 = vmatmul.mubr.bf16.gmra.mrb[156].mxu1 %v11705_v20 }
 0x4e3   : > { %5879 = vmatpush1.bf16.msra.mxu0 %v9470_v37  ;;  %5882 = vmatprep.mubr.bf16.mxu0 %v11403_v6 }
 0x4e4   : > { %6092 = vmatprep.mubr.bf16.mxu1 %v11403_v6  ;;  %5880 = vmatprep.subr.bf16.mxu0 %v9477_v12 }
 0x4e7   : > { %5881 = vmatpush1.bf16.msra.mxu0 %v9475_v24 }
 0x4ea   : > { %5883 = vmatmul.mubr.bf16.vlgmr.msra.gmra.mrb[128].mxu0 %v11399_v4  ;;  %6093 = vmatmul.mubr.bf16.vlgmr.msra.gmra.mrb[160].mxu1 %v11399_v4  ;;  %v4096_v4 = vld [vmem:[%s12607_s8] sm:$0x7f] }
 0x4eb   : > { %5892 = vmatprep.mubr.bf16.mxu0 %v11447_v53  ;;  %6100 = vmatprep.mubr.bf16.mxu1 %v11447_v53  ;;  %v12123_v6 = vrot.slane %v4096_v4, %v10878_v15  ;;  %v12129_v53 = vrot.slane %v4096_v4, %v10887_v18 }
 0x4f2   : > { %5893 = vmatmul.mubr.bf16.gmra.mrb[132].mxu0 %v11443_v49  ;;  %6101 = vmatmul.mubr.bf16.gmra.mrb[164].mxu1 %v11443_v49  ;;  %v12126_v49 = vrot.slane %v4096_v4, %v10881_v16 }
 0x4f3   : > { %5902 = vmatprep.mubr.bf16.mxu0 %v11491_v22  ;;  %6108 = vmatprep.mubr.bf16.mxu1 %v11491_v22 }
 0x4fa   : > { %5903 = vmatmul.mubr.bf16.gmra.mrb[136].mxu0 %v11487_v21  ;;  %6109 = vmatmul.mubr.bf16.gmra.mrb[168].mxu1 %v11487_v21  ;;  %v12132_v21 = vrot.slane %v4096_v4, %v10890_v19 }
 0x4fb   : > { %5912 = vmatprep.mubr.bf16.mxu0 %v11535_v27  ;;  %6116 = vmatprep.mubr.bf16.mxu1 %v11535_v27 }
 0x502   : > { %5913 = vmatmul.mubr.bf16.gmra.mrb[140].mxu0 %v11531_v10  ;;  %6117 = vmatmul.mubr.bf16.gmra.mrb[172].mxu1 %v11531_v10 }
 0x503   : > { %5922 = vmatprep.mubr.bf16.mxu0 %v11579_v58  ;;  %6124 = vmatprep.mubr.bf16.mxu1 %v11579_v58 }
 0x50a   : > { %5923 = vmatmul.mubr.bf16.gmra.mrb[144].mxu0 %v11575_v7  ;;  %6125 = vmatmul.mubr.bf16.gmra.mrb[176].mxu1 %v11575_v7 }
 0x50b   : > { %5932 = vmatprep.mubr.bf16.mxu0 %v11623_v9  ;;  %6132 = vmatprep.mubr.bf16.mxu1 %v11623_v9 }
 0x512   : > { %5933 = vmatmul.mubr.bf16.gmra.mrb[148].mxu0 %v11619_v23  ;;  %6133 = vmatmul.mubr.bf16.gmra.mrb[180].mxu1 %v11619_v23 }
 0x513   : > { %5942 = vmatprep.mubr.bf16.mxu0 %v11667_v55  ;;  %6140 = vmatprep.mubr.bf16.mxu1 %v11667_v55 }
 0x51a   : > { %5943 = vmatmul.mubr.bf16.gmra.mrb[152].mxu0 %v11663_v45  ;;  %6141 = vmatmul.mubr.bf16.gmra.mrb[184].mxu1 %v11663_v45 }
 0x51b   : > { %5952 = vmatprep.mubr.bf16.mxu0 %v11711_v31  ;;  %6148 = vmatprep.mubr.bf16.mxu1 %v11711_v31 }
 0x522   : > { %5953 = vmatmul.mubr.bf16.gmra.mrb[156].mxu0 %v11707_v30  ;;  %6149 = vmatmul.mubr.bf16.gmra.mrb[188].mxu1 %v11707_v30 }
 0x53c   : > { %v5432_v22 = vpop.f32.mrb[96].mxu0 }
 0x53d   : > { %v8430_v10 = vadd.f32 %v5432_v22, %v12123_v6  ;;  %v5658_v27 = vpop.f32.mrb[96].mxu1  ;;  %v5434_v7 = vpop.f32.mrb[97].mxu0 }
 0x53e   : > { %v8462_v58 = vadd.f32 %v5658_v27, %v12126_v49  ;;  %v8431_v23 = vadd.f32 %v5434_v7, %v12129_v53  ;;  %v5660_v15 = vpop.f32.mrb[97].mxu1  ;;  %v5436_v9 = vpop.f32.mrb[98].mxu0 }
 0x53f   : > { %v7868_v45 = vmul.f32 -1.442695, %v8430_v10  ;;  %v8463_v16 = vadd.f32 %v5660_v15, %v12132_v21  ;;  %v8432_v18 = vadd.f32 %v5436_v9, %v12123_v6  ;;  %v5662_v55 = vpop.f32.mrb[98].mxu1  ;;  %v5438_v20 = vpop.f32.mrb[99].mxu0 }
 0x540   : > { %v7870_v19 = vmul.f32 -1.442695, %v8462_v58  ;;  %v7869_v30 = vmul.f32 -1.442695, %v8431_v23  ;;  %v8464_v31 = vadd.f32 %v5662_v55, %v12126_v49  ;;  %v8433_v42 = vadd.f32 %v5438_v20, %v12129_v53  ;;  %v5664_v25 = vpop.f32.mrb[99].mxu1 }
 0x541   : > { %9510 = vpow2.f32 %v7868_v45  ;;  %v7871_v1 = vmul.f32 -1.442695, %v8463_v16  ;;  %v7875_v3 = vmul.f32 -1.442695, %v8432_v18  ;;  %v8465_v51 = vadd.f32 %v5664_v25, %v12132_v21 }
 0x542   : > { %9512 = vpow2.f32 %v7870_v19  ;;  %v7877_v5 = vmul.f32 -1.442695, %v8464_v31  ;;  %v7876_v44 = vmul.f32 -1.442695, %v8433_v42 }
 0x543   : > { %9514 = vpow2.f32 %v7869_v30  ;;  %v7878_v52 = vmul.f32 -1.442695, %v8465_v51 }
 0x544   : > { %9516 = vpow2.f32 %v7871_v1  ;;  %v5442_v54 = vpop.f32.mrb[100].mxu0 }
 0x545   : > { %9518 = vpow2.f32 %v7875_v3  ;;  %v8434_v34 = vadd.f32 %v5442_v54, %v12123_v6  ;;  %v5668_v46 = vpop.f32.mrb[100].mxu1  ;;  %v5444_v33 = vpop.f32.mrb[101].mxu0 }
 0x546   : > { %9520 = vpow2.f32 %v7877_v5  ;;  %v8466_v43 = vadd.f32 %v5668_v46, %v12126_v49  ;;  %v8435_v56 = vadd.f32 %v5444_v33, %v12129_v53  ;;  %v5670_v57 = vpop.f32.mrb[101].mxu1  ;;  %v5446_v38 = vpop.f32.mrb[102].mxu0 }
 0x547   : > { %9522 = vpow2.f32 %v7876_v44  ;;  %v7882_v39 = vmul.f32 -1.442695, %v8434_v34  ;;  %v8467_v50 = vadd.f32 %v5670_v57, %v12132_v21  ;;  %v8436_v59 = vadd.f32 %v5446_v38, %v12123_v6  ;;  %v5672_v60 = vpop.f32.mrb[102].mxu1  ;;  %v5448_v26 = vpop.f32.mrb[103].mxu0 }
 0x548   : > { %9524 = vpow2.f32 %v7878_v52  ;;  %v7884_v61 = vmul.f32 -1.442695, %v8466_v43  ;;  %v7883_v40 = vmul.f32 -1.442695, %v8435_v56  ;;  %v5674_v41 = vpop.f32.mrb[103].mxu1  ;;  %v8468_v45 = vadd.f32 %v5672_v60, %v12126_v49 }
 0x549   : > { %9526 = vpow2.f32 %v7882_v39  ;;  %v7885_v13 = vmul.f32 -1.442695, %v8467_v50  ;;  %v7889_v47 = vmul.f32 -1.442695, %v8436_v59  ;;  %v8437_v55 = vadd.f32 %v5448_v26, %v12129_v53 }
 0x54a   : > { %9528 = vpow2.f32 %v7884_v61  ;;  %v8469_v31 = vadd.f32 %v5674_v41, %v12132_v21  ;;  %v7891_v34 = vmul.f32 -1.442695, %v8468_v45 }
 0x54b   : > { %v9511_v8 = vpop.eup %9510  ;;  %9530 = vpow2.f32 %v7883_v40  ;;  %v7890_v38 = vmul.f32 -1.442695, %v8437_v55 }
 0x54c   : > { %v9513_v62 = vpop.eup %9512  ;;  %v6493_v11 = vadd.f32 1.0, %v9511_v8  ;;  %9532 = vpow2.f32 %v7885_v13  ;;  %v5452_v28 = vpop.f32.mrb[104].mxu0  ;;  %v7892_v60 = vmul.f32 -1.442695, %v8469_v31 }
 0x54d   : > { %v9515_v32 = vpop.eup %9514  ;;  %v6495_v2 = vadd.f32 1.0, %v9513_v62  ;;  %9534 = vpow2.f32 %v7889_v47  ;;  %v5678_v29 = vpop.f32.mrb[104].mxu1  ;;  %v8438_v51 = vadd.f32 %v5452_v28, %v12123_v6 }
 0x54e   : > { %v5454_v0 = vpop.f32.mrb[105].mxu0  ;;  %v9517_v35 = vpop.eup %9516  ;;  %9536 = vrcp.f32 %v6493_v11  ;;  %v6494_v36 = vadd.f32 1.0, %v9515_v32  ;;  %v8470_v46 = vadd.f32 %v5678_v29, %v12126_v49 }
 0x54f   : > { %v5680_v63 = vpop.f32.mrb[105].mxu1  ;;  %v5456_v48 = vpop.f32.mrb[106].mxu0  ;;  %9538 = vrcp.f32 %v6495_v2  ;;  %v6496_v37 = vadd.f32 1.0, %v9517_v35  ;;  %v8439_v39 = vadd.f32 %v5454_v0, %v12129_v53  ;;  %v7896_v40 = vmul.f32 -1.442695, %v8438_v51 }
 0x550   : > { %v9519_v17 = vpop.eup %9518  ;;  %v5682_v12 = vpop.f32.mrb[106].mxu1  ;;  %9540 = vrcp.f32 %v6494_v36  ;;  %v8471_v26 = vadd.f32 %v5680_v63, %v12132_v21  ;;  %v8440_v41 = vadd.f32 %v5456_v48, %v12123_v6  ;;  %v7898_v8 = vmul.f32 -1.442695, %v8470_v46 }
 0x551   : > { %v12147_v24 = vpop.f32.mrb[107].mxu0  ;;  %v9521_v4 = vpop.eup %9520  ;;  %v6500_v22 = vadd.f32 1.0, %v9519_v17  ;;  %9542 = vrcp.f32 %v6496_v37  ;;  %v8472_v62 = vadd.f32 %v5682_v12, %v12126_v49  ;;  %v7897_v32 = vmul.f32 -1.442695, %v8439_v39 }
 0x552   : > { %v12149_v10 = vpop.f32.mrb[107].mxu1  ;;  %v9523_v27 = vpop.eup %9522  ;;  %v6502_v7 = vadd.f32 1.0, %v9521_v4  ;;  %v8441_v2 = vadd.f32 %v12147_v24, %v12129_v53  ;;  %v7899_v35 = vmul.f32 -1.442695, %v8471_v26  ;;  %v7903_v37 = vmul.f32 -1.442695, %v8440_v41 }
 0x553   : > { %v9525_v58 = vpop.eup %9524  ;;  %9544 = vrcp.f32 %v6500_v22  ;;  %v6501_v23 = vadd.f32 1.0, %v9523_v27  ;;  %v8473_v36 = vadd.f32 %v12149_v10, %v12132_v21  ;;  %v7905_v10 = vmul.f32 -1.442695, %v8472_v62 }
 0x554   : > { %v9527_v15 = vpop.eup %9526  ;;  %9546 = vrcp.f32 %v6502_v7  ;;  %v6503_v9 = vadd.f32 1.0, %v9525_v58  ;;  %v5462_v20 = vpop.f32.mrb[108].mxu0  ;;  %v7904_v45 = vmul.f32 -1.442695, %v8441_v2 }
 0x555   : > { %v9529_v16 = vpop.eup %9528  ;;  %9548 = vrcp.f32 %v6501_v23  ;;  %v6507_v18 = vadd.f32 1.0, %v9527_v15  ;;  %v5688_v42 = vpop.f32.mrb[108].mxu1  ;;  %v8442_v12 = vadd.f32 %v5462_v20, %v12123_v6  ;;  %v7906_v55 = vmul.f32 -1.442695, %v8473_v36 }
 0x556   : > { %v9531_v19 = vpop.eup %9530  ;;  %9550 = vrcp.f32 %v6503_v9  ;;  %v6509_v30 = vadd.f32 1.0, %v9529_v16  ;;  %v12154_v25 = vpop.f32.mrb[109].mxu0  ;;  %v8474_v7 = vadd.f32 %v5688_v42, %v12126_v49 }
 0x557   : > { %v9533_v1 = vpop.eup %9532  ;;  %9552 = vrcp.f32 %v6507_v18  ;;  %v6508_v3 = vadd.f32 1.0, %v9531_v19  ;;  %v12158_v5 = vpop.f32.mrb[109].mxu1  ;;  %v8443_v46 = vadd.f32 %v12154_v25, %v12129_v53 }
 0x558   : > { %v12160_v44 = vpop.f32.mrb[110].mxu0  ;;  %v9535_v52 = vpop.eup %9534  ;;  %9554 = vrcp.f32 %v6509_v30  ;;  %v6510_v54 = vadd.f32 1.0, %v9533_v1  ;;  %v7910_v30 = vmul.f32 -1.442695, %v8442_v12  ;;  %v8475_v25 = vadd.f32 %v12158_v5, %v12132_v21 }
 0x559   : > { %v12163_v33 = vpop.f32.mrb[110].mxu1  ;;  %v12165_v43 = vpop.f32.mrb[111].mxu0  ;;  %9556 = vrcp.f32 %v6508_v3  ;;  %v6514_v57 = vadd.f32 1.0, %v9535_v52  ;;  %v7912_v3 = vmul.f32 -1.442695, %v8474_v7 }
 0x55a   : > { %v9537_v56 = vpop.eup %9536  ;;  %v12168_v50 = vpop.f32.mrb[111].mxu1  ;;  %9558 = vrcp.f32 %v6510_v54 }
 0x55b   : > { %v9539_v59 = vpop.eup %9538  ;;  %9560 = vrcp.f32 %v6514_v57 }
 0x55c   : > { %v9541_v61 = vpop.eup %9540  ;;  %9562 = vpow2.f32 %v7891_v34  ;;  %v12180_v29 = vpop.f32.mrb[112].mxu0 }
 0x55d   : > { %v9543_v13 = vpop.eup %9542  ;;  %v8046_v47 = vpack.c.bf16 %v9541_v61, %v9537_v56  ;;  %9564 = vpow2.f32 %v7890_v38  ;;  %v12185_v63 = vpop.f32.mrb[112].mxu1 }
 0x55e   : > { %v9545_v11 = vpop.eup %9544  ;;  %v8047_v28 = vpack.c.bf16 %v9543_v13, %v9539_v59  ;;  %9566 = vpow2.f32 %v7892_v60  ;;  %v12187_v48 = vpop.f32.mrb[113].mxu0 }
 0x55f   : > { %v9547_v0 = vpop.eup %9546  ;;  %7181 = vst [vmem:[%s12174_s29] sm:$0xff] %v8046_v47  ;;  %9568 = vpow2.f32 %v7896_v40  ;;  %v12191_v24 = vpop.f32.mrb[113].mxu1 }
 0x560   : > { %v9549_v17 = vpop.eup %9548  ;;  %7182 = vst [vmem:[%s12174_s29 + $0x8] sm:$0xff] %v8047_v28  ;;  %v12193_v4 = vpop.f32.mrb[114].mxu0  ;;  %9570 = vpow2.f32 %v7898_v8 }
 0x561   : > { %v9551_v22 = vpop.eup %9550  ;;  %v8050_v27 = vpack.c.bf16 %v9549_v17, %v9545_v11  ;;  %v5702_v58 = vpop.f32.mrb[114].mxu1  ;;  %9572 = vpow2.f32 %v7897_v32 }
 0x562   : > { %v12196_v23 = vpop.f32.mrb[115].mxu0  ;;  %v9553_v15 = vpop.eup %9552  ;;  %v8051_v9 = vpack.c.bf16 %v9551_v22, %v9547_v0  ;;  %9574 = vpow2.f32 %v7899_v35  ;;  %v12200_v20 = vadd.f32 %v5702_v58, %v12126_v49  ;;  %v12226_v35 = vmul.f32 -1.442695, %v8443_v46 }
 0x563   : > { %v5704_v16 = vpop.f32.mrb[115].mxu1  ;;  %v9555_v18 = vpop.eup %9554  ;;  %7186 = vst [vmem:[%s12174_s29 + $0x1c] sm:$0xff] %v8050_v27  ;;  %9576 = vpow2.f32 %v7903_v37 }
 0x564   : > { %v9557_v19 = vpop.eup %9556  ;;  %7187 = vst [vmem:[%s12174_s29 + $0x24] sm:$0xff] %v8051_v9  ;;  %v12204_v31 = vadd.f32 %v5704_v16, %v12132_v21  ;;  %9578 = vpow2.f32 %v7905_v10  ;;  %v5482_v54 = vpop.f32.mrb[116].mxu0  ;;  %v12237_v10 = vmul.f32 -1.442695, %v8475_v25  ;;  %v8444_v9 = vadd.f32 %v12160_v44, %v12123_v6 }
 0x565   : > { %v9559_v42 = vpop.eup %9558  ;;  %v8054_v1 = vpack.c.bf16 %v9557_v19, %v9553_v15  ;;  %9580 = vpow2.f32 %v7904_v45  ;;  %v12212_v56 = vadd.f32 %v5482_v54, %v12123_v6  ;;  %v5708_v57 = vpop.f32.mrb[116].mxu1  ;;  %v8476_v45 = vadd.f32 %v12163_v33, %v12126_v49 }
 0x566   : > { %v12206_v51 = vpop.eup %9560  ;;  %v8055_v52 = vpack.c.bf16 %v9559_v42, %v9555_v18  ;;  %9582 = vpow2.f32 %v7906_v55  ;;  %v5484_v38 = vpop.f32.mrb[117].mxu0  ;;  %v12216_v60 = vadd.f32 %v5708_v57, %v12126_v49  ;;  %v8445_v19 = vadd.f32 %v12165_v43, %v12129_v53 }
 0x567   : > { %v9563_v34 = vpop.eup %9562  ;;  %7190 = vst [vmem:[%s12174_s29 + $0x38] sm:$0xff] %v8054_v1  ;;  %9584 = vpow2.f32 %v7910_v30  ;;  %v12219_v26 = vadd.f32 %v5484_v38, %v12129_v53  ;;  %v5710_v61 = vpop.f32.mrb[117].mxu1  ;;  %v8477_v43 = vadd.f32 %v12168_v50, %v12132_v21 }
 0x568   : > { %v9565_v39 = vpop.eup %9564  ;;  %7191 = vst [vmem:[%s12174_s29 + $0x40] sm:$0xff] %v8055_v52  ;;  %v6516_v59 = vadd.f32 1.0, %v9563_v34  ;;  %v5486_v40 = vpop.f32.mrb[118].mxu0  ;;  %9586 = vpow2.f32 %v7912_v3  ;;  %v12224_v47 = vadd.f32 %v5710_v61, %v12132_v21 }
 0x569   : > { %v9567_v41 = vpop.eup %9566  ;;  %v6515_v13 = vadd.f32 1.0, %v9565_v39  ;;  %v5712_v8 = vpop.f32.mrb[118].mxu1  ;;  %v12229_v36 = vadd.f32 %v5486_v40, %v12123_v6 }
 0x56a   : > { %v5488_v62 = vpop.f32.mrb[119].mxu0  ;;  %v9569_v11 = vpop.eup %9568  ;;  %9588 = vrcp.f32 %v6516_v59  ;;  %v6517_v28 = vadd.f32 1.0, %v9567_v41  ;;  %v12232_v37 = vadd.f32 %v5712_v8, %v12126_v49  ;;  %v7917_v41 = vmul.f32 -1.442695, %v8444_v9 }
 0x56b   : > { %v5714_v32 = vpop.f32.mrb[119].mxu1  ;;  %v9571_v2 = vpop.eup %9570  ;;  %9590 = vrcp.f32 %v6515_v13  ;;  %v6521_v0 = vadd.f32 1.0, %v9569_v11  ;;  %v12235_v12 = vadd.f32 %v5488_v62, %v12129_v53  ;;  %v7919_v13 = vmul.f32 -1.442695, %v8476_v45 }
 0x56c   : > { %v9573_v17 = vpop.eup %9572  ;;  %9592 = vrcp.f32 %v6517_v28  ;;  %v6523_v5 = vadd.f32 1.0, %v9571_v2  ;;  %v12240_v7 = vadd.f32 %v5714_v32, %v12132_v21  ;;  %v5492_v16 = vpop.f32.mrb[120].mxu0  ;;  %v8446_v11 = vadd.f32 %v12180_v29, %v12123_v6 }
 0x56d   : > { %v9575_v22 = vpop.eup %9574  ;;  %9594 = vrcp.f32 %v6521_v0  ;;  %v6522_v27 = vadd.f32 1.0, %v9573_v17  ;;  %v12249_v30 = vadd.f32 %v5492_v16, %v12123_v6  ;;  %v5718_v42 = vpop.f32.mrb[120].mxu1  ;;  %v8447_v9 = vadd.f32 %v12187_v48, %v12129_v53 }
 0x56e   : > { %v9577_v58 = vpop.eup %9576  ;;  %9596 = vrcp.f32 %v6523_v5  ;;  %v6524_v15 = vadd.f32 1.0, %v9575_v22  ;;  %v5494_v1 = vpop.f32.mrb[121].mxu0  ;;  %v12252_v44 = vadd.f32 %v5718_v42, %v12126_v49  ;;  %v7918_v5 = vmul.f32 -1.442695, %v8445_v19 }
 0x56f   : > { %v9579_v18 = vpop.eup %9578  ;;  %9598 = vrcp.f32 %v6522_v27  ;;  %v6528_v55 = vadd.f32 1.0, %v9577_v58  ;;  %v12255_v33 = vadd.f32 %v5494_v1, %v12129_v53  ;;  %v5720_v54 = vpop.f32.mrb[121].mxu1  ;;  %v7920_v22 = vmul.f32 -1.442695, %v8477_v43 }
 0x570   : > { %v9581_v3 = vpop.eup %9580  ;;  %9600 = vrcp.f32 %v6524_v15  ;;  %v6530_v52 = vadd.f32 1.0, %v9579_v18  ;;  %v5496_v34 = vpop.f32.mrb[122].mxu0  ;;  %v12260_v38 = vadd.f32 %v5720_v54, %v12132_v21  ;;  %v8478_v15 = vadd.f32 %v12185_v63, %v12126_v49 }
 0x571   : > { %v9583_v46 = vpop.eup %9582  ;;  %9602 = vrcp.f32 %v6528_v55  ;;  %v6529_v57 = vadd.f32 1.0, %v9581_v3  ;;  %v5722_v39 = vpop.f32.mrb[122].mxu1  ;;  %v12265_v28 = vadd.f32 %v5496_v34, %v12123_v6  ;;  %v8479_v55 = vadd.f32 %v12191_v24, %v12132_v21 }
 0x572   : > { %v5498_v59 = vpop.f32.mrb[123].mxu0  ;;  %v9585_v61 = vpop.eup %9584  ;;  %9604 = vrcp.f32 %v6530_v52  ;;  %v6531_v40 = vadd.f32 1.0, %v9583_v46  ;;  %v12268_v2 = vadd.f32 %v5722_v39, %v12126_v49  ;;  %v7924_v63 = vmul.f32 -1.442695, %v8446_v11 }
 0x573   : > { %v5724_v25 = vpop.f32.mrb[123].mxu1  ;;  %v9587_v8 = vpop.eup %9586  ;;  %9606 = vrcp.f32 %v6529_v57  ;;  %v6535_v62 = vadd.f32 1.0, %v9585_v61  ;;  %v12271_v0 = vadd.f32 %v5498_v59, %v12129_v53  ;;  %v8448_v24 = vadd.f32 %v12193_v4, %v12123_v6 }
 0x574   : > { %v9589_v50 = vpop.eup %9588  ;;  %9608 = vrcp.f32 %v6531_v40  ;;  %v6537_v32 = vadd.f32 1.0, %v9587_v8  ;;  %v12274_v27 = vadd.f32 %v5724_v25, %v12132_v21  ;;  %v5502_v45 = vpop.f32.mrb[124].mxu0  ;;  %v7926_v59 = vmul.f32 -1.442695, %v8478_v15 }
 0x575   : > { %v9591_v17 = vpop.eup %9590  ;;  %9610 = vrcp.f32 %v6535_v62  ;;  %v12285_v19 = vadd.f32 %v5502_v45, %v12123_v6  ;;  %v5504_v42 = vpop.f32.mrb[125].mxu0  ;;  %v7925_v61 = vmul.f32 -1.442695, %v8447_v9  ;;  %v7927_v4 = vmul.f32 -1.442695, %v8479_v55 }
 0x576   : > { %v9593_v29 = vpop.eup %9592  ;;  %v8058_v58 = vpack.c.bf16 %v9591_v17, %v12206_v51  ;;  %9612 = vrcp.f32 %v6537_v32  ;;  %v5728_v51 = vpop.f32.mrb[124].mxu1  ;;  %v12293_v3 = vadd.f32 %v5504_v42, %v12129_v53  ;;  %v8449_v8 = vadd.f32 %v12196_v23, %v12129_v53 }
 0x577   : > { %v9595_v16 = vpop.eup %9594  ;;  %v8059_v18 = vpack.c.bf16 %v9593_v29, %v9589_v50  ;;  %9614 = vpow2.f32 %v12226_v35  ;;  %v12290_v48 = vadd.f32 %v5728_v51, %v12126_v49  ;;  %v5730_v35 = vpop.f32.mrb[125].mxu1  ;;  %v7931_v32 = vmul.f32 -1.442695, %v8448_v24 }
 0x578   : > { %v9597_v1 = vpop.eup %9596  ;;  %7194 = vst [vmem:[%s12174_s29 + $0x54] sm:$0xff] %v8058_v58  ;;  %9616 = vpow2.f32 %v12237_v10  ;;  %v5506_v52 = vpop.f32.mrb[126].mxu0  ;;  %v12299_v34 = vadd.f32 %v5730_v35, %v12132_v21 }
 0x579   : > { %v9599_v54 = vpop.eup %9598  ;;  %7195 = vst [vmem:[%s12174_s29 + $0x5c] sm:$0xff] %v8059_v18  ;;  %9618 = vpow2.f32 %v7917_v41  ;;  %v12302_v10 = vadd.f32 %v5506_v52, %v12123_v6  ;;  %v5732_v46 = vpop.f32.mrb[126].mxu1 }
 0x57a   : > { %v5508_v57 = vpop.f32.mrb[127].mxu0  ;;  %v9601_v43 = vpop.eup %9600  ;;  %v8062_v39 = vpack.c.bf16 %v9599_v54, %v9595_v16  ;;  %9620 = vpow2.f32 %v7919_v13  ;;  %v12308_v6 = vadd.f32 %v5732_v46, %v12126_v49 }
 0x57b   : > { %v5734_v40 = vpop.f32.mrb[127].mxu1  ;;  %v9603_v41 = vpop.eup %9602  ;;  %v8063_v25 = vpack.c.bf16 %v9601_v43, %v9597_v1  ;;  %9622 = vpow2.f32 %v7918_v5  ;;  %v12311_v11 = vadd.f32 %v5508_v57, %v12129_v53  ;;  %v7933_v5 = vmul.f32 -1.442695, %v12200_v20 }
 0x57c   : > { %v9605_v62 = vpop.eup %9604  ;;  %7198 = vst [vmem:[%s12174_s29 + $0x70] sm:$0xff] %v8062_v39  ;;  %9624 = vpow2.f32 %v7920_v22  ;;  %v12314_v13 = vadd.f32 %v5734_v40, %v12132_v21  ;;  %v7932_v53 = vmul.f32 -1.442695, %v8449_v8 }
 0x57d   : > { %v9607_v50 = vpop.eup %9606  ;;  %7199 = vst [vmem:[%s12174_s29 + $0x78] sm:$0xff] %v8063_v25  ;;  %9626 = vpow2.f32 %v7924_v63  ;;  %v8254_v29 = vpop.f32.mrb[128].mxu1 }
 0x57e   : > { %v9609_v17 = vpop.eup %9608  ;;  %v8066_v23 = vpack.c.bf16 %v9607_v50, %v9603_v41  ;;  %9628 = vpow2.f32 %v7926_v59  ;;  %v8255_v21 = vpop.f32.mrb[129].mxu1 }
 0x57f   : > { %v12318_v22 = vpop.eup %9610  ;;  %v8067_v49 = vpack.c.bf16 %v9609_v17, %v9605_v62  ;;  %9630 = vpow2.f32 %v7925_v61  ;;  %v12324_v9 = vadd.f32 %v8255_v21, %v8254_v29  ;;  %v8257_v45 = vpop.f32.mrb[130].mxu1  ;;  %v7934_v21 = vmul.f32 -1.442695, %v12204_v31 }
 0x580   : > { %v12320_v58 = vpop.eup %9612  ;;  %7202 = vst [vmem:[%s12174_s29 + $0x8c] sm:$0xff] %v8066_v23  ;;  %9632 = vpow2.f32 %v7927_v4  ;;  %v8258_v20 = vpop.f32.mrb[131].mxu1  ;;  %v7939_v31 = vmul.f32 -1.442695, %v12219_v26  ;;  %v7947_v26 = vmul.f32 -1.442695, %v12232_v37 }
 0x581   : > { %v9615_v15 = vpop.eup %9614  ;;  %7203 = vst [vmem:[%s12174_s29 + $0x94] sm:$0xff] %v8067_v49  ;;  %9634 = vpow2.f32 %v7931_v32  ;;  %v12326_v42 = vadd.f32 %v8258_v20, %v8257_v45 }
 0x582   : > { %v9617_v16 = vpop.eup %9616  ;;  %v6536_v18 = vadd.f32 1.0, %v9615_v15  ;;  %9636 = vpow2.f32 %v7933_v5 }
 0x583   : > { %v9619_v55 = vpop.eup %9618  ;;  %v6538_v51 = vadd.f32 1.0, %v9617_v16  ;;  %9638 = vpow2.f32 %v7932_v53  ;;  %v7938_v16 = vmul.f32 -1.442695, %v12212_v56  ;;  %v7941_v56 = vmul.f32 -1.442695, %v12224_v47 }
 0x584   : > { %v9621_v1 = vpop.eup %9620  ;;  %9640 = vrcp.f32 %v6536_v18  ;;  %v6542_v63 = vadd.f32 1.0, %v9619_v55  ;;  %v7940_v55 = vmul.f32 -1.442695, %v12216_v60  ;;  %v7945_v60 = vmul.f32 -1.442695, %v12229_v36 }
 0x585   : > { %v9623_v35 = vpop.eup %9622  ;;  %9642 = vrcp.f32 %v6538_v51  ;;  %v6544_v52 = vadd.f32 1.0, %v9621_v1  ;;  %v8260_v43 = vpop.f32.mrb[132].mxu1 }
 0x586   : > { %v9625_v54 = vpop.eup %9624  ;;  %9644 = vrcp.f32 %v6542_v63  ;;  %v6543_v24 = vadd.f32 1.0, %v9623_v35  ;;  %v8261_v61 = vpop.f32.mrb[133].mxu1 }
 0x587   : > { %v9627_v46 = vpop.eup %9626  ;;  %9646 = vrcp.f32 %v6544_v52  ;;  %v6545_v57 = vadd.f32 1.0, %v9625_v54  ;;  %v12328_v25 = vadd.f32 %v8261_v61, %v8260_v43  ;;  %v8263_v4 = vpop.f32.mrb[134].mxu1 }
 0x588   : > { %v9629_v39 = vpop.eup %9628  ;;  %9648 = vrcp.f32 %v6543_v24  ;;  %v6549_v59 = vadd.f32 1.0, %v9627_v46  ;;  %v8264_v50 = vpop.f32.mrb[135].mxu1 }
 0x589   : > { %v9631_v40 = vpop.eup %9630  ;;  %9650 = vrcp.f32 %v6545_v57  ;;  %v6551_v41 = vadd.f32 1.0, %v9629_v39  ;;  %v12330_v23 = vadd.f32 %v8264_v50, %v8263_v4 }
 0x58a   : > { %v9633_v8 = vpop.eup %9632  ;;  %9652 = vrcp.f32 %v6549_v59  ;;  %v6550_v62 = vadd.f32 1.0, %v9631_v40  ;;  %v7946_v59 = vmul.f32 -1.442695, %v12235_v12  ;;  %v7948_v40 = vmul.f32 -1.442695, %v12240_v7 }
 0x58b   : > { %v9635_v32 = vpop.eup %9634  ;;  %9654 = vrcp.f32 %v6551_v41  ;;  %v6552_v17 = vadd.f32 1.0, %v9633_v8  ;;  %v7952_v41 = vmul.f32 -1.442695, %v12249_v30  ;;  %v7954_v8 = vmul.f32 -1.442695, %v12252_v44 }
 0x58c   : > { %v9637_v5 = vpop.eup %9636  ;;  %9656 = vrcp.f32 %v6550_v62  ;;  %v6556_v49 = vadd.f32 1.0, %v9635_v32  ;;  %v7953_v32 = vmul.f32 -1.442695, %v12255_v33  ;;  %v7955_v30 = vmul.f32 -1.442695, %v12260_v38 }
 0x58d   : > { %v9639_v53 = vpop.eup %9638  ;;  %9658 = vrcp.f32 %v6552_v17  ;;  %v6558_v29 = vadd.f32 1.0, %v9637_v5  ;;  %v8266_v51 = vpop.f32.mrb[136].mxu1 }
 0x58e   : > { %v9641_v15 = vpop.eup %9640  ;;  %9660 = vrcp.f32 %v6556_v49  ;;  %v6557_v45 = vadd.f32 1.0, %v9639_v53  ;;  %v8267_v35 = vpop.f32.mrb[137].mxu1 }
 0x58f   : > { %v9643_v18 = vpop.eup %9642  ;;  %v8070_v20 = vpack.c.bf16 %v9641_v15, %v12318_v22  ;;  %9662 = vrcp.f32 %v6558_v29  ;;  %v12340_v54 = vadd.f32 %v8267_v35, %v8266_v51  ;;  %v8269_v22 = vpop.f32.mrb[138].mxu1 }
 0x590   : > { %v9645_v1 = vpop.eup %9644  ;;  %v8071_v63 = vpack.c.bf16 %v9643_v18, %v12320_v58  ;;  %9664 = vrcp.f32 %v6557_v45  ;;  %v8270_v58 = vpop.f32.mrb[139].mxu1 }
 0x591   : > { %v9647_v52 = vpop.eup %9646  ;;  %7206 = vst [vmem:[%s12174_s29 + $0xa8] sm:$0xff] %v8070_v20  ;;  %9666 = vpow2.f32 %v7934_v21  ;;  %v12345_v43 = vadd.f32 %v8270_v58, %v8269_v22 }
 0x592   : > { %v9649_v24 = vpop.eup %9648  ;;  %7207 = vst [vmem:[%s12174_s29 + $0xb0] sm:$0xff] %v8071_v63  ;;  %9668 = vpow2.f32 %v7938_v16 }
 0x593   : > { %v9651_v46 = vpop.eup %9650  ;;  %v8074_v57 = vpack.c.bf16 %v9649_v24, %v9645_v1  ;;  %9670 = vpow2.f32 %v7940_v55 }
 0x594   : > { %v9653_v39 = vpop.eup %9652  ;;  %v8075_v47 = vpack.c.bf16 %v9651_v46, %v9647_v52  ;;  %9672 = vpow2.f32 %v7939_v31 }
 0x595   : > { %v9655_v61 = vpop.eup %9654  ;;  %7210 = vst [vmem:[%s12174_s29 + $0xc4] sm:$0xff] %v8074_v57  ;;  %9674 = vpow2.f32 %v7941_v56  ;;  %v8272_v62 = vpop.f32.mrb[140].mxu1 }
 0x596   : > { %v9657_v36 = vpop.eup %9656  ;;  %7211 = vst [vmem:[%s12174_s29 + $0xcc] sm:$0xff] %v8075_v47  ;;  %9676 = vpow2.f32 %v7945_v60  ;;  %v8273_v17 = vpop.f32.mrb[141].mxu1 }
 0x597   : > { %v9659_v4 = vpop.eup %9658  ;;  %v8078_v37 = vpack.c.bf16 %v9657_v36, %v9653_v39  ;;  %9678 = vpow2.f32 %v7947_v26  ;;  %v12358_v5 = vadd.f32 %v8273_v17, %v8272_v62  ;;  %v8275_v49 = vpop.f32.mrb[142].mxu1 }
 0x598   : > { %v9661_v50 = vpop.eup %9660  ;;  %v8079_v12 = vpack.c.bf16 %v9659_v4, %v9655_v61  ;;  %9680 = vpow2.f32 %v7946_v59  ;;  %v8276_v44 = vpop.f32.mrb[143].mxu1 }
 0x599   : > { %v12354_v7 = vpop.eup %9662  ;;  %7214 = vst [vmem:[%s12174_s29 + $0xe0] sm:$0xff] %v8078_v37  ;;  %9682 = vpow2.f32 %v7948_v40  ;;  %v12361_v15 = vadd.f32 %v8276_v44, %v8275_v49 }
 0x59a   : > { %v9665_v53 = vpop.eup %9664  ;;  %7215 = vst [vmem:[%s12174_s29 + $0xe8] sm:$0xff] %v8079_v12  ;;  %9684 = vpow2.f32 %v7952_v41 }
 0x59b   : > { %v9667_v29 = vpop.eup %9666  ;;  %v8082_v21 = vpack.c.bf16 %v9665_v53, %v9661_v50  ;;  %9686 = vpow2.f32 %v7954_v8  ;;  %v7959_v8 = vmul.f32 -1.442695, %v12265_v28  ;;  %v7960_v53 = vmul.f32 -1.442695, %v12271_v0 }
 0x59c   : > { %v9669_v33 = vpop.eup %9668  ;;  %v6559_v45 = vadd.f32 1.0, %v9667_v29  ;;  %9688 = vpow2.f32 %v7953_v32  ;;  %v7961_v32 = vmul.f32 -1.442695, %v12268_v2  ;;  %v7962_v28 = vmul.f32 -1.442695, %v12274_v27 }
 0x59d   : > { %v9671_v16 = vpop.eup %9670  ;;  %7218 = vst [vmem:[%s12174_s29 + $0xfc] sm:$0xff] %v8082_v21  ;;  %v6563_v18 = vadd.f32 1.0, %v9669_v33  ;;  %9690 = vpow2.f32 %v7955_v30  ;;  %v8278_v1 = vpop.f32.mrb[144].mxu1  ;;  %v7966_v2 = vmul.f32 -1.442695, %v12285_v19 }
 0x59e   : > { %v9673_v38 = vpop.eup %9672  ;;  %9692 = vrcp.f32 %v6559_v45  ;;  %v6565_v20 = vadd.f32 1.0, %v9671_v16  ;;  %v8279_v35 = vpop.f32.mrb[145].mxu1  ;;  %v7968_v0 = vmul.f32 -1.442695, %v12290_v48  ;;  %v7967_v27 = vmul.f32 -1.442695, %v12293_v3 }
 0x59f   : > { %v9675_v55 = vpop.eup %9674  ;;  %9694 = vrcp.f32 %v6563_v18  ;;  %v6564_v51 = vadd.f32 1.0, %v9673_v38  ;;  %v12364_v22 = vadd.f32 %v8279_v35, %v8278_v1  ;;  %v8281_v24 = vpop.f32.mrb[146].mxu1  ;;  %v4124_v38 = vsub.s32 6, %v10875_v14  ;;  %v9958_v3 = vld [vmem:[%s12607_s8] sm:$0x7f] }
 0x5a0   : > { %v9677_v63 = vpop.eup %9676  ;;  %9696 = vrcp.f32 %v6565_v20  ;;  %v6566_v31 = vadd.f32 1.0, %v9675_v55  ;;  %v8282_v46 = vpop.f32.mrb[147].mxu1  ;;  %v7969_v19 = vmul.f32 -1.442695, %v12299_v34 }
 0x5a1   : > { %v9679_v52 = vpop.eup %9678  ;;  %9698 = vrcp.f32 %v6564_v51  ;;  %v6570_v56 = vadd.f32 1.0, %v9677_v63  ;;  %v12366_v39 = vadd.f32 %v8282_v46, %v8281_v24  ;;  %v7973_v63 = vmul.f32 -1.442695, %v12302_v10 }
 0x5a2   : > { %v9681_v60 = vpop.eup %9680  ;;  %9700 = vrcp.f32 %v6566_v31  ;;  %v6572_v58 = vadd.f32 1.0, %v9679_v52  ;;  %v7975_v52 = vmul.f32 -1.442695, %v12308_v6  ;;  %v7974_v10 = vmul.f32 -1.442695, %v12311_v11 }
 0x5a3   : > { %v9683_v57 = vpop.eup %9682  ;;  %9702 = vrcp.f32 %v6570_v56  ;;  %v6571_v26 = vadd.f32 1.0, %v9681_v60  ;;  %v12390_v56 = vrot.slane %v9958_v3, %v4124_v38  ;;  %v7976_v6 = vmul.f32 -1.442695, %v12314_v13 }
 0x5a4   : > { %v9685_v47 = vpop.eup %9684  ;;  %9704 = vrcp.f32 %v6572_v58  ;;  %v6573_v59 = vadd.f32 1.0, %v9683_v57 }
 0x5a5   : > { %v9687_v61 = vpop.eup %9686  ;;  %9706 = vrcp.f32 %v6571_v26  ;;  %v6577_v40 = vadd.f32 1.0, %v9685_v47  ;;  %v8284_v62 = vpop.f32.mrb[148].mxu1 }
 0x5a6   : > { %v9689_v36 = vpop.eup %9688  ;;  %9708 = vrcp.f32 %v6573_v59  ;;  %v6579_v41 = vadd.f32 1.0, %v9687_v61  ;;  %v8285_v17 = vpop.f32.mrb[149].mxu1 }
 0x5a7   : > { %v9691_v4 = vpop.eup %9690  ;;  %9710 = vrcp.f32 %v6577_v40  ;;  %v6578_v37 = vadd.f32 1.0, %v9689_v36  ;;  %v12372_v44 = vadd.f32 %v8285_v17, %v8284_v62  ;;  %v8287_v29 = vpop.f32.mrb[150].mxu1 }
 0x5a8   : > { %v9693_v50 = vpop.eup %9692  ;;  %9712 = vrcp.f32 %v6579_v41  ;;  %v6580_v12 = vadd.f32 1.0, %v9691_v4  ;;  %v8288_v33 = vpop.f32.mrb[151].mxu1 }
 0x5a9   : > { %v9695_v30 = vpop.eup %9694  ;;  %v8083_v49 = vpack.c.bf16 %v9693_v50, %v12354_v7  ;;  %9714 = vrcp.f32 %v6578_v37  ;;  %v12377_v16 = vadd.f32 %v8288_v33, %v8287_v29 }
 0x5aa   : > { %v9697_v21 = vpop.eup %9696  ;;  %9716 = vrcp.f32 %v6580_v12 }
 0x5ab   : > { %v9699_v45 = vpop.eup %9698  ;;  %7219 = vst [vmem:[%s12174_s29 + $0x104] sm:$0xff] %v8083_v49  ;;  %9718 = vpow2.f32 %v7959_v8 }
 0x5ac   : > { %v9701_v7 = vpop.eup %9700  ;;  %v8086_v18 = vpack.c.bf16 %v9699_v45, %v9695_v30  ;;  %9720 = vpow2.f32 %v7961_v32  ;;  %v4116_v30 = vsub.s32 4, %v10875_v14 }
 0x5ad   : > { %v9703_v20 = vpop.eup %9702  ;;  %v8087_v55 = vpack.c.bf16 %v9701_v7, %v9697_v21  ;;  %9722 = vpow2.f32 %v7960_v53  ;;  %v8290_v31 = vpop.f32.mrb[152].mxu1 }
 0x5ae   : > { %v9705_v51 = vpop.eup %9704  ;;  %7222 = vst [vmem:[%s12174_s29 + $0x118] sm:$0xff] %v8086_v18  ;;  %9724 = vpow2.f32 %v7962_v28  ;;  %v8291_v34 = vpop.f32.mrb[153].mxu1  ;;  %v4120_v28 = vsub.s32 5, %v10875_v14 }
 0x5af   : > { %v9707_v1 = vpop.eup %9706  ;;  %7223 = vst [vmem:[%s12174_s29 + $0x120] sm:$0xff] %v8087_v55  ;;  %9726 = vpow2.f32 %v7966_v2  ;;  %v8292_v58 = vadd.f32 %v8291_v34, %v8290_v31  ;;  %v8293_v46 = vpop.f32.mrb[154].mxu1 }
 0x5b0   : > { %v9709_v48 = vpop.eup %9708  ;;  %v8090_v35 = vpack.c.bf16 %v9707_v1, %v9703_v20  ;;  %9728 = vpow2.f32 %v7968_v0  ;;  %v8294_v26 = vpop.f32.mrb[155].mxu1  ;;  %v12414_v1 = vrot.slane %v9958_v3, %v4120_v28 }
 0x5b1   : > { %v9711_v24 = vpop.eup %9710  ;;  %v8091_v60 = vpack.c.bf16 %v9709_v48, %v9705_v51  ;;  %9730 = vpow2.f32 %v7967_v27  ;;  %v12397_v59 = vadd.f32 %v8292_v58, %v12390_v56  ;;  %v8295_v61 = vadd.f32 %v8294_v26, %v8293_v46 }
 0x5b2   : > { %v9713_v57 = vpop.eup %9712  ;;  %7226 = vst [vmem:[%s12174_s29 + $0x134] sm:$0xff] %v8090_v35  ;;  %9732 = vpow2.f32 %v7969_v19  ;;  %v12409_v27 = vrot.slane %v9958_v3, %v4116_v30 }
 0x5b3   : > { %v9715_v47 = vpop.eup %9714  ;;  %7227 = vst [vmem:[%s12174_s29 + $0x13c] sm:$0xff] %v8091_v60  ;;  %9734 = vpow2.f32 %v7973_v63  ;;  %v12400_v4 = vadd.f32 %v8295_v61, %v12390_v56 }
 0x5b4   : > { %v9717_v40 = vpop.eup %9716  ;;  %v8094_v36 = vpack.c.bf16 %v9715_v47, %v9711_v24  ;;  %9736 = vpow2.f32 %v7975_v52 }
 0x5b5   : > { %v9719_v11 = vpop.eup %9718  ;;  %v8095_v41 = vpack.c.bf16 %v9717_v40, %v9713_v57  ;;  %9738 = vpow2.f32 %v7974_v10  ;;  %v8296_v50 = vpop.f32.mrb[156].mxu1  ;;  %v5998_v10 = vadd.f32 %v12324_v9, %v12390_v56 }
 0x5b6   : > { %v9721_v37 = vpop.eup %9720  ;;  %7230 = vst [vmem:[%s12174_s29 + $0x150] sm:$0xff] %v8094_v36  ;;  %v6584_v13 = vadd.f32 1.0, %v9719_v11  ;;  %9740 = vpow2.f32 %v7976_v6  ;;  %v8297_v17 = vpop.f32.mrb[157].mxu1 }
 0x5b7   : > { %v9723_v8 = vpop.eup %9722  ;;  %7231 = vst [vmem:[%s12174_s29 + $0x158] sm:$0xff] %v8095_v41  ;;  %v6586_v62 = vadd.f32 1.0, %v9721_v37  ;;  %v8298_v29 = vadd.f32 %v8297_v17, %v8296_v50  ;;  %v8299_v21 = vpop.f32.mrb[158].mxu1 }
 0x5b8   : > { %v9725_v12 = vpop.eup %9724  ;;  %9742 = vrcp.f32 %v6584_v13  ;;  %v6585_v32 = vadd.f32 1.0, %v9723_v8  ;;  %v8300_v2 = vpop.f32.mrb[159].mxu1 }
 0x5b9   : > { %v9727_v49 = vpop.eup %9726  ;;  %9744 = vrcp.f32 %v6586_v62  ;;  %v6587_v53 = vadd.f32 1.0, %v9725_v12  ;;  %v12407_v0 = vadd.f32 %v8298_v29, %v12390_v56  ;;  %v8301_v38 = vadd.f32 %v8300_v2, %v8299_v21 }
 0x5ba   : > { %v9729_v33 = vpop.eup %9728  ;;  %9746 = vrcp.f32 %v6585_v32  ;;  %v6591_v45 = vadd.f32 1.0, %v9727_v49  ;;  %v6001_v12 = vadd.f32 %v12326_v42, %v12390_v56 }
 0x5bb   : > { %v9731_v7 = vpop.eup %9730  ;;  %9748 = vrcp.f32 %v6587_v53  ;;  %v6593_v18 = vadd.f32 1.0, %v9729_v33  ;;  %v12412_v14 = vadd.f32 %v8301_v38, %v12390_v56 }
 0x5bc   : > { %v9733_v20 = vpop.eup %9732  ;;  %9750 = vrcp.f32 %v6591_v45  ;;  %v6592_v55 = vadd.f32 1.0, %v9731_v7 }
 0x5bd   : > { %v9735_v51 = vpop.eup %9734  ;;  %9752 = vrcp.f32 %v6593_v18  ;;  %v6594_v19 = vadd.f32 1.0, %v9733_v20  ;;  %v5884_v52 = vpop.f32.mrb[128].mxu0 }
 0x5be   : > { %v9737_v63 = vpop.eup %9736  ;;  %9754 = vrcp.f32 %v6592_v55  ;;  %v6598_v31 = vadd.f32 1.0, %v9735_v51  ;;  %v8318_v34 = vpop.f32.mrb[160].mxu1  ;;  %v8494_v58 = vadd.f32 %v5884_v52, %v12409_v27 }
 0x5bf   : > { %v9739_v48 = vpop.eup %9738  ;;  %9756 = vrcp.f32 %v6594_v19  ;;  %v6600_v35 = vadd.f32 1.0, %v9737_v63  ;;  %v5886_v46 = vpop.f32.mrb[129].mxu0  ;;  %v6006_v63 = vadd.f32 %v12328_v25, %v12390_v56 }
 0x5c0   : > { %v9741_v24 = vpop.eup %9740  ;;  %9758 = vrcp.f32 %v6598_v31  ;;  %v6599_v60 = vadd.f32 1.0, %v9739_v48  ;;  %v8319_v57 = vpop.f32.mrb[161].mxu1  ;;  %v8495_v6 = vadd.f32 %v5886_v46, %v12414_v1  ;;  %v7872_v36 = vmul.f32 -1.442695, %v8494_v58 }
 0x5c1   : > { %9760 = vrcp.f32 %v6600_v35  ;;  %v6601_v3 = vadd.f32 1.0, %v9741_v24  ;;  %v8320_v26 = vadd.f32 %v8319_v57, %v8318_v34  ;;  %v5888_v47 = vpop.f32.mrb[130].mxu0  ;;  %v8321_v61 = vpop.f32.mrb[162].mxu1 }
 0x5c2   : > { %v9743_v40 = vpop.eup %9742  ;;  %9762 = vrcp.f32 %v6599_v60  ;;  %v8496_v11 = vadd.f32 %v5888_v47, %v12409_v27  ;;  %v5890_v41 = vpop.f32.mrb[131].mxu0  ;;  %v7873_v9 = vmul.f32 -1.442695, %v8495_v6 }
 0x5c3   : > { %v8322_v37 = vpop.f32.mrb[163].mxu1  ;;  %v9745_v13 = vpop.eup %9744  ;;  %9764 = vrcp.f32 %v6601_v3  ;;  %v6095_v8 = vadd.f32 %v8320_v26, %v5998_v10  ;;  %v8497_v62 = vadd.f32 %v5890_v41, %v12414_v1 }
 0x5c4   : > { %v9747_v50 = vpop.eup %9746  ;;  %9766 = vpow2.f32 %v7872_v36  ;;  %v7879_v32 = vmul.f32 -1.442695, %v8496_v11  ;;  %v8323_v17 = vadd.f32 %v8322_v37, %v8321_v61  ;;  %v6009_v61 = vadd.f32 %v12330_v23, %v12390_v56 }
 0x5c5   : > { %v9749_v30 = vpop.eup %9748  ;;  %v8098_v49 = vpack.c.bf16 %v9747_v50, %v9743_v40  ;;  %9768 = vpow2.f32 %v7873_v9  ;;  %v7874_v53 = vmul.f32 -1.442695, %v6095_v8  ;;  %v7880_v29 = vmul.f32 -1.442695, %v8497_v62  ;;  %v5894_v2 = vpop.f32.mrb[132].mxu0 }
 0x5c6   : > { %v9751_v21 = vpop.eup %9750  ;;  %v8099_v28 = vpack.c.bf16 %v9749_v30, %v9745_v13  ;;  %9770 = vpow2.f32 %v7879_v32  ;;  %v6098_v33 = vadd.f32 %v8323_v17, %v6001_v12  ;;  %v8324_v7 = vpop.f32.mrb[164].mxu1  ;;  %v8498_v38 = vadd.f32 %v5894_v2, %v12409_v27 }
 0x5c7   : > { %v9753_v45 = vpop.eup %9752  ;;  %7234 = vst [vmem:[%s12174_s29 + $0x16c] sm:$0xff] %v8098_v49  ;;  %9772 = vpow2.f32 %v7874_v53  ;;  %v5896_v20 = vpop.f32.mrb[133].mxu0 }
 0x5c8   : > { %v9755_v18 = vpop.eup %9754  ;;  %7235 = vst [vmem:[%s12174_s29 + $0x174] sm:$0xff] %v8099_v28  ;;  %9774 = vpow2.f32 %v7880_v29  ;;  %v7881_v42 = vmul.f32 -1.442695, %v6098_v33  ;;  %v8325_v55 = vpop.f32.mrb[165].mxu1  ;;  %v8499_v31 = vadd.f32 %v5896_v20, %v12414_v1  ;;  %v7886_v60 = vmul.f32 -1.442695, %v8498_v38 }
 0x5c9   : > { %v9757_v51 = vpop.eup %9756  ;;  %v8102_v19 = vpack.c.bf16 %v9755_v18, %v9751_v21  ;;  %v8326_v48 = vadd.f32 %v8325_v55, %v8324_v7  ;;  %v5898_v35 = vpop.f32.mrb[134].mxu0  ;;  %v6014_v21 = vadd.f32 %v12340_v54, %v12390_v56 }
 0x5ca   : > { %v8327_v52 = vpop.f32.mrb[166].mxu1  ;;  %v9759_v34 = vpop.eup %9758  ;;  %v8103_v24 = vpack.c.bf16 %v9757_v51, %v9753_v45  ;;  %9776 = vpow2.f32 %v7881_v42  ;;  %v8500_v10 = vadd.f32 %v5898_v35, %v12409_v27  ;;  %v7887_v3 = vmul.f32 -1.442695, %v8499_v31 }
 0x5cb   : > { %v5900_v58 = vpop.f32.mrb[135].mxu0  ;;  %v8328_v46 = vpop.f32.mrb[167].mxu1  ;;  %7238 = vst [vmem:[%s12174_s29 + $0x188] sm:$0xff] %v8102_v19  ;;  %v6103_v6 = vadd.f32 %v8326_v48, %v6006_v63  ;;  %9778 = vpow2.f32 %v7886_v60  ;;  %v6017_v63 = vadd.f32 %v12345_v43, %v12390_v56 }
 0x5cc   : > { %v9761_v57 = vpop.eup %9760  ;;  %v8501_v25 = vadd.f32 %v5900_v58, %v12414_v1  ;;  %v8329_v26 = vadd.f32 %v8328_v46, %v8327_v52  ;;  %7239 = vst [vmem:[%s12174_s29 + $0x190] sm:$0xff] %v8103_v24  ;;  %v7893_v40 = vmul.f32 -1.442695, %v8500_v10  ;;  %9780 = vpow2.f32 %v7887_v3 }
 0x5cd   : > { %v9763_v47 = vpop.eup %9762  ;;  %v7888_v41 = vmul.f32 -1.442695, %v6103_v6  ;;  %v5904_v12 = vpop.f32.mrb[136].mxu0 }
 0x5ce   : > { %v9765_v36 = vpop.eup %9764  ;;  %v8106_v11 = vpack.c.bf16 %v9763_v47, %v9759_v34  ;;  %v7894_v37 = vmul.f32 -1.442695, %v8501_v25  ;;  %9782 = vpow2.f32 %v7893_v40  ;;  %v6106_v8 = vadd.f32 %v8329_v26, %v6009_v61  ;;  %v8330_v32 = vpop.f32.mrb[168].mxu1 }
 0x5cf   : > { %v9767_v13 = vpop.eup %9766  ;;  %v8107_v9 = vpack.c.bf16 %v9765_v36, %v9761_v57  ;;  %9784 = vpow2.f32 %v7888_v41  ;;  %v8502_v30 = vadd.f32 %v5904_v12, %v12409_v27  ;;  %v5906_v49 = vpop.f32.mrb[137].mxu0  ;;  %v6022_v57 = vadd.f32 %v12358_v5, %v12390_v56 }
 0x5d0   : > { %v9769_v62 = vpop.eup %9768  ;;  %7242 = vst [vmem:[%s12174_s29 + $0x1a4] sm:$0xff] %v8106_v11  ;;  %v6497_v50 = vadd.f32 1.0, %v9767_v13  ;;  %9786 = vpow2.f32 %v7894_v37  ;;  %v8331_v53 = vpop.f32.mrb[169].mxu1  ;;  %v7895_v42 = vmul.f32 -1.442695, %v6106_v8  ;;  %v8503_v52 = vadd.f32 %v5906_v49, %v12414_v1 }
 0x5d1   : > { %v9771_v17 = vpop.eup %9770  ;;  %7243 = vst [vmem:[%s12174_s29 + $0x1ac] sm:$0xff] %v8107_v9  ;;  %v6498_v23 = vadd.f32 1.0, %v9769_v62  ;;  %v8332_v33 = vadd.f32 %v8331_v53, %v8330_v32  ;;  %v5908_v45 = vpop.f32.mrb[138].mxu0  ;;  %v7900_v54 = vmul.f32 -1.442695, %v8502_v30  ;;  %v6025_v37 = vadd.f32 %v12361_v15, %v12390_v56 }
 0x5d2   : > { %v9773_v29 = vpop.eup %9772  ;;  %9788 = vrcp.f32 %v6497_v50  ;;  %v6504_v28 = vadd.f32 1.0, %v9771_v17  ;;  %v8333_v2 = vpop.f32.mrb[170].mxu1  ;;  %v8504_v3 = vadd.f32 %v5908_v45, %v12409_v27  ;;  %v7901_v13 = vmul.f32 -1.442695, %v8503_v52 }
 0x5d3   : > { %v9775_v7 = vpop.eup %9774  ;;  %9790 = vrcp.f32 %v6498_v23  ;;  %v6499_v18 = vadd.f32 1.0, %v9773_v29  ;;  %v5910_v38 = vpop.f32.mrb[139].mxu0  ;;  %v6111_v51 = vadd.f32 %v8332_v33, %v6014_v21 }
 0x5d4   : > { %v8334_v20 = vpop.f32.mrb[171].mxu1  ;;  %9792 = vrcp.f32 %v6504_v28  ;;  %v6505_v55 = vadd.f32 1.0, %v9775_v7  ;;  %v9777_v19 = vpop.eup %9776  ;;  %v8505_v61 = vadd.f32 %v5910_v38, %v12414_v1  ;;  %v7907_v23 = vmul.f32 -1.442695, %v8504_v3 }
 0x5d5   : > { %9794 = vrcp.f32 %v6499_v18  ;;  %v8335_v31 = vadd.f32 %v8334_v20, %v8333_v2  ;;  %v6506_v48 = vadd.f32 1.0, %v9777_v19  ;;  %v9779_v35 = vpop.eup %9778  ;;  %v5914_v10 = vpop.f32.mrb[140].mxu0  ;;  %v7902_v12 = vmul.f32 -1.442695, %v6111_v51 }
 0x5d6   : > { %9796 = vrcp.f32 %v6505_v55  ;;  %v9781_v24 = vpop.eup %9780  ;;  %v6511_v60 = vadd.f32 1.0, %v9779_v35  ;;  %v8336_v58 = vpop.f32.mrb[172].mxu1  ;;  %v8506_v30 = vadd.f32 %v5914_v10, %v12409_v27  ;;  %v7908_v15 = vmul.f32 -1.442695, %v8505_v61 }
 0x5d7   : > { %9798 = vpow2.f32 %v7895_v42  ;;  %v6114_v34 = vadd.f32 %v8335_v31, %v6017_v63  ;;  %v6512_v43 = vadd.f32 1.0, %v9781_v24  ;;  %v5916_v6 = vpop.f32.mrb[141].mxu0  ;;  %v8337_v25 = vpop.f32.mrb[173].mxu1  ;;  %v6030_v7 = vadd.f32 %v12364_v22, %v12390_v56 }
 0x5d8   : > { %9800 = vrcp.f32 %v6506_v48  ;;  %v9783_v46 = vpop.eup %9782  ;;  %v8338_v40 = vadd.f32 %v8337_v25, %v8336_v58  ;;  %v5918_v36 = vpop.f32.mrb[142].mxu0  ;;  %v8507_v33 = vadd.f32 %v5916_v6, %v12414_v1  ;;  %v7914_v51 = vmul.f32 -1.442695, %v8506_v30 }
 0x5d9   : > { %9802 = vpow2.f32 %v7900_v54  ;;  %v9785_v26 = vpop.eup %9784  ;;  %v6518_v47 = vadd.f32 1.0, %v9783_v46  ;;  %v8339_v11 = vpop.f32.mrb[174].mxu1  ;;  %v7909_v28 = vmul.f32 -1.442695, %v6114_v34  ;;  %v8508_v19 = vadd.f32 %v5918_v36, %v12409_v27 }
 0x5da   : > { %9804 = vrcp.f32 %v6511_v60  ;;  %v9787_v41 = vpop.eup %9786  ;;  %v6513_v5 = vadd.f32 1.0, %v9785_v26  ;;  %v5920_v9 = vpop.f32.mrb[143].mxu0  ;;  %v6119_v32 = vadd.f32 %v8338_v40, %v6022_v57  ;;  %v7915_v10 = vmul.f32 -1.442695, %v8507_v33 }
 0x5db   : > { %9806 = vrcp.f32 %v6512_v43  ;;  %v8340_v8 = vpop.f32.mrb[175].mxu1  ;;  %v6519_v50 = vadd.f32 1.0, %v9787_v41  ;;  %v8509_v22 = vadd.f32 %v5920_v9, %v12414_v1  ;;  %v6033_v26 = vadd.f32 %v12366_v39, %v12390_v56 }
 0x5dc   : > { %v9789_v62 = vpop.eup %9788  ;;  %9808 = vrcp.f32 %v6518_v47  ;;  %v8341_v49 = vadd.f32 %v8340_v8, %v8339_v11  ;;  %v7916_v3 = vmul.f32 -1.442695, %v6119_v32  ;;  %v7921_v47 = vmul.f32 -1.442695, %v8508_v19 }
 0x5dd   : > { %v9791_v17 = vpop.eup %9790  ;;  %9810 = vrcp.f32 %v6513_v5  ;;  %v5924_v42 = vpop.f32.mrb[144].mxu0  ;;  %v7922_v11 = vmul.f32 -1.442695, %v8509_v22  ;;  %v6038_v30 = vadd.f32 %v12372_v44, %v12390_v56  ;;  %v6041_v19 = vadd.f32 %v12377_v16, %v12390_v56 }
 0x5de   : > { %v9793_v53 = vpop.eup %9792  ;;  %v8048_v29 = vpack.c.bf16 %v9791_v17, %v9789_v62  ;;  %9812 = vrcp.f32 %v6519_v50  ;;  %v6122_v45 = vadd.f32 %v8341_v49, %v6025_v37  ;;  %v8342_v38 = vpop.f32.mrb[176].mxu1 }
 0x5df   : > { %v9795_v21 = vpop.eup %9794  ;;  %9814 = vpow2.f32 %v7901_v13  ;;  %v5926_v63 = vpop.f32.mrb[145].mxu0 }
 0x5e0   : > { %v9797_v2 = vpop.eup %9796  ;;  %7183 = vst [vmem:[%s12174_s29 + $0x10] sm:$0xff] %v8048_v29  ;;  %v8049_v18 = vpack.c.bf16 %v9795_v21, %v9795_v21  ;;  %9816 = vpow2.f32 %v7902_v12  ;;  %v8343_v54 = vpop.f32.mrb[177].mxu1  ;;  %v7923_v37 = vmul.f32 -1.442695, %v6122_v45  ;;  %v8510_v12 = vadd.f32 %v5924_v42, %v12409_v27 }
 0x5e1   : > { %v9799_v20 = vpop.eup %9798  ;;  %v8052_v55 = vpack.c.bf16 %v9797_v2, %v9793_v53  ;;  %9818 = vpow2.f32 %v7907_v23  ;;  %v8344_v35 = vadd.f32 %v8343_v54, %v8342_v38  ;;  %v12459_v52 = vpop.f32.mrb[146].mxu0  ;;  %v8511_v33 = vadd.f32 %v5926_v63, %v12414_v1 }
 0x5e2   : > { %v9801_v31 = vpop.eup %9800  ;;  %7185 = vst.msk [vmem:[%s12174_s29 + $0x18] sm:$0xf] %vm7184_vm1, %v8049_v18  ;;  %v6520_v48 = vadd.f32 1.0, %v9799_v20  ;;  %9820 = vpow2.f32 %v7908_v15  ;;  %v8345_v34 = vpop.f32.mrb[178].mxu1  ;;  %v7928_v20 = vmul.f32 -1.442695, %v8510_v12 }
 0x5e3   : > { %v9803_v24 = vpop.eup %9802  ;;  %7188 = vst [vmem:[%s12174_s29 + $0x2c] sm:$0xff] %v8052_v55  ;;  %v8053_v60 = vpack.c.bf16 %v9801_v31, %v9801_v31  ;;  %9822 = vpow2.f32 %v7909_v28  ;;  %v12462_v58 = vpop.f32.mrb[147].mxu0  ;;  %v12464_v6 = vadd.f32 %v8344_v35, %v6030_v7  ;;  %v8512_v55 = vadd.f32 %v12459_v52, %v12409_v27 }
 0x5e4   : > { %v8346_v46 = vpop.f32.mrb[179].mxu1  ;;  %v9805_v57 = vpop.eup %9804  ;;  %9824 = vrcp.f32 %v6520_v48  ;;  %v6525_v43 = vadd.f32 1.0, %v9803_v24  ;;  %v7929_v22 = vmul.f32 -1.442695, %v8511_v33 }
 0x5e5   : > { %v9807_v25 = vpop.eup %9806  ;;  %7189 = vst.msk [vmem:[%s12174_s29 + $0x34] sm:$0xf] %vm7184_vm1, %v8053_v60  ;;  %9826 = vpow2.f32 %v7914_v51  ;;  %v8347_v61 = vadd.f32 %v8346_v46, %v8345_v34  ;;  %v12473_v39 = vpop.f32.mrb[148].mxu0  ;;  %v7935_v46 = vmul.f32 -1.442695, %v8512_v55 }
 0x5e6   : > { %v9809_v40 = vpop.eup %9808  ;;  %v8056_v36 = vpack.c.bf16 %v9807_v25, %v9805_v57  ;;  %9828 = vrcp.f32 %v6525_v43  ;;  %v8348_v8 = vpop.f32.mrb[180].mxu1  ;;  %v8513_v25 = vadd.f32 %v12462_v58, %v12414_v1 }
 0x5e7   : > { %v9811_v41 = vpop.eup %9810  ;;  %9830 = vpow2.f32 %v7915_v10  ;;  %v12470_v5 = vadd.f32 %v8347_v61, %v6033_v26  ;;  %v12476_v32 = vpop.f32.mrb[149].mxu0 }
 0x5e8   : > { %v9813_v13 = vpop.eup %9812  ;;  %7192 = vst [vmem:[%s12174_s29 + $0x48] sm:$0xff] %v8056_v36  ;;  %v8057_v9 = vpack.c.bf16 %v9811_v41, %v9811_v41  ;;  %9832 = vpow2.f32 %v7916_v3  ;;  %v8349_v17 = vpop.f32.mrb[181].mxu1 }
 0x5e9   : > { %v9815_v62 = vpop.eup %9814  ;;  %v8060_v50 = vpack.c.bf16 %v9813_v13, %v9809_v40  ;;  %9834 = vpow2.f32 %v7921_v47  ;;  %v8350_v53 = vadd.f32 %v8349_v17, %v8348_v8  ;;  %v12482_v29 = vpop.f32.mrb[150].mxu0 }
 0x5ea   : > { %v9817_v23 = vpop.eup %9816  ;;  %7193 = vst.msk [vmem:[%s12174_s29 + $0x50] sm:$0xf] %vm7184_vm1, %v8057_v9  ;;  %v6526_v49 = vadd.f32 1.0, %v9815_v62  ;;  %9836 = vpow2.f32 %v7922_v11  ;;  %v8351_v15 = vpop.f32.mrb[182].mxu1  ;;  %v7930_v11 = vmul.f32 -1.442695, %v12464_v6  ;;  %v8514_v62 = vadd.f32 %v12473_v39, %v12409_v27 }
 0x5eb   : > { %v9819_v21 = vpop.eup %9818  ;;  %7196 = vst [vmem:[%s12174_s29 + $0x64] sm:$0xff] %v8060_v50  ;;  %v6527_v28 = vadd.f32 1.0, %v9817_v23  ;;  %9838 = vpow2.f32 %v7923_v37  ;;  %v12486_v45 = vpop.f32.mrb[151].mxu0  ;;  %v12488_v18 = vadd.f32 %v8350_v53, %v6038_v30 }
 0x5ec   : > { %v8352_v2 = vpop.f32.mrb[183].mxu1  ;;  %v9821_v7 = vpop.eup %9820  ;;  %9840 = vrcp.f32 %v6526_v49  ;;  %v6532_v44 = vadd.f32 1.0, %v9819_v21  ;;  %v8515_v49 = vadd.f32 %v12476_v32, %v12414_v1  ;;  %v7936_v21 = vmul.f32 -1.442695, %v8513_v25 }
 0x5ed   : > { %v9823_v42 = vpop.eup %9822  ;;  %9842 = vrcp.f32 %v6527_v28  ;;  %v6533_v38 = vadd.f32 1.0, %v9821_v7  ;;  %v8353_v54 = vadd.f32 %v8352_v2, %v8351_v15  ;;  %v5944_v60 = vpop.f32.mrb[152].mxu0  ;;  %v7942_v32 = vmul.f32 -1.442695, %v8514_v62 }
 0x5ee   : > { %v9825_v51 = vpop.eup %9824  ;;  %9844 = vrcp.f32 %v6532_v44  ;;  %v6534_v63 = vadd.f32 1.0, %v9823_v42  ;;  %v8354_v10 = vpop.f32.mrb[184].mxu1  ;;  %v12499_v16 = vadd.f32 %v5944_v60, %v12409_v27 }
 0x5ef   : > { %v9827_v31 = vpop.eup %9826  ;;  %v8061_v48 = vpack.c.bf16 %v9825_v51, %v9825_v51  ;;  %9846 = vrcp.f32 %v6533_v38  ;;  %v12494_v24 = vadd.f32 %v8353_v54, %v6041_v19  ;;  %v5946_v56 = vpop.f32.mrb[153].mxu0  ;;  %v8516_v38 = vadd.f32 %v12482_v29, %v12409_v27 }
 0x5f0   : > { %v9829_v35 = vpop.eup %9828  ;;  %9848 = vrcp.f32 %v6534_v63  ;;  %v6539_v34 = vadd.f32 1.0, %v9827_v31  ;;  %v8355_v57 = vpop.f32.mrb[185].mxu1  ;;  %v12504_v26 = vadd.f32 %v5946_v56, %v12414_v1 }
 0x5f1   : > { %v9831_v52 = vpop.eup %9830  ;;  %7197 = vst.msk [vmem:[%s12174_s29 + $0x6c] sm:$0xf] %vm7184_vm1, %v8061_v48  ;;  %9850 = vpow2.f32 %v7928_v20  ;;  %v5948_v47 = vpop.f32.mrb[154].mxu0  ;;  %v8356_v41 = vadd.f32 %v8355_v57, %v8354_v10 }
 0x5f2   : > { %v9833_v43 = vpop.eup %9832  ;;  %9852 = vrcp.f32 %v6539_v34  ;;  %v6540_v3 = vadd.f32 1.0, %v9831_v52  ;;  %v8357_v61 = vpop.f32.mrb[186].mxu1  ;;  %v12510_v58 = vadd.f32 %v5948_v47, %v12409_v27 }
 0x5f3   : > { %v9835_v40 = vpop.eup %9834  ;;  %v6541_v36 = vadd.f32 1.0, %v9833_v43  ;;  %9854 = vpow2.f32 %v7929_v22  ;;  %v5950_v37 = vpop.f32.mrb[155].mxu0  ;;  %v12513_v17 = vadd.f32 %v8356_v41, %v12397_v59  ;;  %v7937_v59 = vmul.f32 -1.442695, %v12470_v5 }
 0x5f4   : > { %v8358_v13 = vpop.f32.mrb[187].mxu1  ;;  %v9837_v9 = vpop.eup %9836  ;;  %9856 = vrcp.f32 %v6540_v3  ;;  %v6546_v8 = vadd.f32 1.0, %v9835_v40  ;;  %v12516_v6 = vadd.f32 %v5950_v37, %v12414_v1  ;;  %v7943_v5 = vmul.f32 -1.442695, %v8515_v49 }
 0x5f5   : > { %v9839_v50 = vpop.eup %9838  ;;  %9858 = vrcp.f32 %v6541_v36  ;;  %v6547_v12 = vadd.f32 1.0, %v9837_v9  ;;  %v8359_v39 = vadd.f32 %v8358_v13, %v8357_v61  ;;  %v5954_v7 = vpop.f32.mrb[156].mxu0  ;;  %v8517_v22 = vadd.f32 %v12486_v45, %v12414_v1 }
 0x5f6   : > { %v9841_v23 = vpop.eup %9840  ;;  %9860 = vrcp.f32 %v6546_v8  ;;  %v6548_v30 = vadd.f32 1.0, %v9839_v50  ;;  %v8360_v44 = vpop.f32.mrb[188].mxu1  ;;  %v12528_v20 = vadd.f32 %v5954_v7, %v12409_v27  ;;  %v7956_v37 = vmul.f32 -1.442695, %v12499_v16 }
 0x5f7   : > { %v9843_v53 = vpop.eup %9842  ;;  %v8064_v15 = vpack.c.bf16 %v9841_v23, %v9829_v35  ;;  %9862 = vrcp.f32 %v6547_v12  ;;  %v12522_v2 = vadd.f32 %v8359_v39, %v12400_v4  ;;  %v5956_v55 = vpop.f32.mrb[157].mxu0  ;;  %v7950_v40 = vmul.f32 -1.442695, %v8517_v22 }
 0x5f8   : > { %v9845_v28 = vpop.eup %9844  ;;  %v8065_v33 = vpack.c.bf16 %v9843_v53, %v9843_v53  ;;  %9864 = vrcp.f32 %v6548_v30  ;;  %v8361_v51 = vpop.f32.mrb[189].mxu1  ;;  %v12533_v63 = vadd.f32 %v5956_v55, %v12414_v1  ;;  %v7957_v39 = vmul.f32 -1.442695, %v12504_v26 }
 0x5f9   : > { %v9847_v42 = vpop.eup %9846  ;;  %7200 = vst [vmem:[%s12174_s29 + $0x80] sm:$0xff] %v8064_v15  ;;  %9866 = vpow2.f32 %v7930_v11  ;;  %v5958_v54 = vpop.f32.mrb[158].mxu0  ;;  %v8362_v35 = vadd.f32 %v8361_v51, %v8360_v44  ;;  %v7965_v22 = vmul.f32 -1.442695, %v12522_v2 }
 0x5fa   : > { %v9849_v19 = vpop.eup %9848  ;;  %7201 = vst.msk [vmem:[%s12174_s29 + $0x88] sm:$0xf] %vm7184_vm1, %v8065_v33  ;;  %v8068_v4 = vpack.c.bf16 %v9847_v42, %v9845_v28  ;;  %9868 = vpow2.f32 %v7935_v46  ;;  %v8363_v31 = vpop.f32.mrb[190].mxu1  ;;  %v7944_v46 = vmul.f32 -1.442695, %v12488_v18  ;;  %v12540_v56 = vadd.f32 %v5958_v54, %v12409_v27 }
 0x5fb   : > { %v9851_v48 = vpop.eup %9850  ;;  %v8069_v29 = vpack.c.bf16 %v9849_v19, %v9849_v19  ;;  %9870 = vpow2.f32 %v7936_v21  ;;  %v5960_v34 = vpop.f32.mrb[159].mxu0  ;;  %v12545_v43 = vadd.f32 %v8362_v35, %v12407_v0  ;;  %v7949_v18 = vmul.f32 -1.442695, %v8516_v38 }
 0x5fc   : > { %v8364_v60 = vpop.f32.mrb[191].mxu1  ;;  %v9853_v10 = vpop.eup %9852  ;;  %7204 = vst [vmem:[%s12174_s29 + $0x9c] sm:$0xff] %v8068_v4  ;;  %v6553_v52 = vadd.f32 1.0, %v9851_v48  ;;  %9872 = vpow2.f32 %v7937_v59  ;;  %v12548_v45 = vadd.f32 %v5960_v34, %v12414_v1  ;;  %v7951_v0 = vmul.f32 -1.442695, %v12494_v24 }
 0x5fd   : > { %v9855_v57 = vpop.eup %9854  ;;  %7205 = vst.msk [vmem:[%s12174_s29 + $0xa4] sm:$0xf] %vm7184_vm1, %v8069_v29  ;;  %9874 = vpow2.f32 %v7942_v32  ;;  %v8365_v3 = vadd.f32 %v8364_v60, %v8363_v31  ;;  %v7958_v28 = vmul.f32 -1.442695, %v12513_v17  ;;  %v7963_v4 = vmul.f32 -1.442695, %v12510_v58 }
 0x5fe   : > { %v9857_v25 = vpop.eup %9856  ;;  %9876 = vrcp.f32 %v6553_v52  ;;  %v6554_v47 = vadd.f32 1.0, %v9855_v57  ;;  %v7964_v31 = vmul.f32 -1.442695, %v12516_v6  ;;  %v7970_v34 = vmul.f32 -1.442695, %v12528_v20 }
 0x5ff   : > { %v9859_v61 = vpop.eup %9858  ;;  %v8072_v27 = vpack.c.bf16 %v9857_v25, %v9853_v10  ;;  %9878 = vpow2.f32 %v7943_v5  ;;  %v12552_v1 = vadd.f32 %v8365_v3, %v12412_v14  ;;  %v7971_v10 = vmul.f32 -1.442695, %v12533_v63 }
 0x600   : > { %v9861_v36 = vpop.eup %9860  ;;  %v8073_v11 = vpack.c.bf16 %v9859_v61, %v9859_v61  ;;  %9880 = vrcp.f32 %v6554_v47  ;;  %v7972_v2 = vmul.f32 -1.442695, %v12545_v43  ;;  %v7977_v63 = vmul.f32 -1.442695, %v12540_v56 }
 0x601   : > { %v9863_v41 = vpop.eup %9862  ;;  %7208 = vst [vmem:[%s12174_s29 + $0xb8] sm:$0xff] %v8072_v27  ;;  %9882 = vpow2.f32 %v7944_v46  ;;  %v7978_v61 = vmul.f32 -1.442695, %v12548_v45 }
 0x602   : > { %v9865_v13 = vpop.eup %9864  ;;  %7209 = vst.msk [vmem:[%s12174_s29 + $0xc0] sm:$0xf] %vm7184_vm1, %v8073_v11  ;;  %v8076_v9 = vpack.c.bf16 %v9863_v41, %v9861_v36  ;;  %9884 = vpow2.f32 %v7949_v18 }
 0x603   : > { %v9867_v8 = vpop.eup %9866  ;;  %v8077_v62 = vpack.c.bf16 %v9865_v13, %v9865_v13  ;;  %9886 = vpow2.f32 %v7950_v40  ;;  %v7979_v40 = vmul.f32 -1.442695, %v12552_v1 }
 0x604   : > { %v9869_v50 = vpop.eup %9868  ;;  %7212 = vst [vmem:[%s12174_s29 + $0xd4] sm:$0xff] %v8076_v9  ;;  %v6555_v24 = vadd.f32 1.0, %v9867_v8  ;;  %9888 = vpow2.f32 %v7951_v0 }
 0x605   : > { %v9871_v14 = vpop.eup %9870  ;;  %7213 = vst.msk [vmem:[%s12174_s29 + $0xdc] sm:$0xf] %vm7184_vm1, %v8077_v62  ;;  %v6560_v12 = vadd.f32 1.0, %v9869_v50  ;;  %9890 = vpow2.f32 %v7956_v37 }
 0x606   : > { %v9873_v23 = vpop.eup %9872  ;;  %9892 = vrcp.f32 %v6555_v24  ;;  %v6561_v16 = vadd.f32 1.0, %v9871_v14 }
 0x607   : > { %v9875_v30 = vpop.eup %9874  ;;  %9894 = vrcp.f32 %v6560_v12  ;;  %v6562_v49 = vadd.f32 1.0, %v9873_v23 }
 0x608   : > { %v9877_v53 = vpop.eup %9876  ;;  %9896 = vrcp.f32 %v6561_v16  ;;  %v6567_v15 = vadd.f32 1.0, %v9875_v30 }
 0x609   : > { %v9879_v21 = vpop.eup %9878  ;;  %9898 = vrcp.f32 %v6562_v49 }
 0x60a   : > { %v9881_v33 = vpop.eup %9880  ;;  %9900 = vrcp.f32 %v6567_v15  ;;  %v6568_v59 = vadd.f32 1.0, %v9879_v21 }
 0x60b   : > { %v9883_v7 = vpop.eup %9882  ;;  %v8080_v44 = vpack.c.bf16 %v9881_v33, %v9877_v53  ;;  %9902 = vpow2.f32 %v7957_v39 }
 0x60c   : > { %v9885_v42 = vpop.eup %9884  ;;  %9904 = vrcp.f32 %v6568_v59  ;;  %v6569_v32 = vadd.f32 1.0, %v9883_v7 }
 0x60d   : > { %v9887_v38 = vpop.eup %9886  ;;  %7216 = vst [vmem:[%s12174_s29 + $0xf0] sm:$0xff] %v8080_v44  ;;  %v6574_v26 = vadd.f32 1.0, %v9885_v42  ;;  %9906 = vpow2.f32 %v7958_v28 }
 0x60e   : > { %v9889_v55 = vpop.eup %9888  ;;  %9908 = vrcp.f32 %v6569_v32  ;;  %v6575_v51 = vadd.f32 1.0, %v9887_v38 }
 0x60f   : > { %v9891_v19 = vpop.eup %9890  ;;  %9910 = vrcp.f32 %v6574_v26  ;;  %v6576_v17 = vadd.f32 1.0, %v9889_v55 }
 0x610   : > { %v9893_v5 = vpop.eup %9892  ;;  %9912 = vrcp.f32 %v6575_v51  ;;  %v6581_v54 = vadd.f32 1.0, %v9891_v19 }
 0x611   : > { %v9895_v48 = vpop.eup %9894  ;;  %v8081_v29 = vpack.c.bf16 %v9893_v5, %v9893_v5  ;;  %9914 = vrcp.f32 %v6576_v17 }
 0x612   : > { %v9897_v35 = vpop.eup %9896  ;;  %9916 = vrcp.f32 %v6581_v54 }
 0x613   : > { %v9899_v60 = vpop.eup %9898  ;;  %7217 = vst.msk [vmem:[%s12174_s29 + $0xf8] sm:$0xf] %vm7184_vm1, %v8081_v29  ;;  %v8084_v58 = vpack.c.bf16 %v9897_v35, %v9895_v48  ;;  %9918 = vpow2.f32 %v7963_v4 }
 0x614   : > { %v9901_v52 = vpop.eup %9900  ;;  %v8085_v6 = vpack.c.bf16 %v9899_v60, %v9899_v60  ;;  %9920 = vpow2.f32 %v7964_v31 }
 0x615   : > { %v9903_v46 = vpop.eup %9902  ;;  %7220 = vst [vmem:[%s12174_s29 + $0x10c] sm:$0xff] %v8084_v58  ;;  %9922 = vpow2.f32 %v7965_v22 }
 0x616   : > { %v9905_v57 = vpop.eup %9904  ;;  %7221 = vst.msk [vmem:[%s12174_s29 + $0x114] sm:$0xf] %vm7184_vm1, %v8085_v6  ;;  %v6582_v20 = vadd.f32 1.0, %v9903_v46  ;;  %9924 = vpow2.f32 %v7970_v34 }
 0x617   : > { %v9907_v3 = vpop.eup %9906  ;;  %v8088_v25 = vpack.c.bf16 %v9905_v57, %v9901_v52  ;;  %9926 = vpow2.f32 %v7971_v10 }
 0x618   : > { %v9909_v47 = vpop.eup %9908  ;;  %9928 = vrcp.f32 %v6582_v20  ;;  %v6583_v18 = vadd.f32 1.0, %v9907_v3 }
 0x619   : > { %v9911_v27 = vpop.eup %9910  ;;  %7224 = vst [vmem:[%s12174_s29 + $0x128] sm:$0xff] %v8088_v25  ;;  %v8089_v43 = vpack.c.bf16 %v9909_v47, %v9909_v47  ;;  %9930 = vpow2.f32 %v7972_v2 }
 0x61a   : > { %v9913_v36 = vpop.eup %9912  ;;  %9932 = vrcp.f32 %v6583_v18 }
 0x61b   : > { %v9915_v11 = vpop.eup %9914  ;;  %7225 = vst.msk [vmem:[%s12174_s29 + $0x130] sm:$0xf] %vm7184_vm1, %v8089_v43  ;;  %v8092_v0 = vpack.c.bf16 %v9913_v36, %v9911_v27  ;;  %9934 = vpow2.f32 %v7977_v63 }
 0x61c   : > { %v9917_v56 = vpop.eup %9916  ;;  %v8093_v41 = vpack.c.bf16 %v9915_v11, %v9915_v11  ;;  %9936 = vpow2.f32 %v7978_v61 }
 0x61d   : > { %v9919_v37 = vpop.eup %9918  ;;  %7228 = vst [vmem:[%s12174_s29 + $0x144] sm:$0xff] %v8092_v0  ;;  %9938 = vpow2.f32 %v7979_v40 }
 0x61e   : > { %v9921_v45 = vpop.eup %9920  ;;  %7229 = vst.msk [vmem:[%s12174_s29 + $0x14c] sm:$0xf] %vm7184_vm1, %v8093_v41  ;;  %v6588_v13 = vadd.f32 1.0, %v9919_v37 }
 0x61f   : > { %v9923_v9 = vpop.eup %9922  ;;  %v6589_v8 = vadd.f32 1.0, %v9921_v45 }
 0x620   : > { %v9925_v1 = vpop.eup %9924  ;;  %9940 = vrcp.f32 %v6588_v13  ;;  %v6590_v62 = vadd.f32 1.0, %v9923_v9 }
 0x621   : > { %v9927_v50 = vpop.eup %9926  ;;  %9942 = vrcp.f32 %v6589_v8  ;;  %v6595_v24 = vadd.f32 1.0, %v9925_v1 }
 0x622   : > { %v9929_v14 = vpop.eup %9928  ;;  %9944 = vrcp.f32 %v6590_v62  ;;  %v6596_v12 = vadd.f32 1.0, %v9927_v50 }
 0x623   : > { %v9931_v23 = vpop.eup %9930  ;;  %v8096_v16 = vpack.c.bf16 %v9929_v14, %v9917_v56  ;;  %9946 = vrcp.f32 %v6595_v24 }
 0x624   : > { %v9933_v30 = vpop.eup %9932  ;;  %9948 = vrcp.f32 %v6596_v12  ;;  %v6597_v49 = vadd.f32 1.0, %v9931_v23 }
 0x625   : > { %v9935_v39 = vpop.eup %9934  ;;  %7232 = vst [vmem:[%s12174_s29 + $0x160] sm:$0xff] %v8096_v16  ;;  %v8097_v53 = vpack.c.bf16 %v9933_v30, %v9933_v30 }
 0x626   : > { %v9937_v15 = vpop.eup %9936  ;;  %9950 = vrcp.f32 %v6597_v49  ;;  %v6602_v21 = vadd.f32 1.0, %v9935_v39 }
 0x627   : > { %v9939_v28 = vpop.eup %9938  ;;  %7233 = vst.msk [vmem:[%s12174_s29 + $0x168] sm:$0xf] %vm7184_vm1, %v8097_v53  ;;  %v6603_v33 = vadd.f32 1.0, %v9937_v15 }
 0x628   : > { %9952 = vrcp.f32 %v6602_v21  ;;  %v6604_v59 = vadd.f32 1.0, %v9939_v28 }
 0x629   : > { %9954 = vrcp.f32 %v6603_v33 }
 0x62a   : > { %v9941_v7 = vpop.eup %9940  ;;  %9956 = vrcp.f32 %v6604_v59 }
 0x62b   : > { %v9943_v44 = vpop.eup %9942 }
 0x62c   : > { %v9945_v42 = vpop.eup %9944  ;;  %v8100_v32 = vpack.c.bf16 %v9943_v44, %v9941_v7 }
 0x62d   : > { %v9947_v38 = vpop.eup %9946  ;;  %v8101_v26 = vpack.c.bf16 %v9945_v42, %v9945_v42 }
 0x62e   : > { %v9949_v55 = vpop.eup %9948  ;;  %7236 = vst [vmem:[%s12174_s29 + $0x17c] sm:$0xff] %v8100_v32 }
 0x62f   : > { %7237 = vst.msk [vmem:[%s12174_s29 + $0x184] sm:$0xf] %vm7184_vm1, %v8101_v26  ;;  %v8104_v51 = vpack.c.bf16 %v9949_v55, %v9947_v38 }
 0x630   : > { %v9951_v19 = vpop.eup %9950 }
 0x631   : > { %7240 = vst [vmem:[%s12174_s29 + $0x198] sm:$0xff] %v8104_v51  ;;  %v8105_v17 = vpack.c.bf16 %v9951_v19, %v9951_v19 }
 0x632   : > { %v9953_v4 = vpop.eup %9952 }
 0x633   : > { %v9955_v5 = vpop.eup %9954  ;;  %7241 = vst.msk [vmem:[%s12174_s29 + $0x1a0] sm:$0xf] %vm7184_vm1, %v8105_v17 }
 0x634   : > { %v9957_v54 = vpop.eup %9956  ;;  %v8108_v31 = vpack.c.bf16 %v9955_v5, %v9953_v4 }
 0x635   : > { %v8109_v48 = vpack.c.bf16 %v9957_v54, %v9957_v54 }
 0x636   : > { %7244 = vst [vmem:[%s12174_s29 + $0x1b4] sm:$0xff] %v8108_v31 }
 0x637   : > { %7245 = vst.msk [vmem:[%s12174_s29 + $0x1bc] sm:$0xf] %vm7184_vm1, %v8109_v48 }
 0x638 PF: > { %s22_s17 = sadd.s32 1, %s9965_s17  }
 0x639   : > { %p19_p4 = scmp.ge.s32.totalorder %s22_s17, 4  }
 0x63b   :  { %21 = sbr.rel (!%p19_p4) target bundleno = 1 (0x1), region = 105 }

</bundles_post_ra>
